<compile_context>
chip_gen: v6e
topology: v6e:2x2x1
jax: 0.10.0
libtpu: 0.0.40
codegen_flags: <defaults>
</compile_context>

<pallas_src>
import jax
import jax.numpy as jnp
from jax.experimental import pallas as pl
from jax.experimental.pallas import tpu as pltpu


H1, H2, H3, OUT = 4000, 400, 40, 5
Y_DIM = 5                 # cat((out, y), 1) must have 405 columns -> y has 5 features
OUT_PAD = 128             # lane-dense output slab; sliced back to OUT in the wrapper
assert H2 + Y_DIM == 405  # mirrors the torch.cat shape assert


def _round_up(n, m):
    return ((n + m - 1) // m) * m


# ---------------------------------------------------------------------------
# Fused kernel: fc1 -> relu -> fc2 -> relu -> [cat,y] fc3 -> relu -> fc4
# ---------------------------------------------------------------------------
def _fused_aspectnet3_kernel(x_ref, y_ref,
                             w1_ref, s1_ref, b1_ref,
                             w2_ref, s2_ref, b2_ref,
                             w3a_ref, w3b_ref, b3_ref,
                             w4_ref, b4_ref,
                             o_ref):
    bf16, f32 = jnp.bfloat16, jnp.float32

    # fc1: int8 weight -> bf16 on the VPU.  The per-output-channel scale
    # factors out of the matmul, so it is applied to the (tb, 4000) output
    # together with the bias in one fused VPU pass, then ReLU.
    w1 = w1_ref[...].astype(bf16)
    h = jnp.dot(x_ref[...].astype(bf16), w1, preferred_element_type=f32)
    h = jnp.maximum(h * s1_ref[...] + b1_ref[...], 0.0)

    # fc2 (same int8 scheme)
    w2 = w2_ref[...].astype(bf16)
    h = jnp.dot(h.astype(bf16), w2, preferred_element_type=f32)
    h = jnp.maximum(h * s2_ref[...] + b2_ref[...], 0.0)

    # cat([h, y], 1) @ W3  ==  h @ W3[:400] + y @ W3[400:]
    h3 = jnp.dot(h.astype(bf16), w3a_ref[...], preferred_element_type=f32)
    # K=5 side: unrolled VPU broadcast-mul-add instead of a tiny MXU matmul.
    yv = y_ref[...]
    w3b = w3b_ref[...]
    for k in range(Y_DIM):
        h3 = h3 + yv[:, k:k + 1] * w3b[k:k + 1, :]
    h3 = jnp.maximum(h3 + b3_ref[...], 0.0)

    # fc4 (no activation); output lane-padded to 128, padded columns are zero.
    out = jnp.dot(h3.astype(bf16), w4_ref[...], preferred_element_type=f32)
    o_ref[...] = (out + b4_ref[...]).astype(o_ref.dtype)


# ---------------------------------------------------------------------------
# Wrapper
# ---------------------------------------------------------------------------
def _batch_tile(B):
    # Small B: one grid point, rounded up to the 8-sublane granule.
    # Large B: fixed 128-row tiles (saturates the MXU M dim on v5e; on v6e/v7x
    # it keeps >=2 grid points at B>=256 so "parallel" can use both v7x TCs).
    if B <= 128:
        return max(8, _round_up(B, 8))
    return 128


@jax.jit
def aspect_net3_forward(params, x, y):
    B, K = x.shape
    tb = _batch_tile(B)
    B_pad = _round_up(B, tb)
    nb = B_pad // tb
    if B_pad != B:
        x = jnp.pad(x, ((0, B_pad - B), (0, 0)))
        y = jnp.pad(y, ((0, B_pad - B), (0, 0)))

    row_map = lambda i: (i, 0)   # sliced along batch
    rep_map = lambda i: (0, 0)   # grid-invariant (weights / scales / biases)

    def wspec(shape):
        # Grid-invariant operands: single-buffered (double-buffering a
        # constant-index block only wastes VMEM).
        return pl.BlockSpec(shape, rep_map, pipeline_mode=pl.Buffered(1))

    flops = 2 * B_pad * (K * H1 + H1 * H2 + (H2 + Y_DIM) * H3 + H3 * OUT_PAD)
    weight_bytes = (K * H1 + H1 * H2)                       # int8 fc1/fc2
    weight_bytes += 2 * (H2 * H3 + H3 * OUT_PAD)            # bf16 fc3a/fc4
    weight_bytes += 4 * (Y_DIM * H3 + 2 * H1 + 2 * H2 + H3 + OUT_PAD)  # f32 rest
    io_bytes = 4 * B_pad * (K + Y_DIM + OUT_PAD)
    cost = pl.CostEstimate(flops=flops, transcendentals=0,
                           bytes_accessed=weight_bytes + io_bytes)

    out = pl.pallas_call(
        _fused_aspectnet3_kernel,
        out_shape=jax.ShapeDtypeStruct((B_pad, OUT_PAD), jnp.float32),
        grid=(nb,),
        in_specs=[
            pl.BlockSpec((tb, K), row_map),          # x
            pl.BlockSpec((tb, Y_DIM), row_map),      # y
            wspec((K, H1)),                          # w1 (int8)
            wspec((1, H1)),                          # s1 (f32 scales)
            wspec((1, H1)),                          # b1
            wspec((H1, H2)),                         # w2 (int8)
            wspec((1, H2)),                          # s2
            wspec((1, H2)),                          # b2
            wspec((H2, H3)),                         # w3[:400] (bf16)
            wspec((Y_DIM, H3)),                      # w3[400:] (f32)
            wspec((1, H3)),                          # b3
            wspec((H3, OUT_PAD)),                    # w4 padded (bf16)
            wspec((1, OUT_PAD)),                     # b4 padded
        ],
        out_specs=pl.BlockSpec((tb, OUT_PAD), row_map),
        compiler_params=pltpu.CompilerParams(
            dimension_semantics=("parallel",),
            vmem_limit_bytes=24 << 20,
        ),
        cost_estimate=cost,
    )(x, y,
      params["w1q"], params["s1"], params["b1"],
      params["w2q"], params["s2"], params["b2"],
      params["w3a"], params["w3b"], params["b3"],
      params["w4p"], params["b4p"])

    return out[:B, :OUT]


# ---------------------------------------------------------------------------
# Params (PyTorch-default-style init); fc1/fc2 int8 per-channel, fc3 pre-split,
# fc4 lane-padded to 128 output columns.
# ---------------------------------------------------------------------------
def _quant_int8_per_col(w):
    amax = jnp.max(jnp.abs(w), axis=0, keepdims=True)          # (1, out)
    scale = jnp.maximum(amax, 1e-8) / 127.0
    q = jnp.clip(jnp.round(w / scale), -127.0, 127.0).astype(jnp.int8)
    return q, scale.astype(jnp.float32)


def init_params(data_dim, key):
    ks = jax.random.split(key, 8)

    def lin(kw, kb, fan_in, fan_out):
        bound = 1.0 / jnp.sqrt(jnp.float32(fan_in))
        w = jax.random.uniform(kw, (fan_in, fan_out), jnp.float32, -bound, bound)
        b = jax.random.uniform(kb, (fan_out,), jnp.float32, -bound, bound)
        return w, b

    w1, b1 = lin(ks[0], ks[1], data_dim, H1)
    w2, b2 = lin(ks[2], ks[3], H1, H2)
    w3, b3 = lin(ks[4], ks[5], H2 + Y_DIM, H3)
    w4, b4 = lin(ks[6], ks[7], H3, OUT)

    w1q, s1 = _quant_int8_per_col(w1)
    w2q, s2 = _quant_int8_per_col(w2)

    w4p = jnp.zeros((H3, OUT_PAD), jnp.float32).at[:, :OUT].set(w4)
    b4p = jnp.zeros((OUT_PAD,), jnp.float32).at[:OUT].set(b4)

    return dict(
        w1q=w1q, s1=s1, b1=b1.reshape(1, H1),
        w2q=w2q, s2=s2, b2=b2.reshape(1, H2),
        w3a=w3[:H2].astype(jnp.bfloat16),        # multiplies `out`
        w3b=w3[H2:].astype(jnp.float32),         # multiplies `y` (tiny, f32)
        b3=b3.reshape(1, H3),
        w4p=w4p.astype(jnp.bfloat16),
        b4p=b4p.reshape(1, OUT_PAD),
    )


def reference_forward(params, x, y):
    bf16, f32 = jnp.bfloat16, jnp.float32

    def qdot(a, wq, s):
        return jnp.dot(a.astype(bf16), wq.astype(bf16),
                       preferred_element_type=f32) * s

    h = jnp.maximum(qdot(x, params["w1q"], params["s1"]) + params["b1"], 0.0)
    h = jnp.maximum(qdot(h, params["w2q"], params["s2"]) + params["b2"], 0.0)
    h3 = jnp.dot(h.astype(bf16), params["w3a"], preferred_element_type=f32)
    h3 = h3 + jnp.dot(y, params["w3b"])
    h3 = jnp.maximum(h3 + params["b3"], 0.0)
    out = jnp.dot(h3.astype(bf16), params["w4p"],
                  preferred_element_type=f32) + params["b4p"]
    return out[:, :OUT]


if __name__ == "__main__":
    data_dim = 32
    batch = 2

    key = jax.random.PRNGKey(0)
    kp, kx, ky = jax.random.split(key, 3)

    params = init_params(data_dim, kp)
    x = jax.random.normal(kx, (batch, data_dim), jnp.float32)
    y = jax.random.normal(ky, (batch, Y_DIM), jnp.float32)

    out = aspect_net3_forward(params, x, y)
    out = jax.block_until_ready(out)

    ref = reference_forward(params, x, y)
    assert out.shape == (batch, OUT), out.shape
    assert jnp.allclose(out, ref, atol=2e-2, rtol=2e-2), "mismatch vs reference"

    print("KERNEL_OK")
</pallas_src>

<mosaic_0001>
module attributes {stable_mosaic.version = 11 : i64} {
  func.func @_fused_aspectnet3_kernel(%arg0: i32, %arg1: memref<8x32xf32, #tpu.memory_space<vmem>>, %arg2: memref<8x5xf32, #tpu.memory_space<vmem>>, %arg3: memref<32x4000xi8, #tpu.memory_space<vmem>>, %arg4: memref<1x4000xf32, #tpu.memory_space<vmem>>, %arg5: memref<1x4000xf32, #tpu.memory_space<vmem>>, %arg6: memref<4000x400xi8, #tpu.memory_space<vmem>>, %arg7: memref<1x400xf32, #tpu.memory_space<vmem>>, %arg8: memref<1x400xf32, #tpu.memory_space<vmem>>, %arg9: memref<400x40xbf16, #tpu.memory_space<vmem>>, %arg10: memref<5x40xf32, #tpu.memory_space<vmem>>, %arg11: memref<1x40xf32, #tpu.memory_space<vmem>>, %arg12: memref<40x128xbf16, #tpu.memory_space<vmem>>, %arg13: memref<1x128xf32, #tpu.memory_space<vmem>>, %arg14: memref<8x128xf32, #tpu.memory_space<vmem>>) attributes {dimension_semantics = [#tpu.dimension_semantics<parallel>], iteration_bounds = array<i64: 1>, scalar_prefetch = 0 : i64, scratch_operands = 0 : i64, tpu.core_type = #tpu.core_type<tc>, window_params = [{transform_indices = @transform_0, window_bounds = array<i64: 8, 32>}, {transform_indices = @transform_1, window_bounds = array<i64: 8, 5>}, {pipeline_mode = #tpu.pipeline_mode<synchronous>, transform_indices = @transform_2, window_bounds = array<i64: 32, 4000>}, {pipeline_mode = #tpu.pipeline_mode<synchronous>, transform_indices = @transform_3, window_bounds = array<i64: 1, 4000>}, {pipeline_mode = #tpu.pipeline_mode<synchronous>, transform_indices = @transform_4, window_bounds = array<i64: 1, 4000>}, {pipeline_mode = #tpu.pipeline_mode<synchronous>, transform_indices = @transform_5, window_bounds = array<i64: 4000, 400>}, {pipeline_mode = #tpu.pipeline_mode<synchronous>, transform_indices = @transform_6, window_bounds = array<i64: 1, 400>}, {pipeline_mode = #tpu.pipeline_mode<synchronous>, transform_indices = @transform_7, window_bounds = array<i64: 1, 400>}, {pipeline_mode = #tpu.pipeline_mode<synchronous>, transform_indices = @transform_8, window_bounds = array<i64: 400, 40>}, {pipeline_mode = #tpu.pipeline_mode<synchronous>, transform_indices = @transform_9, window_bounds = array<i64: 5, 40>}, {pipeline_mode = #tpu.pipeline_mode<synchronous>, transform_indices = @transform_10, window_bounds = array<i64: 1, 40>}, {pipeline_mode = #tpu.pipeline_mode<synchronous>, transform_indices = @transform_11, window_bounds = array<i64: 40, 128>}, {pipeline_mode = #tpu.pipeline_mode<synchronous>, transform_indices = @transform_12, window_bounds = array<i64: 1, 128>}, {transform_indices = @transform_13, window_bounds = array<i64: 8, 128>}]} {
    %c0 = arith.constant 0 : index
    %c0_0 = arith.constant 0 : index
    %0 = vector.load %arg3[%c0, %c0_0] : memref<32x4000xi8, #tpu.memory_space<vmem>>, vector<32x4000xi8>
    %1 = arith.sitofp %0 : vector<32x4000xi8> to vector<32x4000xbf16>
    %c0_1 = arith.constant 0 : index
    %c0_2 = arith.constant 0 : index
    %2 = vector.load %arg1[%c0_1, %c0_2] : memref<8x32xf32, #tpu.memory_space<vmem>>, vector<8x32xf32>
    %3 = arith.truncf %2 : vector<8x32xf32> to vector<8x32xbf16>
    %cst = arith.constant dense<0.000000e+00> : vector<8x4000xf32>
    %4 = tpu.matmul %3, %1, %cst {dimension_numbers = #tpu.dot_dimension_numbers<[1], [0], [0], [1], [0, 0, 1, 1], [], []>} : vector<8x32xbf16>, vector<32x4000xbf16>, vector<8x4000xf32> -> vector<8x4000xf32>
    %c0_3 = arith.constant 0 : index
    %c0_4 = arith.constant 0 : index
    %5 = vector.load %arg4[%c0_3, %c0_4] : memref<1x4000xf32, #tpu.memory_space<vmem>>, vector<1x4000xf32>
    %6 = vector.broadcast %5 : vector<1x4000xf32> to vector<8x4000xf32>
    %7 = arith.mulf %4, %6 : vector<8x4000xf32>
    %c0_5 = arith.constant 0 : index
    %c0_6 = arith.constant 0 : index
    %8 = vector.load %arg5[%c0_5, %c0_6] : memref<1x4000xf32, #tpu.memory_space<vmem>>, vector<1x4000xf32>
    %9 = vector.broadcast %8 : vector<1x4000xf32> to vector<8x4000xf32>
    %10 = arith.addf %7, %9 : vector<8x4000xf32>
    %cst_7 = arith.constant 0.000000e+00 : f32
    %11 = vector.broadcast %cst_7 : f32 to vector<8x4000xf32>
    %12 = arith.maximumf %10, %11 : vector<8x4000xf32>
    %c0_8 = arith.constant 0 : index
    %c0_9 = arith.constant 0 : index
    %13 = vector.load %arg6[%c0_8, %c0_9] : memref<4000x400xi8, #tpu.memory_space<vmem>>, vector<4000x400xi8>
    %14 = arith.sitofp %13 : vector<4000x400xi8> to vector<4000x400xbf16>
    %15 = arith.truncf %12 : vector<8x4000xf32> to vector<8x4000xbf16>
    %cst_10 = arith.constant dense<0.000000e+00> : vector<8x400xf32>
    %16 = tpu.matmul %15, %14, %cst_10 {dimension_numbers = #tpu.dot_dimension_numbers<[1], [0], [0], [1], [0, 0, 1, 1], [], []>} : vector<8x4000xbf16>, vector<4000x400xbf16>, vector<8x400xf32> -> vector<8x400xf32>
    %c0_11 = arith.constant 0 : index
    %c0_12 = arith.constant 0 : index
    %17 = vector.load %arg7[%c0_11, %c0_12] : memref<1x400xf32, #tpu.memory_space<vmem>>, vector<1x400xf32>
    %18 = vector.broadcast %17 : vector<1x400xf32> to vector<8x400xf32>
    %19 = arith.mulf %16, %18 : vector<8x400xf32>
    %c0_13 = arith.constant 0 : index
    %c0_14 = arith.constant 0 : index
    %20 = vector.load %arg8[%c0_13, %c0_14] : memref<1x400xf32, #tpu.memory_space<vmem>>, vector<1x400xf32>
    %21 = vector.broadcast %20 : vector<1x400xf32> to vector<8x400xf32>
    %22 = arith.addf %19, %21 : vector<8x400xf32>
    %cst_15 = arith.constant 0.000000e+00 : f32
    %23 = vector.broadcast %cst_15 : f32 to vector<8x400xf32>
    %24 = arith.maximumf %22, %23 : vector<8x400xf32>
    %25 = arith.truncf %24 : vector<8x400xf32> to vector<8x400xbf16>
    %c0_16 = arith.constant 0 : index
    %c0_17 = arith.constant 0 : index
    %26 = vector.load %arg9[%c0_16, %c0_17] : memref<400x40xbf16, #tpu.memory_space<vmem>>, vector<400x40xbf16>
    %cst_18 = arith.constant dense<0.000000e+00> : vector<8x40xf32>
    %27 = tpu.matmul %25, %26, %cst_18 {dimension_numbers = #tpu.dot_dimension_numbers<[1], [0], [0], [1], [0, 0, 1, 1], [], []>} : vector<8x400xbf16>, vector<400x40xbf16>, vector<8x40xf32> -> vector<8x40xf32>
    %c0_19 = arith.constant 0 : index
    %c0_20 = arith.constant 0 : index
    %28 = vector.load %arg2[%c0_19, %c0_20] : memref<8x5xf32, #tpu.memory_space<vmem>>, vector<8x5xf32>
    %c0_21 = arith.constant 0 : index
    %c0_22 = arith.constant 0 : index
    %29 = vector.load %arg10[%c0_21, %c0_22] : memref<5x40xf32, #tpu.memory_space<vmem>>, vector<5x40xf32>
    %30 = vector.extract_strided_slice %28 {offsets = [0, 0], sizes = [8, 1], strides = [1, 1]} : vector<8x5xf32> to vector<8x1xf32>
    %31 = vector.extract_strided_slice %29 {offsets = [0, 0], sizes = [1, 40], strides = [1, 1]} : vector<5x40xf32> to vector<1x40xf32>
    %32 = vector.broadcast %30 : vector<8x1xf32> to vector<8x40xf32>
    %33 = vector.broadcast %31 : vector<1x40xf32> to vector<8x40xf32>
    %34 = arith.mulf %32, %33 : vector<8x40xf32>
    %35 = arith.addf %27, %34 : vector<8x40xf32>
    %36 = vector.extract_strided_slice %28 {offsets = [0, 1], sizes = [8, 1], strides = [1, 1]} : vector<8x5xf32> to vector<8x1xf32>
    %37 = vector.extract_strided_slice %29 {offsets = [1, 0], sizes = [1, 40], strides = [1, 1]} : vector<5x40xf32> to vector<1x40xf32>
    %38 = vector.broadcast %36 : vector<8x1xf32> to vector<8x40xf32>
    %39 = vector.broadcast %37 : vector<1x40xf32> to vector<8x40xf32>
    %40 = arith.mulf %38, %39 : vector<8x40xf32>
    %41 = arith.addf %35, %40 : vector<8x40xf32>
    %42 = vector.extract_strided_slice %28 {offsets = [0, 2], sizes = [8, 1], strides = [1, 1]} : vector<8x5xf32> to vector<8x1xf32>
    %43 = vector.extract_strided_slice %29 {offsets = [2, 0], sizes = [1, 40], strides = [1, 1]} : vector<5x40xf32> to vector<1x40xf32>
    %44 = vector.broadcast %42 : vector<8x1xf32> to vector<8x40xf32>
    %45 = vector.broadcast %43 : vector<1x40xf32> to vector<8x40xf32>
    %46 = arith.mulf %44, %45 : vector<8x40xf32>
    %47 = arith.addf %41, %46 : vector<8x40xf32>
    %48 = vector.extract_strided_slice %28 {offsets = [0, 3], sizes = [8, 1], strides = [1, 1]} : vector<8x5xf32> to vector<8x1xf32>
    %49 = vector.extract_strided_slice %29 {offsets = [3, 0], sizes = [1, 40], strides = [1, 1]} : vector<5x40xf32> to vector<1x40xf32>
    %50 = vector.broadcast %48 : vector<8x1xf32> to vector<8x40xf32>
    %51 = vector.broadcast %49 : vector<1x40xf32> to vector<8x40xf32>
    %52 = arith.mulf %50, %51 : vector<8x40xf32>
    %53 = arith.addf %47, %52 : vector<8x40xf32>
    %54 = vector.extract_strided_slice %28 {offsets = [0, 4], sizes = [8, 1], strides = [1, 1]} : vector<8x5xf32> to vector<8x1xf32>
    %55 = vector.extract_strided_slice %29 {offsets = [4, 0], sizes = [1, 40], strides = [1, 1]} : vector<5x40xf32> to vector<1x40xf32>
    %56 = vector.broadcast %54 : vector<8x1xf32> to vector<8x40xf32>
    %57 = vector.broadcast %55 : vector<1x40xf32> to vector<8x40xf32>
    %58 = arith.mulf %56, %57 : vector<8x40xf32>
    %59 = arith.addf %53, %58 : vector<8x40xf32>
    %c0_23 = arith.constant 0 : index
    %c0_24 = arith.constant 0 : index
    %60 = vector.load %arg11[%c0_23, %c0_24] : memref<1x40xf32, #tpu.memory_space<vmem>>, vector<1x40xf32>
    %61 = vector.broadcast %60 : vector<1x40xf32> to vector<8x40xf32>
    %62 = arith.addf %59, %61 : vector<8x40xf32>
    %cst_25 = arith.constant 0.000000e+00 : f32
    %63 = vector.broadcast %cst_25 : f32 to vector<8x40xf32>
    %64 = arith.maximumf %62, %63 : vector<8x40xf32>
    %65 = arith.truncf %64 : vector<8x40xf32> to vector<8x40xbf16>
    %c0_26 = arith.constant 0 : index
    %c0_27 = arith.constant 0 : index
    %66 = vector.load %arg12[%c0_26, %c0_27] : memref<40x128xbf16, #tpu.memory_space<vmem>>, vector<40x128xbf16>
    %cst_28 = arith.constant dense<0.000000e+00> : vector<8x128xf32>
    %67 = tpu.matmul %65, %66, %cst_28 {dimension_numbers = #tpu.dot_dimension_numbers<[1], [0], [0], [1], [0, 0, 1, 1], [], []>} : vector<8x40xbf16>, vector<40x128xbf16>, vector<8x128xf32> -> vector<8x128xf32>
    %c0_29 = arith.constant 0 : index
    %c0_30 = arith.constant 0 : index
    %68 = vector.load %arg13[%c0_29, %c0_30] : memref<1x128xf32, #tpu.memory_space<vmem>>, vector<1x128xf32>
    %69 = vector.broadcast %68 : vector<1x128xf32> to vector<8x128xf32>
    %70 = arith.addf %67, %69 : vector<8x128xf32>
    %c0_31 = arith.constant 0 : index
    %c0_32 = arith.constant 0 : index
    %71 = vector.load %arg14[%c0_31, %c0_32] : memref<8x128xf32, #tpu.memory_space<vmem>>, vector<8x128xf32>
    tpu.vector_store %arg14[%c0_31, %c0_32], %70 {strides = array<i32>} : memref<8x128xf32, #tpu.memory_space<vmem>>, vector<8x128xf32>,
    return
  }
  func.func @transform_0(%arg0: i32) -> (i32, i32) {
    %c0_i32 = arith.constant 0 : i32
    %c0_i32_0 = arith.constant 0 : i32
    return %arg0, %c0_i32 : i32, i32
  }
  func.func @transform_1(%arg0: i32) -> (i32, i32) {
    %c0_i32 = arith.constant 0 : i32
    %c0_i32_0 = arith.constant 0 : i32
    return %arg0, %c0_i32 : i32, i32
  }
  func.func @transform_2(%arg0: i32) -> (i32, i32) {
    %c0_i32 = arith.constant 0 : i32
    %c0_i32_0 = arith.constant 0 : i32
    %c0_i32_1 = arith.constant 0 : i32
    return %c0_i32, %c0_i32_0 : i32, i32
  }
  func.func @transform_3(%arg0: i32) -> (i32, i32) {
    %c0_i32 = arith.constant 0 : i32
    %c0_i32_0 = arith.constant 0 : i32
    %c0_i32_1 = arith.constant 0 : i32
    return %c0_i32, %c0_i32_0 : i32, i32
  }
  func.func @transform_4(%arg0: i32) -> (i32, i32) {
    %c0_i32 = arith.constant 0 : i32
    %c0_i32_0 = arith.constant 0 : i32
    %c0_i32_1 = arith.constant 0 : i32
    return %c0_i32, %c0_i32_0 : i32, i32
  }
  func.func @transform_5(%arg0: i32) -> (i32, i32) {
    %c0_i32 = arith.constant 0 : i32
    %c0_i32_0 = arith.constant 0 : i32
    %c0_i32_1 = arith.constant 0 : i32
    return %c0_i32, %c0_i32_0 : i32, i32
  }
  func.func @transform_6(%arg0: i32) -> (i32, i32) {
    %c0_i32 = arith.constant 0 : i32
    %c0_i32_0 = arith.constant 0 : i32
    %c0_i32_1 = arith.constant 0 : i32
    return %c0_i32, %c0_i32_0 : i32, i32
  }
  func.func @transform_7(%arg0: i32) -> (i32, i32) {
    %c0_i32 = arith.constant 0 : i32
    %c0_i32_0 = arith.constant 0 : i32
    %c0_i32_1 = arith.constant 0 : i32
    return %c0_i32, %c0_i32_0 : i32, i32
  }
  func.func @transform_8(%arg0: i32) -> (i32, i32) {
    %c0_i32 = arith.constant 0 : i32
    %c0_i32_0 = arith.constant 0 : i32
    %c0_i32_1 = arith.constant 0 : i32
    return %c0_i32, %c0_i32_0 : i32, i32
  }
  func.func @transform_9(%arg0: i32) -> (i32, i32) {
    %c0_i32 = arith.constant 0 : i32
    %c0_i32_0 = arith.constant 0 : i32
    %c0_i32_1 = arith.constant 0 : i32
    return %c0_i32, %c0_i32_0 : i32, i32
  }
  func.func @transform_10(%arg0: i32) -> (i32, i32) {
    %c0_i32 = arith.constant 0 : i32
    %c0_i32_0 = arith.constant 0 : i32
    %c0_i32_1 = arith.constant 0 : i32
    return %c0_i32, %c0_i32_0 : i32, i32
  }
  func.func @transform_11(%arg0: i32) -> (i32, i32) {
    %c0_i32 = arith.constant 0 : i32
    %c0_i32_0 = arith.constant 0 : i32
    %c0_i32_1 = arith.constant 0 : i32
    return %c0_i32, %c0_i32_0 : i32, i32
  }
  func.func @transform_12(%arg0: i32) -> (i32, i32) {
    %c0_i32 = arith.constant 0 : i32
    %c0_i32_0 = arith.constant 0 : i32
    %c0_i32_1 = arith.constant 0 : i32
    return %c0_i32, %c0_i32_0 : i32, i32
  }
  func.func @transform_13(%arg0: i32) -> (i32, i32) {
    %c0_i32 = arith.constant 0 : i32
    %c0_i32_0 = arith.constant 0 : i32
    return %arg0, %c0_i32 : i32, i32
  }
}

</mosaic_0001>

<bundles_post_ra>
// kernel: aspect_net3_forward.1
= control target key start
LH: loop header
LB: loop body
LE: loop exit
PB: predicated region body
PF: predicated region fallthrough
CT: control target
= control target key end

     0   :  { %v7092_v3 = vmov 0   ;;  %vm143_vm0 = vcmask 261120   ;;  %vm4354_vm1 = vcmask 130048   ;;  %vm4519_vm2 = vcmask 1043456   ;;  %s7078_s2 = inlined_call_operand.vmem [shape: s8[32,4000], index: 2, kind: input, shape index: {}]   ;;  %s7079_s0 = inlined_call_operand.vmem [shape: f32[8,32], index: 0, kind: input, shape index: {}]   ;;  %s7080_s5 = inlined_call_operand.vmem [shape: s8[4000,400], index: 5, kind: input, shape index: {}]   ;;  %s7081_s3 = inlined_call_operand.vmem [shape: f32[1,4000], index: 3, kind: input, shape index: {}]   ;;  %s7082_s4 = inlined_call_operand.vmem [shape: f32[1,4000], index: 4, kind: input, shape index: {}]   ;;  %s7083_s8 = inlined_call_operand.vmem [shape: bf16[400,40], index: 8, kind: input, shape index: {}]   ;;  %s7084_s1 = inlined_call_operand.vmem [shape: f32[8,5], index: 1, kind: input, shape index: {}]   ;;  %s7085_s6 = inlined_call_operand.vmem [shape: f32[1,400], index: 6, kind: input, shape index: {}]   ;;  %s7086_s7 = inlined_call_operand.vmem [shape: f32[1,400], index: 7, kind: input, shape index: {}]   ;;  %s7087_s11 = inlined_call_operand.vmem [shape: bf16[40,128], index: 11, kind: input, shape index: {}]   ;;  %s7088_s9 = inlined_call_operand.vmem [shape: f32[5,40], index: 9, kind: input, shape index: {}]   ;;  %s7089_s10 = inlined_call_operand.vmem [shape: f32[1,40], index: 10, kind: input, shape index: {}]   ;;  %s7090_s12 = inlined_call_operand.vmem [shape: f32[1,128], index: 12, kind: input, shape index: {}]   ;;  %s7091_s13 = inlined_call_operand.vmem [shape: f32[8,128], index: 13, kind: output, shape index: {}]  }
   0x1   :  { %v46_v0 = vld [vmem:[%s7078_s2 + $0x8] sm:$0xff]  ;;  %v48_v1 = vld [vmem:[%s7078_s2 + $0x18] sm:$0xff]  ;;  %v45_v2 = vld [vmem:[%s7078_s2] sm:$0xff]  ;;  %179 = vmatprep.mubr.bf16.mxu0 %v7092_v3  ;;  %220 = vmatprep.mubr.bf16.mxu1 %v7092_v3  ;;  %vm4705_vm3 = vmmov 0   ;;  %vm4515_vm4 = vcmask 326656  }
   0x2   :  { %v78_v4 = vunpack.c.l.s8.bf16 %v46_v0  ;;  %v110_v5 = vunpack.c.h.s8.bf16 %v46_v0  ;;  %v80_v6 = vunpack.c.l.s8.bf16 %v48_v1  ;;  %v112_v7 = vunpack.c.h.s8.bf16 %v48_v1  ;;  %v47_v8 = vld [vmem:[%s7078_s2 + $0x10] sm:$0xff]  ;;  %4661 = vset.pattern.permute.xlu0 %v7092_v3  ;;  %v52_v11 = vld [vmem:[%s7078_s2 + $0x38] sm:$0xff]  ;;  %v50_v12 = vld [vmem:[%s7078_s2 + $0x28] sm:$0xff] }
   0x3   :  { %v109_v9 = vunpack.c.h.s8.bf16 %v45_v2  ;;  %v111_v10 = vunpack.c.h.s8.bf16 %v47_v8  ;;  %v77_v13 = vunpack.c.l.s8.bf16 %v45_v2  ;;  %v79_v14 = vunpack.c.l.s8.bf16 %v47_v8  ;;  %v141_v15 = vld [vmem:[%s7079_s0] sm:$0xff]  ;;  %v51_v17 = vld [vmem:[%s7078_s2 + $0x30] sm:$0xff]  ;;  %v56_v25 = vld [vmem:[%s7078_s2 + $0x58] sm:$0xff] }
   0x4   :  { %159 = vmatprep.subr.bf16.mxu0 %v110_v5  ;;  %200 = vmatprep.subr.bf16.mxu1 %v112_v7  ;;  %v116_v16 = vunpack.c.h.s8.bf16 %v52_v11  ;;  %v114_v18 = vunpack.c.h.s8.bf16 %v50_v12  ;;  %v49_v19 = vld [vmem:[%s7078_s2 + $0x20] sm:$0xff]  ;;  %v4806_v20 = vpack.c.bf16 %v141_v15, %v141_v15  ;;  %v115_v21 = vunpack.c.h.s8.bf16 %v51_v17  ;;  %v54_v26 = vld [vmem:[%s7078_s2 + $0x48] sm:$0xff]  ;;  %v55_v30 = vld [vmem:[%s7078_s2 + $0x50] sm:$0xff] }
   0x5   :  { %160 = vmatpush1.bf16.msra.mxu0 %v109_v9  ;;  %201 = vmatpush1.bf16.msra.mxu1 %v111_v10  ;;  %v113_v22 = vunpack.c.h.s8.bf16 %v49_v19  ;;  %v84_v23 = vunpack.c.l.s8.bf16 %v52_v11  ;;  %v82_v24 = vunpack.c.l.s8.bf16 %v50_v12  ;;  %v83_v27 = vunpack.c.l.s8.bf16 %v51_v17  ;;  %v53_v32 = vld [vmem:[%s7078_s2 + $0x40] sm:$0xff]  ;;  %v60_v37 = vld [vmem:[%s7078_s2 + $0x78] sm:$0xff]  ;;  %v58_v38 = vld [vmem:[%s7078_s2 + $0x68] sm:$0xff] }
   0x6   :  { %161 = vmatprep.subr.bf16.mxu0 %v78_v4  ;;  %202 = vmatprep.subr.bf16.mxu1 %v80_v6  ;;  %v81_v28 = vunpack.c.l.s8.bf16 %v49_v19  ;;  %v120_v29 = vunpack.c.h.s8.bf16 %v56_v25  ;;  %v118_v31 = vunpack.c.h.s8.bf16 %v54_v26  ;;  %v119_v33 = vunpack.c.h.s8.bf16 %v55_v30  ;;  %v59_v42 = vld [vmem:[%s7078_s2 + $0x70] sm:$0xff]  ;;  %v57_v44 = vld [vmem:[%s7078_s2 + $0x60] sm:$0xff]  ;;  %v64_v49 = vld [vmem:[%s7078_s2 + $0x98] sm:$0xff] }
   0x7   :  { %v117_v34 = vunpack.c.h.s8.bf16 %v53_v32  ;;  %v88_v35 = vunpack.c.l.s8.bf16 %v56_v25  ;;  %v86_v36 = vunpack.c.l.s8.bf16 %v54_v26  ;;  %v87_v39 = vunpack.c.l.s8.bf16 %v55_v30  ;;  %v62_v50 = vld [vmem:[%s7078_s2 + $0x88] sm:$0xff]  ;;  %v63_v54 = vld [vmem:[%s7078_s2 + $0x90] sm:$0xff]  ;;  %v61_v56 = vld [vmem:[%s7078_s2 + $0x80] sm:$0xff] }
   0x8   :  { %v85_v40 = vunpack.c.l.s8.bf16 %v53_v32  ;;  %v124_v41 = vunpack.c.h.s8.bf16 %v60_v37  ;;  %v122_v43 = vunpack.c.h.s8.bf16 %v58_v38  ;;  %v123_v45 = vunpack.c.h.s8.bf16 %v59_v42  ;;  %v68_v61 = vld [vmem:[%s7078_s2 + $0xb8] sm:$0xff]  ;;  %v66_v62 = vld [vmem:[%s7078_s2 + $0xa8] sm:$0xff]  ;;  %v67_v2 = vld [vmem:[%s7078_s2 + $0xb0] sm:$0xff] }
   0x9   :  { %162 = vmatpush1.bf16.msra.mxu0 %v77_v13  ;;  %203 = vmatpush1.bf16.msra.mxu1 %v79_v14  ;;  %v121_v46 = vunpack.c.h.s8.bf16 %v57_v44  ;;  %v92_v47 = vunpack.c.l.s8.bf16 %v60_v37  ;;  %v90_v48 = vunpack.c.l.s8.bf16 %v58_v38  ;;  %v91_v51 = vunpack.c.l.s8.bf16 %v59_v42  ;;  %v65_v5 = vld [vmem:[%s7078_s2 + $0xa0] sm:$0xff]  ;;  %v72_v10 = vld [vmem:[%s7078_s2 + $0xd8] sm:$0xff]  ;;  %v70_v11 = vld [vmem:[%s7078_s2 + $0xc8] sm:$0xff] }
   0xa   :  { %282 = vmatprep.subr.bf16.mxu1 %v116_v16  ;;  %241 = vmatprep.subr.bf16.mxu0 %v114_v18  ;;  %v89_v52 = vunpack.c.l.s8.bf16 %v57_v44  ;;  %v128_v53 = vunpack.c.h.s8.bf16 %v64_v49  ;;  %v126_v55 = vunpack.c.h.s8.bf16 %v62_v50  ;;  %v127_v57 = vunpack.c.h.s8.bf16 %v63_v54  ;;  %v71_v15 = vld [vmem:[%s7078_s2 + $0xd0] sm:$0xff]  ;;  %v69_v17 = vld [vmem:[%s7078_s2 + $0xc0] sm:$0xff] }
   0xb   :  { %v125_v58 = vunpack.c.h.s8.bf16 %v61_v56  ;;  %v96_v59 = vunpack.c.l.s8.bf16 %v64_v49  ;;  %v94_v60 = vunpack.c.l.s8.bf16 %v62_v50  ;;  %v95_v63 = vunpack.c.l.s8.bf16 %v63_v54  ;;  %v73_v30 = vld [vmem:[%s7078_s2 + $0xe0] sm:$0xff] }
   0xc   :  { %4568 = vmatmul.mubr.msk.bf16.vlgmr.msra.gmra.mxu0 %vm143_vm0, %v4806_v20  ;;  %4569 = vmatmul.mubr.msk.bf16.vlgmr.msra.gmra.mxu1 %vm143_vm0, %v4806_v20  ;;  %v93_v0 = vunpack.c.l.s8.bf16 %v61_v56  ;;  %v132_v1 = vunpack.c.h.s8.bf16 %v68_v61  ;;  %v130_v4 = vunpack.c.h.s8.bf16 %v66_v62  ;;  %v131_v6 = vunpack.c.h.s8.bf16 %v67_v2  ;;  %v1279_v42 = vld [vmem:[%s7080_s5 + $0x160] sm:$0xff] }
   0xd   :  { %283 = vmatpush1.bf16.msra.mxu1 %v115_v21  ;;  %242 = vmatpush1.bf16.msra.mxu0 %v113_v22  ;;  %v129_v7 = vunpack.c.h.s8.bf16 %v65_v5  ;;  %v100_v8 = vunpack.c.l.s8.bf16 %v68_v61  ;;  %v98_v9 = vunpack.c.l.s8.bf16 %v66_v62  ;;  %v99_v12 = vunpack.c.l.s8.bf16 %v67_v2  ;;  %v1275_v54 = vld [vmem:[%s7080_s5 + $0x140] sm:$0xff] }
   0xe   :  { %284 = vmatprep.subr.bf16.mxu1 %v84_v23  ;;  %243 = vmatprep.subr.bf16.mxu0 %v82_v24  ;;  %v97_v13 = vunpack.c.l.s8.bf16 %v65_v5  ;;  %v136_v14 = vunpack.c.h.s8.bf16 %v72_v10  ;;  %v134_v16 = vunpack.c.h.s8.bf16 %v70_v11  ;;  %v135_v18 = vunpack.c.h.s8.bf16 %v71_v15  ;;  %v76_v23 = vld [vmem:[%s7078_s2 + $0xf8] sm:$0xff]  ;;  %v74_v24 = vld [vmem:[%s7078_s2 + $0xe8] sm:$0xff] }
   0xf   :  { %302 = vmatprep.mubr.bf16.mxu1 %v7092_v3  ;;  %261 = vmatprep.mubr.bf16.mxu0 %v7092_v3  ;;  %v133_v19 = vunpack.c.h.s8.bf16 %v69_v17  ;;  %v104_v21 = vunpack.c.l.s8.bf16 %v72_v10  ;;  %v102_v22 = vunpack.c.l.s8.bf16 %v70_v11  ;;  %v103_v25 = vunpack.c.l.s8.bf16 %v71_v15 }
  0x10   :  { %v101_v26 = vunpack.c.l.s8.bf16 %v69_v17  ;;  %v137_v32 = vunpack.c.h.s8.bf16 %v73_v30  ;;  %v105_v38 = vunpack.c.l.s8.bf16 %v73_v30  ;;  %v1827_v44 = vunpack.c.h.s8.bf16 %v1279_v42 }
  0x11   :  { %285 = vmatpush1.bf16.msra.mxu1 %v83_v27  ;;  %244 = vmatpush1.bf16.msra.mxu0 %v81_v28  ;;  %v140_v27 = vunpack.c.h.s8.bf16 %v76_v23  ;;  %v75_v28 = vld [vmem:[%s7078_s2 + $0xf0] sm:$0xff]  ;;  %v1823_v50 = vunpack.c.l.s8.bf16 %v1279_v42  ;;  %v1815_v61 = vunpack.c.l.s8.bf16 %v1275_v54 }
  0x12   :  { %364 = vmatprep.subr.bf16.mxu1 %v120_v29  ;;  %323 = vmatprep.subr.bf16.mxu0 %v118_v31  ;;  %v138_v29 = vunpack.c.h.s8.bf16 %v74_v24  ;;  %v139_v31 = vunpack.c.h.s8.bf16 %v75_v28  ;;  %v107_v37 = vunpack.c.l.s8.bf16 %v75_v28 }
  0x14   :  { %4571 = vmatmul.mubr.msk.bf16.vlgmr.msra.gmra.mxu1 %vm143_vm0, %v4806_v20  ;;  %4570 = vmatmul.mubr.msk.bf16.vlgmr.msra.gmra.mxu0 %vm143_vm0, %v4806_v20 }
  0x15   :  { %365 = vmatpush1.bf16.msra.mxu1 %v119_v33  ;;  %324 = vmatpush1.bf16.msra.mxu0 %v117_v34  ;;  %v108_v33 = vunpack.c.l.s8.bf16 %v76_v23  ;;  %v106_v34 = vunpack.c.l.s8.bf16 %v74_v24 }
  0x16   :  { %366 = vmatprep.subr.bf16.mxu1 %v88_v35  ;;  %325 = vmatprep.subr.bf16.mxu0 %v86_v36  ;;  %v1248_v35 = vld [vmem:[%s7080_s5 + $0x68] sm:$0xff] }
  0x17   :  { %384 = vmatprep.mubr.bf16.mxu1 %v7092_v3  ;;  %343 = vmatprep.mubr.bf16.mxu0 %v7092_v3  ;;  %v1280_v36 = vld [vmem:[%s7080_s5 + $0x168] sm:$0xff] }
  0x19   :  { %367 = vmatpush1.bf16.msra.mxu1 %v87_v39  ;;  %326 = vmatpush1.bf16.msra.mxu0 %v85_v40  ;;  %v1764_v39 = vunpack.c.h.s8.bf16 %v1248_v35  ;;  %v1828_v40 = vunpack.c.h.s8.bf16 %v1280_v36 }
  0x1a   :  { %446 = vmatprep.subr.bf16.mxu1 %v124_v41  ;;  %405 = vmatprep.subr.bf16.mxu0 %v122_v43  ;;  %v1247_v41 = vld [vmem:[%s7080_s5 + $0x60] sm:$0xff] }
  0x1b   :  { %v1763_v43 = vunpack.c.h.s8.bf16 %v1247_v41  ;;  %v1759_v49 = vunpack.c.l.s8.bf16 %v1247_v41 }
  0x1c   :  { %4573 = vmatmul.mubr.msk.bf16.vlgmr.msra.gmra.mxu1 %vm143_vm0, %v4806_v20  ;;  %4572 = vmatmul.mubr.msk.bf16.vlgmr.msra.gmra.mxu0 %vm143_vm0, %v4806_v20 }
  0x1d   :  { %447 = vmatpush1.bf16.msra.mxu1 %v123_v45  ;;  %406 = vmatpush1.bf16.msra.mxu0 %v121_v46  ;;  %v1760_v45 = vunpack.c.l.s8.bf16 %v1248_v35  ;;  %v1824_v46 = vunpack.c.l.s8.bf16 %v1280_v36 }
  0x1e   :  { %448 = vmatprep.subr.bf16.mxu1 %v92_v47  ;;  %407 = vmatprep.subr.bf16.mxu0 %v90_v48  ;;  %v1244_v47 = vld [vmem:[%s7080_s5 + $0x48] sm:$0xff] }
  0x1f   :  { %466 = vmatprep.mubr.bf16.mxu1 %v7092_v3  ;;  %425 = vmatprep.mubr.bf16.mxu0 %v7092_v3  ;;  %v1276_v48 = vld [vmem:[%s7080_s5 + $0x148] sm:$0xff]  ;;  %v1752_v56 = vunpack.c.l.s8.bf16 %v1244_v47 }
  0x21   :  { %449 = vmatpush1.bf16.msra.mxu1 %v91_v51  ;;  %408 = vmatpush1.bf16.msra.mxu0 %v89_v52  ;;  %v1756_v51 = vunpack.c.h.s8.bf16 %v1244_v47  ;;  %v1820_v52 = vunpack.c.h.s8.bf16 %v1276_v48 }
  0x22   :  { %528 = vmatprep.subr.bf16.mxu1 %v128_v53  ;;  %487 = vmatprep.subr.bf16.mxu0 %v126_v55  ;;  %v1243_v53 = vld [vmem:[%s7080_s5 + $0x40] sm:$0xff] }
  0x23   :  { %v1755_v55 = vunpack.c.h.s8.bf16 %v1243_v53 }
  0x24   :  { %4575 = vmatmul.mubr.msk.bf16.vlgmr.msra.gmra.mxu1 %vm143_vm0, %v4806_v20  ;;  %4574 = vmatmul.mubr.msk.bf16.vlgmr.msra.gmra.mxu0 %vm143_vm0, %v4806_v20 }
  0x25   :  { %529 = vmatpush1.bf16.msra.mxu1 %v127_v57  ;;  %488 = vmatpush1.bf16.msra.mxu0 %v125_v58  ;;  %v1816_v57 = vunpack.c.l.s8.bf16 %v1276_v48  ;;  %v1240_v58 = vld [vmem:[%s7080_s5 + $0x28] sm:$0xff] }
  0x26   :  { %530 = vmatprep.subr.bf16.mxu1 %v96_v59  ;;  %489 = vmatprep.subr.bf16.mxu0 %v94_v60  ;;  %v1272_v59 = vld [vmem:[%s7080_s5 + $0x128] sm:$0xff]  ;;  %v1751_v60 = vunpack.c.l.s8.bf16 %v1243_v53  ;;  %v1748_v62 = vunpack.c.h.s8.bf16 %v1240_v58  ;;  %v1744_v5 = vunpack.c.l.s8.bf16 %v1240_v58 }
  0x27   :  { %548 = vmatprep.mubr.bf16.mxu1 %v7092_v3  ;;  %507 = vmatprep.mubr.bf16.mxu0 %v7092_v3 }
  0x29   :  { %531 = vmatpush1.bf16.msra.mxu1 %v95_v63  ;;  %490 = vmatpush1.bf16.msra.mxu0 %v93_v0  ;;  %v1812_v63 = vunpack.c.h.s8.bf16 %v1272_v59  ;;  %v1239_v0 = vld [vmem:[%s7080_s5 + $0x20] sm:$0xff] }
  0x2a   :  { %610 = vmatprep.subr.bf16.mxu1 %v132_v1  ;;  %569 = vmatprep.subr.bf16.mxu0 %v130_v4  ;;  %v1271_v1 = vld [vmem:[%s7080_s5 + $0x120] sm:$0xff]  ;;  %v1747_v2 = vunpack.c.h.s8.bf16 %v1239_v0 }
  0x2b   :  { %v1811_v4 = vunpack.c.h.s8.bf16 %v1271_v1  ;;  %v1807_v10 = vunpack.c.l.s8.bf16 %v1271_v1 }
  0x2c   :  { %4577 = vmatmul.mubr.msk.bf16.vlgmr.msra.gmra.mxu1 %vm143_vm0, %v4806_v20  ;;  %4576 = vmatmul.mubr.msk.bf16.vlgmr.msra.gmra.mxu0 %vm143_vm0, %v4806_v20 }
  0x2d   :  { %611 = vmatpush1.bf16.msra.mxu1 %v131_v6  ;;  %570 = vmatpush1.bf16.msra.mxu0 %v129_v7  ;;  %v1808_v6 = vunpack.c.l.s8.bf16 %v1272_v59  ;;  %v1236_v7 = vld [vmem:[%s7080_s5 + $0x8] sm:$0xff] }
  0x2e   :  { %612 = vmatprep.subr.bf16.mxu1 %v100_v8  ;;  %571 = vmatprep.subr.bf16.mxu0 %v98_v9  ;;  %v1268_v8 = vld [vmem:[%s7080_s5 + $0x108] sm:$0xff]  ;;  %v1743_v9 = vunpack.c.l.s8.bf16 %v1239_v0  ;;  %v1740_v11 = vunpack.c.h.s8.bf16 %v1236_v7  ;;  %v1736_v17 = vunpack.c.l.s8.bf16 %v1236_v7 }
  0x2f   :  { %630 = vmatprep.mubr.bf16.mxu1 %v7092_v3  ;;  %589 = vmatprep.mubr.bf16.mxu0 %v7092_v3 }
  0x31   :  { %613 = vmatpush1.bf16.msra.mxu1 %v99_v12  ;;  %572 = vmatpush1.bf16.msra.mxu0 %v97_v13  ;;  %v1804_v12 = vunpack.c.h.s8.bf16 %v1268_v8  ;;  %v1235_v13 = vld [vmem:[%s7080_s5] sm:$0xff] }
  0x32   :  { %692 = vmatprep.subr.bf16.mxu1 %v136_v14  ;;  %651 = vmatprep.subr.bf16.mxu0 %v134_v16  ;;  %v1267_v14 = vld [vmem:[%s7080_s5 + $0x100] sm:$0xff]  ;;  %v1739_v15 = vunpack.c.h.s8.bf16 %v1235_v13 }
  0x33   :  { %v1803_v16 = vunpack.c.h.s8.bf16 %v1267_v14  ;;  %v1799_v23 = vunpack.c.l.s8.bf16 %v1267_v14  ;;  %v5041_v14 = vld [vmem:[%s7081_s3] sm:$0xff] }
  0x34   :  { %4579 = vmatmul.mubr.msk.bf16.vlgmr.msra.gmra.mxu1 %vm143_vm0, %v4806_v20  ;;  %4578 = vmatmul.mubr.msk.bf16.vlgmr.msra.gmra.mxu0 %vm143_vm0, %v4806_v20 }
  0x35   :  { %693 = vmatpush1.bf16.msra.mxu1 %v135_v18  ;;  %652 = vmatpush1.bf16.msra.mxu0 %v133_v19  ;;  %v1800_v18 = vunpack.c.l.s8.bf16 %v1268_v8  ;;  %v1264_v19 = vld [vmem:[%s7080_s5 + $0xe8] sm:$0xff] }
  0x36   :  { %694 = vmatprep.subr.bf16.mxu1 %v104_v21  ;;  %653 = vmatprep.subr.bf16.mxu0 %v102_v22  ;;  %v1296_v21 = vld [vmem:[%s7080_s5 + $0x1e8] sm:$0xff]  ;;  %v1735_v22 = vunpack.c.l.s8.bf16 %v1235_v13  ;;  %v1796_v24 = vunpack.c.h.s8.bf16 %v1264_v19  ;;  %v1792_v30 = vunpack.c.l.s8.bf16 %v1264_v19 }
  0x37   :  { %712 = vmatprep.mubr.bf16.mxu1 %v7092_v3  ;;  %671 = vmatprep.mubr.bf16.mxu0 %v7092_v3 }
  0x39   :  { %695 = vmatpush1.bf16.msra.mxu1 %v103_v25  ;;  %654 = vmatpush1.bf16.msra.mxu0 %v101_v26  ;;  %v1860_v25 = vunpack.c.h.s8.bf16 %v1296_v21  ;;  %v1263_v26 = vld [vmem:[%s7080_s5 + $0xe0] sm:$0xff] }
  0x3a   :  { %774 = vmatprep.subr.bf16.mxu1 %v140_v27  ;;  %733 = vmatprep.subr.bf16.mxu0 %v138_v29  ;;  %v1295_v27 = vld [vmem:[%s7080_s5 + $0x1e0] sm:$0xff]  ;;  %v1795_v28 = vunpack.c.h.s8.bf16 %v1263_v26 }
  0x3b   :  { %v1859_v29 = vunpack.c.h.s8.bf16 %v1295_v27  ;;  %v1855_v35 = vunpack.c.l.s8.bf16 %v1295_v27 }
  0x3c   :  { %4581 = vmatmul.mubr.msk.bf16.vlgmr.msra.gmra.mxu1 %vm143_vm0, %v4806_v20  ;;  %4580 = vmatmul.mubr.msk.bf16.vlgmr.msra.gmra.mxu0 %vm143_vm0, %v4806_v20 }
  0x3d   :  { %775 = vmatpush1.bf16.msra.mxu1 %v139_v31  ;;  %734 = vmatpush1.bf16.msra.mxu0 %v137_v32  ;;  %v1856_v31 = vunpack.c.l.s8.bf16 %v1296_v21  ;;  %v1260_v32 = vld [vmem:[%s7080_s5 + $0xc8] sm:$0xff] }
  0x3e   :  { %776 = vmatprep.subr.bf16.mxu1 %v108_v33  ;;  %735 = vmatprep.subr.bf16.mxu0 %v106_v34  ;;  %v1292_v33 = vld [vmem:[%s7080_s5 + $0x1c8] sm:$0xff]  ;;  %v1791_v34 = vunpack.c.l.s8.bf16 %v1263_v26  ;;  %v1788_v36 = vunpack.c.h.s8.bf16 %v1260_v32  ;;  %v1784_v42 = vunpack.c.l.s8.bf16 %v1260_v32 }
  0x3f   :  { %794 = vmatprep.mubr.bf16.mxu1 %v7092_v3  ;;  %753 = vmatprep.mubr.bf16.mxu0 %v7092_v3 }
  0x41   :  { %777 = vmatpush1.bf16.msra.mxu1 %v107_v37  ;;  %736 = vmatpush1.bf16.msra.mxu0 %v105_v38  ;;  %v1852_v37 = vunpack.c.h.s8.bf16 %v1292_v33  ;;  %v1259_v38 = vld [vmem:[%s7080_s5 + $0xc0] sm:$0xff] }
  0x42   :  { %2770 = vmatprep.subr.bf16.mxu0 %v1764_v39  ;;  %2811 = vmatprep.subr.bf16.mxu1 %v1828_v40  ;;  %v1291_v39 = vld [vmem:[%s7080_s5 + $0x1c0] sm:$0xff]  ;;  %v1787_v40 = vunpack.c.h.s8.bf16 %v1259_v38 }
  0x43   :  { %v1851_v41 = vunpack.c.h.s8.bf16 %v1291_v39  ;;  %v1847_v47 = vunpack.c.l.s8.bf16 %v1291_v39 }
  0x44   :  { %4583 = vmatmul.mubr.msk.bf16.vlgmr.msra.gmra.mxu1 %vm143_vm0, %v4806_v20  ;;  %4582 = vmatmul.mubr.msk.bf16.vlgmr.msra.gmra.mxu0 %vm143_vm0, %v4806_v20  ;;  %v1819_v20 = vunpack.c.h.s8.bf16 %v1275_v54 }
  0x45   :  { %2771 = vmatpush1.bf16.msra.mxu0 %v1763_v43  ;;  %2812 = vmatpush1.bf16.msra.mxu1 %v1827_v44  ;;  %v1848_v43 = vunpack.c.l.s8.bf16 %v1292_v33  ;;  %v1256_v44 = vld [vmem:[%s7080_s5 + $0xa8] sm:$0xff] }
  0x46   :  { %2772 = vmatprep.subr.bf16.mxu0 %v1760_v45  ;;  %2813 = vmatprep.subr.bf16.mxu1 %v1824_v46  ;;  %v1288_v45 = vld [vmem:[%s7080_s5 + $0x1a8] sm:$0xff]  ;;  %v1783_v46 = vunpack.c.l.s8.bf16 %v1259_v38  ;;  %v1780_v48 = vunpack.c.h.s8.bf16 %v1256_v44  ;;  %v1776_v54 = vunpack.c.l.s8.bf16 %v1256_v44 }
  0x49   :  { %2773 = vmatpush1.bf16.msra.mxu0 %v1759_v49  ;;  %2814 = vmatpush1.bf16.msra.mxu1 %v1823_v50  ;;  %v1844_v49 = vunpack.c.h.s8.bf16 %v1288_v45  ;;  %v1255_v50 = vld [vmem:[%s7080_s5 + $0xa0] sm:$0xff] }
  0x4a   :  { %2774 = vmatprep.subr.bf16.mxu0 %v1756_v51  ;;  %2815 = vmatprep.subr.bf16.mxu1 %v1820_v52  ;;  %v1287_v51 = vld [vmem:[%s7080_s5 + $0x1a0] sm:$0xff]  ;;  %v1779_v52 = vunpack.c.h.s8.bf16 %v1255_v50 }
  0x4b   :  { %v1843_v53 = vunpack.c.h.s8.bf16 %v1287_v51  ;;  %v1839_v58 = vunpack.c.l.s8.bf16 %v1287_v51 }
  0x4d   :  { %2775 = vmatpush1.bf16.msra.mxu0 %v1755_v55  ;;  %2816 = vmatpush1.bf16.msra.mxu1 %v1819_v20  ;;  %v1840_v55 = vunpack.c.l.s8.bf16 %v1288_v45  ;;  %v1252_v20 = vld [vmem:[%s7080_s5 + $0x88] sm:$0xff] }
  0x4e   :  { %2776 = vmatprep.subr.bf16.mxu0 %v1752_v56  ;;  %2817 = vmatprep.subr.bf16.mxu1 %v1816_v57  ;;  %v1284_v56 = vld [vmem:[%s7080_s5 + $0x188] sm:$0xff]  ;;  %v1775_v57 = vunpack.c.l.s8.bf16 %v1255_v50  ;;  %v1772_v59 = vunpack.c.h.s8.bf16 %v1252_v20  ;;  %v1768_v1 = vunpack.c.l.s8.bf16 %v1252_v20 }
  0x51   :  { %2777 = vmatpush1.bf16.msra.mxu0 %v1751_v60  ;;  %2818 = vmatpush1.bf16.msra.mxu1 %v1815_v61  ;;  %v1836_v60 = vunpack.c.h.s8.bf16 %v1284_v56  ;;  %v1251_v61 = vld [vmem:[%s7080_s5 + $0x80] sm:$0xff] }
  0x52   :  { %2778 = vmatprep.subr.bf16.mxu0 %v1748_v62  ;;  %2819 = vmatprep.subr.bf16.mxu1 %v1812_v63  ;;  %v1283_v62 = vld [vmem:[%s7080_s5 + $0x180] sm:$0xff]  ;;  %v1771_v63 = vunpack.c.h.s8.bf16 %v1251_v61 }
  0x53   :  { %v1835_v0 = vunpack.c.h.s8.bf16 %v1283_v62  ;;  %v1831_v7 = vunpack.c.l.s8.bf16 %v1283_v62 }
  0x55   :  { %2779 = vmatpush1.bf16.msra.mxu0 %v1747_v2  ;;  %2820 = vmatpush1.bf16.msra.mxu1 %v1811_v4  ;;  %v1832_v2 = vunpack.c.l.s8.bf16 %v1284_v56  ;;  %v5025_v4 = vld [vmem:[%s7080_s5 + $0x268] sm:$0xff] }
  0x56   :  { %2780 = vmatprep.subr.bf16.mxu0 %v1744_v5  ;;  %2821 = vmatprep.subr.bf16.mxu1 %v1808_v6  ;;  %v5030_v5 = vld [vmem:[%s7080_s5 + $0x368] sm:$0xff]  ;;  %v1767_v6 = vunpack.c.l.s8.bf16 %v1251_v61  ;;  %v1892_v8 = vunpack.c.h.s8.bf16 %v5025_v4 }
  0x59   :  { %2781 = vmatpush1.bf16.msra.mxu0 %v1743_v9  ;;  %2822 = vmatpush1.bf16.msra.mxu1 %v1807_v10  ;;  %v1956_v9 = vunpack.c.h.s8.bf16 %v5030_v5  ;;  %v811_v10 = vlaneseq }
  0x5a   :  { %2782 = vmatprep.subr.bf16.mxu0 %v1740_v11  ;;  %2823 = vmatprep.subr.bf16.mxu1 %v1804_v12 }
  0x5b   :  { %v812_v11 = vshrl.u32 %v811_v10, 7 }
  0x5d   :  { %2783 = vmatpush1.bf16.msra.mxu0 %v1739_v15  ;;  %2824 = vmatpush1.bf16.msra.mxu1 %v1803_v16  ;;  %v5034_v12 = vsub.s32 0, %v812_v11  ;;  %v5036_v13 = vsub.s32 2, %v812_v11  ;;  %v5043_v15 = vsub.s32 1, %v812_v11  ;;  %v5045_v16 = vsub.s32 3, %v812_v11 }
  0x5e   :  { %2784 = vmatprep.subr.bf16.mxu0 %v1736_v17  ;;  %2825 = vmatprep.subr.bf16.mxu1 %v1800_v18  ;;  %v5050_v17 = vld [vmem:[%s7082_s4] sm:$0xff]  ;;  %v5070_v32 = vsub.s32 4, %v812_v11  ;;  %v5081_v44 = vsub.s32 5, %v812_v11 }
  0x5f   :  { %v814_v18 = vrot.slane %v5041_v14, %v5034_v12  ;;  %v822_v19 = vrot.slane %v5041_v14, %v5036_v13  ;;  %v1014_v21 = vrot.slane %v5050_v17, %v5034_v12  ;;  %v1018_v27 = vrot.slane %v5050_v17, %v5043_v15 }
  0x60   :  { %7101 = vst [vmem:[#allocation2_spill] sm:$0xff] %v5070_v32  ;;  %v1030_v56 = vrot.slane %v5050_v17, %v5070_v32 }
  0x61   :  { %2785 = vmatpush1.bf16.msra.mxu0 %v1735_v22  ;;  %2826 = vmatpush1.bf16.msra.mxu1 %v1799_v23  ;;  %v1022_v22 = vrot.slane %v5050_v17, %v5036_v13  ;;  %v818_v23 = vrot.slane %v5041_v14, %v5043_v15 }
  0x62   :  { %2786 = vmatprep.subr.bf16.mxu0 %v1796_v24  ;;  %2827 = vmatprep.subr.bf16.mxu1 %v1860_v25  ;;  %v826_v24 = vrot.slane %v5041_v14, %v5045_v16 }
  0x65   :  { %2787 = vmatpush2.bf16.msra.mxu0 %v1795_v28  ;;  %2828 = vmatpush2.bf16.msra.mxu1 %v1859_v29  ;;  %v5066_v28 = vsub.s32 6, %v812_v11 }
  0x66   :  { %2788 = vmatprep.subr.bf16.mxu0 %v1792_v30  ;;  %2829 = vmatprep.subr.bf16.mxu1 %v1856_v31  ;;  %v1026_v31 = vrot.slane %v5050_v17, %v5045_v16 }
  0x69   :  { %2789 = vmatpush2.bf16.msra.mxu0 %v1791_v34  ;;  %2830 = vmatpush2.bf16.msra.mxu1 %v1855_v35  ;;  %v5072_v35 = vsub.s32 7, %v812_v11 }
  0x6a   :  { %2790 = vmatprep.subr.bf16.mxu0 %v1788_v36  ;;  %2831 = vmatprep.subr.bf16.mxu1 %v1852_v37 }
  0x6b   :  { %v1042_v62 = vrot.slane %v5050_v17, %v5072_v35 }
  0x6d   :  { %2791 = vmatpush2.bf16.msra.mxu0 %v1787_v40  ;;  %2832 = vmatpush2.bf16.msra.mxu1 %v1851_v41  ;;  %v5077_v40 = vld [vmem:[%s7080_s5 + $0x260] sm:$0xff] }
  0x6e   :  { %2792 = vmatprep.subr.bf16.mxu0 %v1784_v42  ;;  %2833 = vmatprep.subr.bf16.mxu1 %v1848_v43  ;;  %v838_v43 = vrot.slane %v5041_v14, %v5066_v28 }
  0x71   :  { %2793 = vmatpush2.bf16.msra.mxu0 %v1783_v46  ;;  %2834 = vmatpush2.bf16.msra.mxu1 %v1847_v47 }
  0x72   :  { %2794 = vmatprep.subr.bf16.mxu0 %v1780_v48  ;;  %2835 = vmatprep.subr.bf16.mxu1 %v1844_v49  ;;  %v1343_v48 = vld [vmem:[%s7080_s5 + $0x360] sm:$0xff]  ;;  %v830_v49 = vrot.slane %v5041_v14, %v5070_v32 }
  0x75   :  { %2795 = vmatpush2.bf16.msra.mxu0 %v1779_v52  ;;  %2836 = vmatpush2.bf16.msra.mxu1 %v1843_v53  ;;  %v1891_v53 = vunpack.c.h.s8.bf16 %v5077_v40 }
  0x76   :  { %2796 = vmatprep.subr.bf16.mxu0 %v1776_v54  ;;  %2837 = vmatprep.subr.bf16.mxu1 %v1840_v55  ;;  %v1038_v54 = vrot.slane %v5050_v17, %v5066_v28 }
  0x79   :  { %2797 = vmatpush2.bf16.msra.mxu0 %v1775_v57  ;;  %2838 = vmatpush2.bf16.msra.mxu1 %v1839_v58  ;;  %v842_v57 = vrot.slane %v5041_v14, %v5072_v35 }
  0x7a   :  { %2798 = vmatprep.subr.bf16.mxu0 %v1772_v59  ;;  %2839 = vmatprep.subr.bf16.mxu1 %v1836_v60  ;;  %v1955_v59 = vunpack.c.h.s8.bf16 %v1343_v48 }
  0x7d   :  { %2799 = vmatpush2.bf16.msra.mxu0 %v1771_v63  ;;  %2840 = vmatpush2.bf16.msra.mxu1 %v1835_v0  ;;  %v834_v63 = vrot.slane %v5041_v14, %v5081_v44  ;;  %v1308_v14 = vld [vmem:[%s7080_s5 + $0x248] sm:$0xff] }
  0x7e   :  { %2800 = vmatprep.subr.bf16.mxu0 %v1768_v1  ;;  %2841 = vmatprep.subr.bf16.mxu1 %v1832_v2 }
  0x81   :  { %2801 = vmatpush2.bf16.msra.mxu0 %v1767_v6  ;;  %2842 = vmatpush2.bf16.msra.mxu1 %v1831_v7 }
  0x82   :  { %2852 = vmatprep.subr.bf16.mxu0 %v1892_v8  ;;  %2893 = vmatprep.subr.bf16.mxu1 %v1956_v9  ;;  %v1888_v8 = vunpack.c.l.s8.bf16 %v5025_v4  ;;  %v1952_v9 = vunpack.c.l.s8.bf16 %v5030_v5 }
  0xcc   :  { %v181_v25 = vpop.f32.mrf.mxu0  ;;  %v222_v26 = vpop.f32.mrf.mxu1 }
  0xcd   :  { %v971_v29 = vmul.f32 %v814_v18, %v181_v25  ;;  %v973_v30 = vmul.f32 %v822_v19, %v222_v26  ;;  %v1034_v18 = vrot.slane %v5050_v17, %v5081_v44  ;;  %v1340_v19 = vld [vmem:[%s7080_s5 + $0x348] sm:$0xff]  ;;  %v1951_v25 = vunpack.c.l.s8.bf16 %v1343_v48 }
  0xce   :  { %v183_v33 = vpop.f32.mrf.mxu0  ;;  %v224_v34 = vpop.f32.mrf.mxu1 }
  0xcf   :  { %v1171_v36 = vadd.f32 %v1014_v21, %v971_v29  ;;  %v1173_v37 = vadd.f32 %v1022_v22, %v973_v30  ;;  %v972_v38 = vmul.f32 %v818_v23, %v183_v33  ;;  %v974_v39 = vmul.f32 %v826_v24, %v224_v34  ;;  %v1307_v30 = vld [vmem:[%s7080_s5 + $0x240] sm:$0xff] }
  0xd0   :  { %v185_v41 = vpop.f32.mrf.mxu0  ;;  %v226_v42 = vpop.f32.mrf.mxu1  ;;  %v1887_v24 = vunpack.c.l.s8.bf16 %v5077_v40  ;;  %v1948_v29 = vunpack.c.h.s8.bf16 %v1340_v19 }
  0xd1   :  { %v1203_v45 = vmax.f32 %v1171_v36, 0.0  ;;  %v1172_v46 = vadd.f32 %v1018_v27, %v972_v38  ;;  %v1174_v47 = vadd.f32 %v1026_v31, %v974_v39  ;;  %v1205_v50 = vmax.f32 %v1173_v37, 0.0  ;;  %v1339_v31 = vld [vmem:[%s7080_s5 + $0x340] sm:$0xff] }
  0xd2   :  { %v186_v51 = vpop.f32.mrf.mxu0  ;;  %v227_v52 = vpop.f32.mrf.mxu1  ;;  %v1884_v27 = vunpack.c.h.s8.bf16 %v1308_v14  ;;  %v1883_v41 = vunpack.c.h.s8.bf16 %v1307_v30  ;;  %v1947_v42 = vunpack.c.h.s8.bf16 %v1339_v31 }
  0xd3   :  { %v1204_v55 = vmax.f32 %v1172_v46, 0.0  ;;  %v1206_v20 = vmax.f32 %v1174_v47, 0.0  ;;  %v5095_v58 = vpack.c.bf16 %v1203_v45, %v1203_v45  ;;  %v5105_v7 = vpack.c.bf16 %v1205_v50, %v1205_v50  ;;  %v1304_v50 = vld [vmem:[%s7080_s5 + $0x228] sm:$0xff] }
  0xd4   :  { %v304_v60 = vpop.f32.mrf.mxu1  ;;  %v263_v61 = vpop.f32.mrf.mxu0  ;;  %v1880_v45 = vunpack.c.l.s8.bf16 %v1308_v14  ;;  %v1944_v46 = vunpack.c.l.s8.bf16 %v1340_v19  ;;  %v1336_v51 = vld [vmem:[%s7080_s5 + $0x328] sm:$0xff] }
  0xd5   :  { %7102 = vst [vmem:[#allocation3_spill] sm:$0xff] %v5095_v58  ;;  %v5101_v0 = vpack.c.bf16 %v1204_v55, %v1204_v55  ;;  %v5103_v1 = vpack.c.bf16 %v1206_v20, %v1206_v20  ;;  %v977_v2 = vmul.f32 %v838_v43, %v304_v60  ;;  %v975_v6 = vmul.f32 %v830_v49, %v263_v61  ;;  %v5155_v52 = vld [vmem:[%s7081_s3 + $0x8] sm:$0xff]  ;;  %v1303_v60 = vld [vmem:[%s7080_s5 + $0x220] sm:$0xff] }
  0xd6   :  { %7105 = vst [vmem:[#allocation6_spill] sm:$0xff] %v5105_v7  ;;  %v306_v10 = vpop.f32.mrf.mxu1  ;;  %v265_v11 = vpop.f32.mrf.mxu0  ;;  %v1879_v55 = vunpack.c.l.s8.bf16 %v1307_v30  ;;  %v1943_v20 = vunpack.c.l.s8.bf16 %v1339_v31  ;;  %v1335_v61 = vld [vmem:[%s7080_s5 + $0x320] sm:$0xff] }
  0xd7   :  { %7103 = vst [vmem:[#allocation4_spill] sm:$0xff] %v5101_v0  ;;  %7104 = vst [vmem:[#allocation5_spill] sm:$0xff] %v5103_v1  ;;  %2802 = vmatprep.mubr.bf16.mxu0 %v5101_v0  ;;  %2843 = vmatprep.mubr.bf16.mxu1 %v5103_v1  ;;  %v5119_v4 = vadd.f32 %v1038_v54, %v977_v2  ;;  %v5121_v5 = vadd.f32 %v1030_v56, %v975_v6  ;;  %v1939_v14 = vunpack.c.h.s8.bf16 %v1335_v61 }
  0xd8   :  { %v978_v21 = vmul.f32 %v842_v57, %v306_v10  ;;  %2803 = vmatmul.mubr.bf16.vlgmr.msra.gmra.mxu0 %v5095_v58  ;;  %2844 = vmatmul.mubr.bf16.vlgmr.msra.gmra.mxu1 %v5105_v7  ;;  %v976_v17 = vmul.f32 %v834_v63, %v265_v11  ;;  %v308_v22 = vpop.f32.mrf.mxu1  ;;  %v267_v23 = vpop.f32.mrf.mxu0  ;;  %v870_v56 = vrot.slane %v5155_v52, %v5066_v28  ;;  %v1876_v57 = vunpack.c.h.s8.bf16 %v1304_v50 }
  0xd9   :  { %2853 = vmatpush1.bf16.msra.mxu0 %v1891_v53  ;;  %2894 = vmatpush1.bf16.msra.mxu1 %v1955_v59  ;;  %v1940_v59 = vunpack.c.h.s8.bf16 %v1336_v51  ;;  %v862_v6 = vrot.slane %v5155_v52, %v5070_v32 }
  0xda   :  { %v1178_v26 = vadd.f32 %v1042_v62, %v978_v21  ;;  %2854 = vmatprep.subr.bf16.mxu0 %v1888_v8  ;;  %2895 = vmatprep.subr.bf16.mxu1 %v1952_v9  ;;  %v1176_v33 = vadd.f32 %v1034_v18, %v976_v17  ;;  %v309_v34 = vpop.f32.mrf.mxu1  ;;  %v268_v36 = vpop.f32.mrf.mxu0  ;;  %v5168_v62 = vld [vmem:[%s7082_s4 + $0x8] sm:$0xff]  ;;  %v1875_v18 = vunpack.c.h.s8.bf16 %v1303_v60  ;;  %v1872_v21 = vunpack.c.l.s8.bf16 %v1304_v50 }
  0xdb   :  { %v1070_v8 = vrot.slane %v5168_v62, %v5066_v28  ;;  %v1062_v11 = vrot.slane %v5168_v62, %v5070_v32  ;;  %v1936_v17 = vunpack.c.l.s8.bf16 %v1336_v51  ;;  %v1935_v34 = vunpack.c.l.s8.bf16 %v1335_v61 }
  0xdc   :  { %v1210_v37 = vmax.f32 %v1178_v26, 0.0  ;;  %v1208_v38 = vmax.f32 %v1176_v33, 0.0  ;;  %v5132_v39 = vpop.f32.mrf.mxu1  ;;  %v5134_v40 = vpop.f32.mrf.mxu0  ;;  %v1332_v26 = vld [vmem:[%s7080_s5 + $0x308] sm:$0xff]  ;;  %v1871_v33 = vunpack.c.l.s8.bf16 %v1303_v60  ;;  %v5213_v60 = vld [vmem:[%s7081_s3 + $0x10] sm:$0xff] }
  0xdd   :  { %2855 = vmatpush1.bf16.msra.mxu0 %v1887_v24  ;;  %2896 = vmatpush1.bf16.msra.mxu1 %v1951_v25  ;;  %v1300_v25 = vld [vmem:[%s7080_s5 + $0x208] sm:$0xff] }
  0xde   :  { %v5136_v43 = vpack.c.bf16 %v1210_v37, %v1210_v37  ;;  %2856 = vmatprep.subr.bf16.mxu0 %v1884_v27  ;;  %2897 = vmatprep.subr.bf16.mxu1 %v1948_v29  ;;  %v5138_v47 = vpack.c.bf16 %v1208_v38, %v1208_v38  ;;  %v5140_v48 = vpop.f32.mrf.mxu1  ;;  %v5142_v49 = vpop.f32.mrf.mxu0  ;;  %v1868_v36 = vunpack.c.h.s8.bf16 %v1300_v25  ;;  %v1932_v37 = vunpack.c.h.s8.bf16 %v1332_v26  ;;  %v1299_v38 = vld [vmem:[%s7080_s5 + $0x200] sm:$0xff] }
  0xdf   :  { %v1867_v51 = vunpack.c.h.s8.bf16 %v1299_v38 }
  0xe0   :  { %7106 = vst [vmem:[#allocation7_spill] sm:$0xff] %v5136_v43  ;;  %7107 = vst [vmem:[#allocation8_spill] sm:$0xff] %v5138_v47  ;;  %2925 = vmatprep.mubr.bf16.mxu1 %v5136_v43  ;;  %2884 = vmatprep.mubr.bf16.mxu0 %v5138_v47  ;;  %v390_v53 = vpop.f32.mrf.mxu1  ;;  %v349_v54 = vpop.f32.mrf.mxu0 }
  0xe1   :  { %2857 = vmatpush1.bf16.msra.mxu0 %v1883_v41  ;;  %2898 = vmatpush1.bf16.msra.mxu1 %v1947_v42  ;;  %v1331_v41 = vld [vmem:[%s7080_s5 + $0x300] sm:$0xff]  ;;  %v1864_v54 = vunpack.c.l.s8.bf16 %v1300_v25  ;;  %v906_v25 = vrot.slane %v5213_v60, %v5072_v35 }
  0xe2   :  { %2858 = vmatprep.subr.bf16.mxu0 %v1880_v45  ;;  %2899 = vmatprep.subr.bf16.mxu1 %v1944_v46  ;;  %v391_v63 = vpop.f32.mrf.mxu1  ;;  %v350_v2 = vpop.f32.mrf.mxu0  ;;  %v1931_v53 = vunpack.c.h.s8.bf16 %v1331_v41 }
  0xe3   :  { %v1863_v2 = vunpack.c.l.s8.bf16 %v1299_v38 }
  0xe4   :  { %v468_v9 = vpop.f32.mrf.mxu1  ;;  %v427_v10 = vpop.f32.mrf.mxu0 }
  0xe5   :  { %2859 = vmatpush1.bf16.msra.mxu0 %v1879_v55  ;;  %2900 = vmatpush1.bf16.msra.mxu1 %v1943_v20  ;;  %v985_v19 = vmul.f32 %v870_v56, %v468_v9  ;;  %v983_v22 = vmul.f32 %v862_v6, %v427_v10  ;;  %v1928_v55 = vunpack.c.l.s8.bf16 %v1332_v26  ;;  %v1927_v6 = vunpack.c.l.s8.bf16 %v1331_v41 }
  0xe6   :  { %2860 = vmatprep.subr.bf16.mxu0 %v1876_v57  ;;  %2901 = vmatprep.subr.bf16.mxu1 %v1940_v59  ;;  %v5176_v23 = vpop.f32.mrf.mxu1  ;;  %v5178_v24 = vpop.f32.mrf.mxu0  ;;  %v1328_v57 = vld [vmem:[%s7080_s5 + $0x2e8] sm:$0xff]  ;;  %v902_v9 = vrot.slane %v5213_v60, %v5066_v28  ;;  %v898_v26 = vrot.slane %v5213_v60, %v5081_v44 }
  0xe7   :  { %v5186_v27 = vadd.f32 %v1070_v8, %v985_v19  ;;  %v5188_v29 = vadd.f32 %v1062_v11, %v983_v22  ;;  %v1360_v59 = vld [vmem:[%s7080_s5 + $0x3e8] sm:$0xff]  ;;  %v1327_v8 = vld [vmem:[%s7080_s5 + $0x2e0] sm:$0xff]  ;;  %v1924_v10 = vunpack.c.h.s8.bf16 %v1328_v57 }
  0xe8   :  { %v472_v30 = vpop.f32.mrf.mxu1  ;;  %v431_v31 = vpop.f32.mrf.mxu0  ;;  %v1988_v11 = vunpack.c.h.s8.bf16 %v1360_v59 }
  0xe9   :  { %2861 = vmatpush1.bf16.msra.mxu0 %v1875_v18  ;;  %2902 = vmatpush1.bf16.msra.mxu1 %v1939_v14  ;;  %v1359_v18 = vld [vmem:[%s7080_s5 + $0x3e0] sm:$0xff]  ;;  %v5226_v14 = vld [vmem:[%s7082_s4 + $0x10] sm:$0xff]  ;;  %v1923_v30 = vunpack.c.h.s8.bf16 %v1327_v8 }
  0xea   :  { %2862 = vmatprep.subr.bf16.mxu0 %v1872_v21  ;;  %2903 = vmatprep.subr.bf16.mxu1 %v1936_v17  ;;  %v473_v42 = vpop.f32.mrf.mxu1  ;;  %v432_v45 = vpop.f32.mrf.mxu0  ;;  %v894_v17 = vrot.slane %v5213_v60, %v5070_v32  ;;  %v1102_v22 = vrot.slane %v5226_v14, %v5066_v28  ;;  %v1106_v38 = vrot.slane %v5226_v14, %v5072_v35 }
  0xeb   :  { %v1098_v41 = vrot.slane %v5226_v14, %v5081_v44  ;;  %v1920_v42 = vunpack.c.l.s8.bf16 %v1328_v57  ;;  %v1984_v45 = vunpack.c.l.s8.bf16 %v1360_v59  ;;  %v1919_v59 = vunpack.c.l.s8.bf16 %v1327_v8 }
  0xec   :  { %v5196_v46 = vpop.f32.mrf.mxu1  ;;  %v5198_v50 = vpop.f32.mrf.mxu0 }
  0xed   :  { %2863 = vmatpush1.bf16.msra.mxu0 %v1871_v33  ;;  %2904 = vmatpush1.bf16.msra.mxu1 %v1935_v34  ;;  %v1094_v34 = vrot.slane %v5226_v14, %v5070_v32 }
  0xee   :  { %2864 = vmatprep.subr.bf16.mxu0 %v1868_v36  ;;  %2905 = vmatprep.subr.bf16.mxu1 %v1932_v37  ;;  %v5200_v20 = vpop.f32.mrf.mxu1  ;;  %v5202_v56 = vpop.f32.mrf.mxu0  ;;  %v1987_v36 = vunpack.c.h.s8.bf16 %v1359_v18 }
  0xf0   :  { %v554_v61 = vpop.f32.mrf.mxu1  ;;  %v513_v63 = vpop.f32.mrf.mxu0 }
  0xf1   :  { %2865 = vmatpush1.bf16.msra.mxu0 %v1867_v51  ;;  %2906 = vmatpush1.bf16.msra.mxu1 %v1931_v53  ;;  %v1356_v61 = vld [vmem:[%s7080_s5 + $0x3c8] sm:$0xff] }
  0xf2   :  { %2866 = vmatprep.subr.bf16.mxu0 %v1864_v54  ;;  %2907 = vmatprep.subr.bf16.mxu1 %v1928_v55  ;;  %v555_v19 = vpop.f32.mrf.mxu1  ;;  %v514_v21 = vpop.f32.mrf.mxu0  ;;  %v1324_v55 = vld [vmem:[%s7080_s5 + $0x2c8] sm:$0xff] }
  0xf4   :  { %v632_v31 = vpop.f32.mrf.mxu1  ;;  %v591_v33 = vpop.f32.mrf.mxu0 }
  0xf5   :  { %2867 = vmatpush1.bf16.msra.mxu0 %v1863_v2  ;;  %2908 = vmatpush1.bf16.msra.mxu1 %v1927_v6  ;;  %v993_v37 = vmul.f32 %v902_v9, %v632_v31  ;;  %v991_v51 = vmul.f32 %v894_v17, %v591_v33  ;;  %v1916_v17 = vunpack.c.h.s8.bf16 %v1324_v55  ;;  %v1980_v31 = vunpack.c.h.s8.bf16 %v1356_v61 }
  0xf6   :  { %2868 = vmatprep.subr.bf16.mxu0 %v1924_v10  ;;  %2909 = vmatprep.subr.bf16.mxu1 %v1988_v11  ;;  %v634_v53 = vpop.f32.mrf.mxu1  ;;  %v593_v54 = vpop.f32.mrf.mxu0  ;;  %v1983_v11 = vunpack.c.l.s8.bf16 %v1359_v18 }
  0xf7   :  { %v5248_v63 = vadd.f32 %v1102_v22, %v993_v37  ;;  %v994_v2 = vmul.f32 %v906_v25, %v634_v53  ;;  %v992_v6 = vmul.f32 %v898_v26, %v593_v54  ;;  %v5250_v9 = vadd.f32 %v1094_v34, %v991_v51  ;;  %v1323_v22 = vld [vmem:[%s7080_s5 + $0x2c0] sm:$0xff]  ;;  %v806_v51 = vld [vmem:[%s7081_s3 + $0x18] sm:$0xff] }
  0xf8   :  { %v636_v10 = vpop.f32.mrf.mxu1  ;;  %v595_v57 = vpop.f32.mrf.mxu0  ;;  %v1355_v25 = vld [vmem:[%s7080_s5 + $0x3c0] sm:$0xff]  ;;  %v1915_v33 = vunpack.c.h.s8.bf16 %v1323_v22  ;;  %v1976_v37 = vunpack.c.l.s8.bf16 %v1356_v61 }
  0xf9   :  { %2869 = vmatpush2.bf16.msra.mxu0 %v1923_v30  ;;  %2910 = vmatpush2.bf16.msra.mxu1 %v1987_v36  ;;  %v5252_v19 = vadd.f32 %v1106_v38, %v994_v2  ;;  %v5254_v21 = vadd.f32 %v1098_v41, %v992_v6  ;;  %v1979_v34 = vunpack.c.h.s8.bf16 %v1355_v25  ;;  %v1912_v36 = vunpack.c.l.s8.bf16 %v1324_v55  ;;  %v1319_v2 = vld [vmem:[%s7080_s5 + $0x2a0] sm:$0xff] }
  0xfa   :  { %2870 = vmatprep.subr.bf16.mxu0 %v1920_v42  ;;  %2911 = vmatprep.subr.bf16.mxu1 %v1984_v45  ;;  %v637_v26 = vpop.f32.mrf.mxu1  ;;  %v596_v30 = vpop.f32.mrf.mxu0  ;;  %v1320_v42 = vld [vmem:[%s7080_s5 + $0x2a8] sm:$0xff]  ;;  %v1911_v55 = vunpack.c.l.s8.bf16 %v1323_v22  ;;  %v1975_v61 = vunpack.c.l.s8.bf16 %v1355_v25  ;;  %v934_v6 = vrot.slane %v806_v51, %v5066_v28  ;;  %v926_v22 = vrot.slane %v806_v51, %v5070_v32 }
  0xfb   :  { %v1352_v45 = vld [vmem:[%s7080_s5 + $0x3a8] sm:$0xff]  ;;  %v1908_v10 = vunpack.c.h.s8.bf16 %v1320_v42  ;;  %v938_v26 = vrot.slane %v806_v51, %v5072_v35  ;;  %v930_v30 = vrot.slane %v806_v51, %v5081_v44  ;;  %v858_v51 = vrot.slane %v5155_v52, %v5045_v16 }
  0xfc   :  { %v5262_v8 = vpop.f32.mrf.mxu1  ;;  %v5264_v18 = vpop.f32.mrf.mxu0  ;;  %v1972_v57 = vunpack.c.h.s8.bf16 %v1352_v45  ;;  %v1968_v3 = vunpack.c.l.s8.bf16 %v1352_v45 }
  0xfd   :  { %2871 = vmatpush2.bf16.msra.mxu0 %v1919_v59  ;;  %2912 = vmatpush2.bf16.msra.mxu1 %v1983_v11  ;;  %v1351_v59 = vld [vmem:[%s7080_s5 + $0x3a0] sm:$0xff]  ;;  %v1006_v11 = vld [vmem:[%s7082_s4 + $0x18] sm:$0xff] }
  0xfe   :  { %2872 = vmatprep.subr.bf16.mxu0 %v1916_v17  ;;  %2913 = vmatprep.subr.bf16.mxu1 %v1980_v31  ;;  %v5266_v38 = vpop.f32.mrf.mxu1  ;;  %v5268_v41 = vpop.f32.mrf.mxu0  ;;  %v1134_v25 = vrot.slane %v1006_v11, %v5066_v28  ;;  %v1904_v28 = vunpack.c.l.s8.bf16 %v1320_v42 }
 0x100   :  { %v718_v53 = vpop.f32.mrf.mxu1  ;;  %v677_v54 = vpop.f32.mrf.mxu0 }
 0x101   :  { %2873 = vmatpush2.bf16.msra.mxu0 %v1915_v33  ;;  %2914 = vmatpush2.bf16.msra.mxu1 %v1979_v34  ;;  %v1907_v33 = vunpack.c.h.s8.bf16 %v1319_v2  ;;  %v1971_v53 = vunpack.c.h.s8.bf16 %v1351_v59 }
 0x102   :  { %2874 = vmatprep.subr.bf16.mxu0 %v1912_v36  ;;  %2915 = vmatprep.subr.bf16.mxu1 %v1976_v37  ;;  %v719_v17 = vpop.f32.mrf.mxu1  ;;  %v678_v31 = vpop.f32.mrf.mxu0  ;;  %v1126_v37 = vrot.slane %v1006_v11, %v5070_v32 }
 0x103   :  { %v1138_v17 = vrot.slane %v1006_v11, %v5072_v35  ;;  %v1130_v31 = vrot.slane %v1006_v11, %v5081_v44 }
 0x104   :  { %v796_v34 = vpop.f32.mrf.mxu1  ;;  %v755_v36 = vpop.f32.mrf.mxu0 }
 0x105   :  { %2875 = vmatpush2.bf16.msra.mxu0 %v1911_v55  ;;  %2916 = vmatpush2.bf16.msra.mxu1 %v1975_v61  ;;  %v1001_v54 = vmul.f32 %v934_v6, %v796_v34  ;;  %v999_v43 = vmul.f32 %v926_v22, %v755_v36  ;;  %v1316_v55 = vld [vmem:[%s7080_s5 + $0x288] sm:$0xff]  ;;  %v850_v6 = vrot.slane %v5155_v52, %v5043_v15  ;;  %v1903_v34 = vunpack.c.l.s8.bf16 %v1319_v2 }
 0x106   :  { %2876 = vmatprep.subr.bf16.mxu0 %v1908_v10  ;;  %2917 = vmatprep.subr.bf16.mxu1 %v1972_v57  ;;  %v798_v7 = vpop.f32.mrf.mxu1  ;;  %v757_v47 = vpop.f32.mrf.mxu0  ;;  %v1348_v61 = vld [vmem:[%s7080_s5 + $0x388] sm:$0xff]  ;;  %v1967_v36 = vunpack.c.l.s8.bf16 %v1351_v59  ;;  %v1900_v1 = vunpack.c.h.s8.bf16 %v1316_v55  ;;  %v982_v2 = vmul.f32 %v858_v51, %v5140_v48  ;;  %v1058_v59 = vrot.slane %v5168_v62, %v5045_v16 }
 0x107   :  { %v5306_v10 = vadd.f32 %v1134_v25, %v1001_v54  ;;  %v1002_v42 = vmul.f32 %v938_v26, %v798_v7  ;;  %v1000_v45 = vmul.f32 %v930_v30, %v757_v47  ;;  %v5308_v57 = vadd.f32 %v1126_v37, %v999_v43  ;;  %v1315_v7 = vld [vmem:[%s7080_s5 + $0x280] sm:$0xff]  ;;  %v1376_v48 = vld [vmem:[%s7080_s5 + $0x468] sm:$0xff] }
 0x108   :  { %v800_v11 = vpop.f32.mrf.mxu1  ;;  %v759_v22 = vpop.f32.mrf.mxu0  ;;  %v1964_v0 = vunpack.c.h.s8.bf16 %v1348_v61  ;;  %v1347_v43 = vld [vmem:[%s7080_s5 + $0x380] sm:$0xff]  ;;  %v980_v26 = vmul.f32 %v850_v6, %v5142_v49  ;;  %v1899_v30 = vunpack.c.h.s8.bf16 %v1315_v7  ;;  %v1896_v37 = vunpack.c.l.s8.bf16 %v1316_v55  ;;  %v1408_v54 = vld [vmem:[%s7080_s5 + $0x568] sm:$0xff] }
 0x109   :  { %2877 = vmatpush2.bf16.msra.mxu0 %v1907_v33  ;;  %2918 = vmatpush2.bf16.msra.mxu1 %v1971_v53  ;;  %v5310_v32 = vadd.f32 %v1138_v17, %v1002_v42  ;;  %v5312_v58 = vadd.f32 %v1130_v31, %v1000_v45  ;;  %v1963_v33 = vunpack.c.h.s8.bf16 %v1347_v43  ;;  %v1960_v53 = vunpack.c.l.s8.bf16 %v1348_v61  ;;  %v1375_v61 = vld [vmem:[%s7080_s5 + $0x460] sm:$0xff] }
 0x10a   :  { %2878 = vmatprep.subr.bf16.mxu0 %v1904_v28  ;;  %2919 = vmatprep.subr.bf16.mxu1 %v1968_v3  ;;  %v801_v47 = vpop.f32.mrf.mxu1  ;;  %v760_v25 = vpop.f32.mrf.mxu0  ;;  %v1050_v3 = vrot.slane %v5168_v62, %v5043_v15  ;;  %v1182_v49 = vadd.f32 %v1058_v59, %v982_v2  ;;  %v1207_v31 = vmax.f32 %v5121_v5, 0.0  ;;  %v1895_v28 = vunpack.c.l.s8.bf16 %v1315_v7  ;;  %v1407_v6 = vld [vmem:[%s7080_s5 + $0x560] sm:$0xff]  ;;  %v1372_v7 = vld [vmem:[%s7080_s5 + $0x448] sm:$0xff] }
 0x10b   :  { %v1959_v51 = vunpack.c.l.s8.bf16 %v1347_v43  ;;  %v2084_v55 = vunpack.c.h.s8.bf16 %v1408_v54  ;;  %v2019_v11 = vunpack.c.h.s8.bf16 %v1375_v61  ;;  %v1404_v43 = vld [vmem:[%s7080_s5 + $0x548] sm:$0xff]  ;;  %v2015_v2 = vunpack.c.l.s8.bf16 %v1375_v61 }
 0x10c   :  { %v1180_v17 = vadd.f32 %v1050_v3, %v980_v26  ;;  %v1214_v42 = vmax.f32 %v1182_v49, 0.0  ;;  %v5340_v45 = vpack.c.bf16 %v1207_v31, %v1207_v31  ;;  %v2079_v59 = vunpack.c.l.s8.bf16 %v1407_v6  ;;  %v1368_v49 = vld [vmem:[%s7080_s5 + $0x428] sm:$0xff] }
 0x10d   :  { %2879 = vmatpush2.bf16.msra.mxu0 %v1903_v34  ;;  %2920 = vmatpush2.bf16.msra.mxu1 %v1967_v36  ;;  %v2016_v34 = vunpack.c.l.s8.bf16 %v1376_v48  ;;  %v2080_v36 = vunpack.c.l.s8.bf16 %v1408_v54  ;;  %v2012_v26 = vunpack.c.h.s8.bf16 %v1372_v7  ;;  %v2076_v3 = vunpack.c.h.s8.bf16 %v1404_v43 }
 0x10e   :  { %2880 = vmatprep.subr.bf16.mxu0 %v1900_v1  ;;  %2921 = vmatprep.subr.bf16.mxu1 %v1964_v0  ;;  %v1209_v0 = vmax.f32 %v5119_v4, 0.0  ;;  %v2020_v1 = vunpack.c.h.s8.bf16 %v1376_v48  ;;  %v1212_v5 = vmax.f32 %v1180_v17, 0.0  ;;  %v2083_v4 = vunpack.c.h.s8.bf16 %v1407_v6  ;;  %v1400_v17 = vld [vmem:[%s7080_s5 + $0x528] sm:$0xff] }
 0x10f   :  { %v5350_v47 = vpack.c.bf16 %v1214_v42, %v1214_v42  ;;  %v2008_v48 = vunpack.c.l.s8.bf16 %v1372_v7  ;;  %v2072_v54 = vunpack.c.l.s8.bf16 %v1404_v43  ;;  %v2000_v42 = vunpack.c.l.s8.bf16 %v1368_v49 }
 0x110   :  { %v5342_v22 = vpack.c.bf16 %v1209_v0, %v1209_v0  ;;  %v5352_v25 = vpack.c.bf16 %v1212_v5, %v1212_v5  ;;  %v2068_v0 = vunpack.c.h.s8.bf16 %v1400_v17  ;;  %v2064_v5 = vunpack.c.l.s8.bf16 %v1400_v17 }
 0x111   :  { %2881 = vmatpush2.bf16.msra.mxu0 %v1899_v30  ;;  %2922 = vmatpush2.bf16.msra.mxu1 %v1963_v33  ;;  %v1371_v30 = vld [vmem:[%s7080_s5 + $0x440] sm:$0xff] }
 0x112   :  { %2882 = vmatprep.subr.bf16.mxu0 %v1896_v37  ;;  %2923 = vmatprep.subr.bf16.mxu1 %v1960_v53  ;;  %v1403_v33 = vld [vmem:[%s7080_s5 + $0x540] sm:$0xff]  ;;  %v2011_v37 = vunpack.c.h.s8.bf16 %v1371_v30  ;;  %v2007_v31 = vunpack.c.l.s8.bf16 %v1371_v30 }
 0x113   :  { %v2075_v53 = vunpack.c.h.s8.bf16 %v1403_v33 }
 0x115   :  { %2883 = vmatpush2.bf16.msra.mxu0 %v1895_v28  ;;  %2924 = vmatpush2.bf16.msra.mxu1 %v1959_v51  ;;  %v2071_v28 = vunpack.c.l.s8.bf16 %v1403_v33  ;;  %v2004_v51 = vunpack.c.h.s8.bf16 %v1368_v49 }
 0x116   :  { %2934 = vmatprep.subr.bf16.mxu0 %v2020_v1  ;;  %2975 = vmatprep.subr.bf16.mxu1 %v2084_v55  ;;  %v1367_v1 = vld [vmem:[%s7080_s5 + $0x420] sm:$0xff] }
 0x117   :  { %v1399_v55 = vld [vmem:[%s7080_s5 + $0x520] sm:$0xff]  ;;  %v2003_v61 = vunpack.c.h.s8.bf16 %v1367_v1 }
 0x118   :  { %2885 = vmatmul.mubr.bf16.vlgmr.msra.gmra.mxu0 %v5340_v45  ;;  %2926 = vmatmul.mubr.bf16.vlgmr.msra.gmra.mxu1 %v5342_v22  ;;  %v2067_v6 = vunpack.c.h.s8.bf16 %v1399_v55 }
 0x119   :  { %2935 = vmatpush1.bf16.msra.mxu0 %v2019_v11  ;;  %2976 = vmatpush1.bf16.msra.mxu1 %v2083_v4  ;;  %v1364_v11 = vld [vmem:[%s7080_s5 + $0x408] sm:$0xff] }
 0x11a   :  { %2936 = vmatprep.subr.bf16.mxu0 %v2016_v34  ;;  %2977 = vmatprep.subr.bf16.mxu1 %v2080_v36  ;;  %v1396_v4 = vld [vmem:[%s7080_s5 + $0x508] sm:$0xff]  ;;  %v1999_v34 = vunpack.c.l.s8.bf16 %v1367_v1  ;;  %v2063_v36 = vunpack.c.l.s8.bf16 %v1399_v55  ;;  %v1996_v7 = vunpack.c.h.s8.bf16 %v1364_v11  ;;  %v1992_v30 = vunpack.c.l.s8.bf16 %v1364_v11 }
 0x11b   :  { %3007 = vmatprep.mubr.bf16.mxu1 %v5350_v47  ;;  %2966 = vmatprep.mubr.bf16.mxu0 %v5352_v25  ;;  %v2060_v43 = vunpack.c.h.s8.bf16 %v1396_v4  ;;  %v2056_v33 = vunpack.c.l.s8.bf16 %v1396_v4 }
 0x11d   :  { %2937 = vmatpush1.bf16.msra.mxu0 %v2015_v2  ;;  %2978 = vmatpush1.bf16.msra.mxu1 %v2079_v59  ;;  %v1363_v2 = vld [vmem:[%s7080_s5 + $0x400] sm:$0xff] }
 0x11e   :  { %2938 = vmatprep.subr.bf16.mxu0 %v2012_v26  ;;  %2979 = vmatprep.subr.bf16.mxu1 %v2076_v3  ;;  %v1395_v59 = vld [vmem:[%s7080_s5 + $0x500] sm:$0xff]  ;;  %v1995_v26 = vunpack.c.h.s8.bf16 %v1363_v2 }
 0x11f   :  { %v2059_v3 = vunpack.c.h.s8.bf16 %v1395_v59 }
 0x121   :  { %2939 = vmatpush1.bf16.msra.mxu0 %v2011_v37  ;;  %2980 = vmatpush1.bf16.msra.mxu1 %v2075_v53  ;;  %v1392_v37 = vld [vmem:[%s7080_s5 + $0x4e8] sm:$0xff] }
 0x122   :  { %2940 = vmatprep.subr.bf16.mxu0 %v2008_v48  ;;  %2981 = vmatprep.subr.bf16.mxu1 %v2072_v54  ;;  %v1424_v53 = vld [vmem:[%s7080_s5 + $0x5e8] sm:$0xff]  ;;  %v1991_v48 = vunpack.c.l.s8.bf16 %v1363_v2  ;;  %v2055_v54 = vunpack.c.l.s8.bf16 %v1395_v59  ;;  %v2052_v49 = vunpack.c.h.s8.bf16 %v1392_v37  ;;  %v2048_v1 = vunpack.c.l.s8.bf16 %v1392_v37 }
 0x123   :  { %v2116_v17 = vunpack.c.h.s8.bf16 %v1424_v53  ;;  %v2112_v55 = vunpack.c.l.s8.bf16 %v1424_v53 }
 0x125   :  { %2941 = vmatpush1.bf16.msra.mxu0 %v2007_v31  ;;  %2982 = vmatpush1.bf16.msra.mxu1 %v2071_v28  ;;  %v1391_v31 = vld [vmem:[%s7080_s5 + $0x4e0] sm:$0xff] }
 0x126   :  { %2942 = vmatprep.subr.bf16.mxu0 %v2004_v51  ;;  %2983 = vmatprep.subr.bf16.mxu1 %v2068_v0  ;;  %v1423_v28 = vld [vmem:[%s7080_s5 + $0x5e0] sm:$0xff]  ;;  %v2051_v51 = vunpack.c.h.s8.bf16 %v1391_v31 }
 0x127   :  { %v2115_v0 = vunpack.c.h.s8.bf16 %v1423_v28 }
 0x129   :  { %2943 = vmatpush1.bf16.msra.mxu0 %v2003_v61  ;;  %2984 = vmatpush1.bf16.msra.mxu1 %v2067_v6  ;;  %v1388_v61 = vld [vmem:[%s7080_s5 + $0x4c8] sm:$0xff] }
 0x12a   :  { %2944 = vmatprep.subr.bf16.mxu0 %v2000_v42  ;;  %2985 = vmatprep.subr.bf16.mxu1 %v2064_v5  ;;  %v1420_v6 = vld [vmem:[%s7080_s5 + $0x5c8] sm:$0xff]  ;;  %v2047_v42 = vunpack.c.l.s8.bf16 %v1391_v31  ;;  %v2111_v5 = vunpack.c.l.s8.bf16 %v1423_v28  ;;  %v2044_v11 = vunpack.c.h.s8.bf16 %v1388_v61  ;;  %v2040_v2 = vunpack.c.l.s8.bf16 %v1388_v61 }
 0x12b   :  { %v2108_v4 = vunpack.c.h.s8.bf16 %v1420_v6  ;;  %v2104_v59 = vunpack.c.l.s8.bf16 %v1420_v6  ;;  %v854_v31 = vrot.slane %v5155_v52, %v5036_v13  ;;  %v846_v28 = vrot.slane %v5155_v52, %v5034_v12  ;;  %v1412_v61 = vld [vmem:[%s7080_s5 + $0x588] sm:$0xff] }
 0x12c   :  { %v874_v6 = vrot.slane %v5155_v52, %v5072_v35 }
 0x12d   :  { %2945 = vmatpush1.bf16.msra.mxu0 %v1999_v34  ;;  %2986 = vmatpush1.bf16.msra.mxu1 %v2063_v36  ;;  %v1387_v34 = vld [vmem:[%s7080_s5 + $0x4c0] sm:$0xff] }
 0x12e   :  { %2946 = vmatprep.subr.bf16.mxu0 %v1996_v7  ;;  %2987 = vmatprep.subr.bf16.mxu1 %v2060_v43  ;;  %v1419_v36 = vld [vmem:[%s7080_s5 + $0x5c0] sm:$0xff]  ;;  %v2043_v7 = vunpack.c.h.s8.bf16 %v1387_v34 }
 0x12f   :  { %v2107_v43 = vunpack.c.h.s8.bf16 %v1419_v36 }
 0x131   :  { %2947 = vmatpush1.bf16.msra.mxu0 %v1995_v26  ;;  %2988 = vmatpush1.bf16.msra.mxu1 %v2059_v3  ;;  %v1384_v26 = vld [vmem:[%s7080_s5 + $0x4a8] sm:$0xff] }
 0x132   :  { %2948 = vmatprep.subr.bf16.mxu0 %v1992_v30  ;;  %2989 = vmatprep.subr.bf16.mxu1 %v2056_v33  ;;  %v1416_v3 = vld [vmem:[%s7080_s5 + $0x5a8] sm:$0xff]  ;;  %v2039_v30 = vunpack.c.l.s8.bf16 %v1387_v34  ;;  %v2103_v33 = vunpack.c.l.s8.bf16 %v1419_v36  ;;  %v2036_v37 = vunpack.c.h.s8.bf16 %v1384_v26  ;;  %v981_v34 = vmul.f32 %v854_v31, %v5132_v39 }
 0x133   :  { %v2100_v53 = vunpack.c.h.s8.bf16 %v1416_v3  ;;  %v979_v36 = vmul.f32 %v846_v28, %v5134_v40  ;;  %v986_v39 = vmul.f32 %v874_v6, %v5176_v23  ;;  %v1074_v40 = vrot.slane %v5168_v62, %v5072_v35  ;;  %v1472_v23 = vld [vmem:[%s7080_s5 + $0x768] sm:$0xff] }
 0x134   :  { %v2212_v28 = vunpack.c.h.s8.bf16 %v1472_v23 }
 0x135   :  { %2949 = vmatpush1.bf16.msra.mxu0 %v1991_v48  ;;  %2990 = vmatpush1.bf16.msra.mxu1 %v2055_v54  ;;  %v1383_v48 = vld [vmem:[%s7080_s5 + $0x4a0] sm:$0xff]  ;;  %v1186_v35 = vadd.f32 %v1074_v40, %v986_v39 }
 0x136   :  { %2950 = vmatprep.subr.bf16.mxu0 %v2052_v49  ;;  %2991 = vmatprep.subr.bf16.mxu1 %v2116_v17  ;;  %v1415_v54 = vld [vmem:[%s7080_s5 + $0x5a0] sm:$0xff]  ;;  %v2035_v49 = vunpack.c.h.s8.bf16 %v1383_v48 }
 0x137   :  { %v2099_v17 = vunpack.c.h.s8.bf16 %v1415_v54  ;;  %v1467_v40 = vld [vmem:[%s7080_s5 + $0x740] sm:$0xff] }
 0x139   :  { %2951 = vmatpush2.bf16.msra.mxu0 %v2051_v51  ;;  %2992 = vmatpush2.bf16.msra.mxu1 %v2115_v0  ;;  %v2032_v51 = vunpack.c.l.s8.bf16 %v1384_v26  ;;  %v2096_v0 = vunpack.c.l.s8.bf16 %v1416_v3  ;;  %v1066_v26 = vrot.slane %v5168_v62, %v5081_v44 }
 0x13a   :  { %2952 = vmatprep.subr.bf16.mxu0 %v2048_v1  ;;  %2993 = vmatprep.subr.bf16.mxu1 %v2112_v55  ;;  %v866_v1 = vrot.slane %v5155_v52, %v5081_v44  ;;  %v1380_v55 = vld [vmem:[%s7080_s5 + $0x488] sm:$0xff]  ;;  %v1379_v52 = vld [vmem:[%s7080_s5 + $0x480] sm:$0xff] }
 0x13b   :  { %v2027_v3 = vunpack.c.h.s8.bf16 %v1379_v52  ;;  %v1440_v44 = vld [vmem:[%s7080_s5 + $0x668] sm:$0xff] }
 0x13c   :  { %v2148_v31 = vunpack.c.h.s8.bf16 %v1440_v44 }
 0x13d   :  { %2953 = vmatpush2.bf16.msra.mxu0 %v2047_v42  ;;  %2994 = vmatpush2.bf16.msra.mxu1 %v2111_v5  ;;  %v1054_v42 = vrot.slane %v5168_v62, %v5036_v13  ;;  %v1046_v5 = vrot.slane %v5168_v62, %v5034_v12  ;;  %v2023_v62 = vunpack.c.l.s8.bf16 %v1379_v52 }
 0x13e   :  { %2954 = vmatprep.subr.bf16.mxu0 %v2044_v11  ;;  %2995 = vmatprep.subr.bf16.mxu1 %v2108_v4  ;;  %v2031_v11 = vunpack.c.l.s8.bf16 %v1383_v48  ;;  %v2095_v4 = vunpack.c.l.s8.bf16 %v1415_v54  ;;  %v2088_v48 = vunpack.c.l.s8.bf16 %v1412_v61 }
 0x141   :  { %2955 = vmatpush2.bf16.msra.mxu0 %v2043_v7  ;;  %2996 = vmatpush2.bf16.msra.mxu1 %v2107_v43  ;;  %v2028_v7 = vunpack.c.h.s8.bf16 %v1380_v55  ;;  %v2092_v43 = vunpack.c.h.s8.bf16 %v1412_v61 }
 0x142   :  { %2956 = vmatprep.subr.bf16.mxu0 %v2040_v2  ;;  %2997 = vmatprep.subr.bf16.mxu1 %v2104_v59  ;;  %v1411_v2 = vld [vmem:[%s7080_s5 + $0x580] sm:$0xff]  ;;  %v984_v59 = vmul.f32 %v866_v1, %v5178_v24 }
 0x143   :  { %v2087_v24 = vunpack.c.l.s8.bf16 %v1411_v2  ;;  %v1471_v1 = vld [vmem:[%s7080_s5 + $0x760] sm:$0xff] }
 0x144   :  { %v1184_v54 = vadd.f32 %v1066_v26, %v984_v59  ;;  %v1435_v26 = vld [vmem:[%s7080_s5 + $0x640] sm:$0xff] }
 0x145   :  { %2957 = vmatpush2.bf16.msra.mxu0 %v2039_v30  ;;  %2998 = vmatpush2.bf16.msra.mxu1 %v2103_v33  ;;  %v2091_v30 = vunpack.c.h.s8.bf16 %v1411_v2  ;;  %v1181_v33 = vadd.f32 %v1054_v42, %v981_v34  ;;  %v2208_v34 = vunpack.c.l.s8.bf16 %v1472_v23  ;;  %v2207_v2 = vunpack.c.l.s8.bf16 %v1471_v1 }
 0x146   :  { %2958 = vmatprep.subr.bf16.mxu0 %v2036_v37  ;;  %2999 = vmatprep.subr.bf16.mxu1 %v2100_v53  ;;  %v1179_v37 = vadd.f32 %v1046_v5, %v979_v36  ;;  %v2024_v53 = vunpack.c.l.s8.bf16 %v1380_v55  ;;  %v1218_v55 = vmax.f32 %v1186_v35, 0.0  ;;  %v2211_v5 = vunpack.c.h.s8.bf16 %v1471_v1  ;;  %v1436_v36 = vld [vmem:[%s7080_s5 + $0x648] sm:$0xff]  ;;  %v1431_v35 = vld [vmem:[%s7080_s5 + $0x620] sm:$0xff] }
 0x147   :  { %v2140_v59 = vunpack.c.h.s8.bf16 %v1436_v36  ;;  %v2127_v1 = vunpack.c.l.s8.bf16 %v1431_v35 }
 0x149   :  { %2959 = vmatpush2.bf16.msra.mxu0 %v2035_v49  ;;  %3000 = vmatpush2.bf16.msra.mxu1 %v2099_v17  ;;  %v1213_v49 = vmax.f32 %v1181_v33, 0.0  ;;  %v1211_v17 = vmax.f32 %v1179_v37, 0.0  ;;  %v2136_v33 = vunpack.c.l.s8.bf16 %v1436_v36 }
 0x14a   :  { %2960 = vmatprep.subr.bf16.mxu0 %v2032_v51  ;;  %3001 = vmatprep.subr.bf16.mxu1 %v2096_v0  ;;  %v1439_v51 = vld [vmem:[%s7080_s5 + $0x660] sm:$0xff]  ;;  %v1216_v0 = vmax.f32 %v1184_v54, 0.0  ;;  %v2135_v54 = vunpack.c.l.s8.bf16 %v1435_v26 }
 0x14b   :  { %v2147_v61 = vunpack.c.h.s8.bf16 %v1439_v51  ;;  %v5468_v6 = vpack.c.bf16 %v1213_v49, %v1213_v49  ;;  %v5470_v42 = vpack.c.bf16 %v1211_v17, %v1211_v17  ;;  %v2143_v52 = vunpack.c.l.s8.bf16 %v1439_v51  ;;  %v1428_v51 = vld [vmem:[%s7080_s5 + $0x608] sm:$0xff] }
 0x14c   :  { %v2131_v49 = vunpack.c.h.s8.bf16 %v1431_v35  ;;  %v1484_v35 = vld [vmem:[%s7080_s5 + $0x7c8] sm:$0xff] }
 0x14d   :  { %2961 = vmatpush2.bf16.msra.mxu0 %v2031_v11  ;;  %3002 = vmatpush2.bf16.msra.mxu1 %v2095_v4  ;;  %v5472_v11 = vpack.c.bf16 %v1216_v0, %v1216_v0  ;;  %v2144_v4 = vunpack.c.l.s8.bf16 %v1440_v44  ;;  %v2199_v44 = vunpack.c.l.s8.bf16 %v1467_v40  ;;  %v1460_v0 = vld [vmem:[%s7080_s5 + $0x708] sm:$0xff] }
 0x14e   :  { %2962 = vmatprep.subr.bf16.mxu0 %v2028_v7  ;;  %3003 = vmatprep.subr.bf16.mxu1 %v2092_v43  ;;  %v5477_v7 = vpack.c.bf16 %v1218_v55, %v1218_v55  ;;  %v1468_v43 = vld [vmem:[%s7080_s5 + $0x748] sm:$0xff] }
 0x14f   :  { %v2204_v39 = vunpack.c.h.s8.bf16 %v1468_v43  ;;  %v2200_v37 = vunpack.c.l.s8.bf16 %v1468_v43 }
 0x151   :  { %2963 = vmatpush2.bf16.msra.mxu0 %v2027_v3  ;;  %3004 = vmatpush2.bf16.msra.mxu1 %v2091_v30  ;;  %v2139_v3 = vunpack.c.h.s8.bf16 %v1435_v26  ;;  %v2203_v30 = vunpack.c.h.s8.bf16 %v1467_v40  ;;  %v1488_v26 = vld [vmem:[%s7080_s5 + $0x7e8] sm:$0xff] }
 0x152   :  { %2964 = vmatprep.subr.bf16.mxu0 %v2024_v53  ;;  %3005 = vmatprep.subr.bf16.mxu1 %v2088_v48  ;;  %v1432_v53 = vld [vmem:[%s7080_s5 + $0x628] sm:$0xff] }
 0x153   :  { %v1464_v48 = vld [vmem:[%s7080_s5 + $0x728] sm:$0xff]  ;;  %v2132_v23 = vunpack.c.h.s8.bf16 %v1432_v53 }
 0x155   :  { %2965 = vmatpush2.bf16.msra.mxu0 %v2023_v62  ;;  %3006 = vmatpush2.bf16.msra.mxu1 %v2087_v24  ;;  %v2196_v62 = vunpack.c.h.s8.bf16 %v1464_v48  ;;  %v1463_v24 = vld [vmem:[%s7080_s5 + $0x720] sm:$0xff] }
 0x156   :  { %3016 = vmatprep.subr.bf16.mxu0 %v2148_v31  ;;  %3057 = vmatprep.subr.bf16.mxu1 %v2212_v28  ;;  %v2195_v17 = vunpack.c.h.s8.bf16 %v1463_v24  ;;  %v2128_v31 = vunpack.c.l.s8.bf16 %v1432_v53  ;;  %v2192_v28 = vunpack.c.l.s8.bf16 %v1464_v48  ;;  %v2191_v55 = vunpack.c.l.s8.bf16 %v1463_v24 }
 0x158   :  { %2967 = vmatmul.mubr.bf16.vlgmr.msra.gmra.mxu0 %v5470_v42  ;;  %3008 = vmatmul.mubr.bf16.vlgmr.msra.gmra.mxu1 %v5468_v6 }
 0x159   :  { %3017 = vmatpush1.bf16.msra.mxu0 %v2147_v61  ;;  %3048 = vmatprep.mubr.bf16.mxu0 %v5472_v11  ;;  %v2124_v61 = vunpack.c.h.s8.bf16 %v1428_v51 }
 0x15a   :  { %3058 = vmatpush1.bf16.msra.mxu1 %v2211_v5  ;;  %3089 = vmatprep.mubr.bf16.mxu1 %v5477_v7  ;;  %v1427_v5 = vld [vmem:[%s7080_s5 + $0x600] sm:$0xff] }
 0x15b   :  { %3018 = vmatprep.subr.bf16.mxu0 %v2144_v4  ;;  %3059 = vmatprep.subr.bf16.mxu1 %v2208_v34  ;;  %v2188_v4 = vunpack.c.h.s8.bf16 %v1460_v0  ;;  %v1459_v34 = vld [vmem:[%s7080_s5 + $0x700] sm:$0xff]  ;;  %v2123_v36 = vunpack.c.h.s8.bf16 %v1427_v5 }
 0x15c   :  { %v2187_v43 = vunpack.c.h.s8.bf16 %v1459_v34  ;;  %v2183_v40 = vunpack.c.l.s8.bf16 %v1459_v34 }
 0x15d   :  { %3019 = vmatpush1.bf16.msra.mxu0 %v2143_v52  ;;  %v2120_v52 = vunpack.c.l.s8.bf16 %v1428_v51 }
 0x15e   :  { %3060 = vmatpush1.bf16.msra.mxu1 %v2207_v2  ;;  %3020 = vmatprep.subr.bf16.mxu0 %v2140_v59  ;;  %v2184_v2 = vunpack.c.l.s8.bf16 %v1460_v0  ;;  %v1456_v59 = vld [vmem:[%s7080_s5 + $0x6e8] sm:$0xff] }
 0x15f   :  { %3061 = vmatprep.subr.bf16.mxu1 %v2204_v39  ;;  %v2119_v39 = vunpack.c.l.s8.bf16 %v1427_v5  ;;  %v1480_v5 = vld [vmem:[%s7080_s5 + $0x7a8] sm:$0xff] }
 0x161   :  { %3021 = vmatpush1.bf16.msra.mxu0 %v2139_v3  ;;  %v2180_v3 = vunpack.c.h.s8.bf16 %v1456_v59 }
 0x162   :  { %3062 = vmatpush1.bf16.msra.mxu1 %v2203_v30  ;;  %3022 = vmatprep.subr.bf16.mxu0 %v2136_v33  ;;  %v1455_v30 = vld [vmem:[%s7080_s5 + $0x6e0] sm:$0xff]  ;;  %v2244_v33 = vunpack.c.h.s8.bf16 %v1488_v26 }
 0x163   :  { %3063 = vmatprep.subr.bf16.mxu1 %v2200_v37  ;;  %v1487_v37 = vld [vmem:[%s7080_s5 + $0x7e0] sm:$0xff]  ;;  %v2179_v53 = vunpack.c.h.s8.bf16 %v1455_v30 }
 0x164   :  { %v2243_v48 = vunpack.c.h.s8.bf16 %v1487_v37  ;;  %v2239_v24 = vunpack.c.l.s8.bf16 %v1487_v37  ;;  %v890_v37 = vrot.slane %v5213_v60, %v5045_v16 }
 0x165   :  { %3023 = vmatpush1.bf16.msra.mxu0 %v2135_v54  ;;  %v2176_v54 = vunpack.c.l.s8.bf16 %v1456_v59 }
 0x166   :  { %3064 = vmatpush1.bf16.msra.mxu1 %v2199_v44  ;;  %3024 = vmatprep.subr.bf16.mxu0 %v2132_v23  ;;  %v2240_v44 = vunpack.c.l.s8.bf16 %v1488_v26  ;;  %v1452_v23 = vld [vmem:[%s7080_s5 + $0x6c8] sm:$0xff] }
 0x167   :  { %3065 = vmatprep.subr.bf16.mxu1 %v2196_v62  ;;  %v2175_v62 = vunpack.c.l.s8.bf16 %v1455_v30  ;;  %v882_v30 = vrot.slane %v5213_v60, %v5043_v15  ;;  %v1082_v60 = vrot.slane %v5226_v14, %v5043_v15 }
 0x169   :  { %3025 = vmatpush1.bf16.msra.mxu0 %v2131_v49  ;;  %v2172_v49 = vunpack.c.h.s8.bf16 %v1452_v23 }
 0x16a   :  { %3066 = vmatpush1.bf16.msra.mxu1 %v2195_v17  ;;  %3026 = vmatprep.subr.bf16.mxu0 %v2128_v31  ;;  %v1451_v17 = vld [vmem:[%s7080_s5 + $0x6c0] sm:$0xff]  ;;  %v2236_v31 = vunpack.c.h.s8.bf16 %v1484_v35 }
 0x16b   :  { %3067 = vmatprep.subr.bf16.mxu1 %v2192_v28  ;;  %v1483_v28 = vld [vmem:[%s7080_s5 + $0x7c0] sm:$0xff]  ;;  %v2171_v51 = vunpack.c.h.s8.bf16 %v1451_v17 }
 0x16c   :  { %v2235_v0 = vunpack.c.h.s8.bf16 %v1483_v28  ;;  %v2231_v34 = vunpack.c.l.s8.bf16 %v1483_v28 }
 0x16d   :  { %3027 = vmatpush1.bf16.msra.mxu0 %v2127_v1  ;;  %v2168_v1 = vunpack.c.l.s8.bf16 %v1452_v23 }
 0x16e   :  { %3068 = vmatpush1.bf16.msra.mxu1 %v2191_v55  ;;  %3028 = vmatprep.subr.bf16.mxu0 %v2124_v61  ;;  %v2232_v55 = vunpack.c.l.s8.bf16 %v1484_v35  ;;  %v1448_v61 = vld [vmem:[%s7080_s5 + $0x6a8] sm:$0xff]  ;;  %v1475_v35 = vld [vmem:[%s7080_s5 + $0x780] sm:$0xff] }
 0x16f   :  { %3069 = vmatprep.subr.bf16.mxu1 %v2188_v4  ;;  %v2167_v4 = vunpack.c.l.s8.bf16 %v1451_v17 }
 0x171   :  { %3029 = vmatpush1.bf16.msra.mxu0 %v2123_v36  ;;  %v2164_v36 = vunpack.c.h.s8.bf16 %v1448_v61 }
 0x172   :  { %3070 = vmatpush1.bf16.msra.mxu1 %v2187_v43  ;;  %3030 = vmatprep.subr.bf16.mxu0 %v2120_v52  ;;  %v1447_v43 = vld [vmem:[%s7080_s5 + $0x6a0] sm:$0xff]  ;;  %v2228_v52 = vunpack.c.h.s8.bf16 %v1480_v5 }
 0x173   :  { %3071 = vmatprep.subr.bf16.mxu1 %v2184_v2  ;;  %v1479_v2 = vld [vmem:[%s7080_s5 + $0x7a0] sm:$0xff]  ;;  %v2163_v59 = vunpack.c.h.s8.bf16 %v1447_v43 }
 0x174   :  { %v2227_v26 = vunpack.c.h.s8.bf16 %v1479_v2 }
 0x175   :  { %3031 = vmatpush1.bf16.msra.mxu0 %v2119_v39  ;;  %v2160_v39 = vunpack.c.l.s8.bf16 %v1448_v61  ;;  %v2215_v61 = vunpack.c.l.s8.bf16 %v1475_v35 }
 0x176   :  { %3072 = vmatpush1.bf16.msra.mxu1 %v2183_v40  ;;  %3032 = vmatprep.subr.bf16.mxu0 %v2180_v3  ;;  %v2224_v40 = vunpack.c.l.s8.bf16 %v1480_v5  ;;  %v1444_v3 = vld [vmem:[%s7080_s5 + $0x688] sm:$0xff] }
 0x177   :  { %3073 = vmatprep.subr.bf16.mxu1 %v2244_v33  ;;  %v1476_v33 = vld [vmem:[%s7080_s5 + $0x788] sm:$0xff]  ;;  %v2152_v28 = vunpack.c.l.s8.bf16 %v1444_v3 }
 0x178   :  { %v2220_v23 = vunpack.c.h.s8.bf16 %v1476_v33 }
 0x179   :  { %3033 = vmatpush2.bf16.msra.mxu0 %v2179_v53  ;;  %v2159_v53 = vunpack.c.l.s8.bf16 %v1447_v43  ;;  %v1535_v43 = vld [vmem:[%s7080_s5 + $0x960] sm:$0xff] }
 0x17a   :  { %3074 = vmatpush2.bf16.msra.mxu1 %v2243_v48  ;;  %3034 = vmatprep.subr.bf16.mxu0 %v2176_v54  ;;  %v2223_v48 = vunpack.c.l.s8.bf16 %v1479_v2  ;;  %v2156_v54 = vunpack.c.h.s8.bf16 %v1444_v3 }
 0x17b   :  { %3075 = vmatprep.subr.bf16.mxu1 %v2240_v44  ;;  %v1443_v44 = vld [vmem:[%s7080_s5 + $0x680] sm:$0xff] }
 0x17c   :  { %v2155_v17 = vunpack.c.h.s8.bf16 %v1443_v44 }
 0x17d   :  { %3035 = vmatpush2.bf16.msra.mxu0 %v2175_v62  ;;  %v988_v62 = vmul.f32 %v882_v30, %v5202_v56  ;;  %v1504_v56 = vld [vmem:[%s7080_s5 + $0x868] sm:$0xff] }
 0x17e   :  { %3076 = vmatpush2.bf16.msra.mxu1 %v2239_v24  ;;  %3036 = vmatprep.subr.bf16.mxu0 %v2172_v49  ;;  %v990_v24 = vmul.f32 %v890_v37, %v5200_v20  ;;  %v1090_v49 = vrot.slane %v5226_v14, %v5045_v16  ;;  %v1536_v20 = vld [vmem:[%s7080_s5 + $0x968] sm:$0xff]  ;;  %v2151_v14 = vunpack.c.l.s8.bf16 %v1443_v44  ;;  %v2276_v5 = vunpack.c.h.s8.bf16 %v1504_v56 }
 0x17f   :  { %3077 = vmatprep.subr.bf16.mxu1 %v2236_v31  ;;  %v2219_v31 = vunpack.c.h.s8.bf16 %v1475_v35  ;;  %v2336_v37 = vunpack.c.l.s8.bf16 %v1536_v20 }
 0x181   :  { %3037 = vmatpush2.bf16.msra.mxu0 %v2171_v51  ;;  %v2216_v51 = vunpack.c.l.s8.bf16 %v1476_v33 }
 0x182   :  { %3078 = vmatpush2.bf16.msra.mxu1 %v2235_v0  ;;  %3038 = vmatprep.subr.bf16.mxu0 %v2168_v1  ;;  %v1188_v0 = vadd.f32 %v1082_v60, %v988_v62  ;;  %v1190_v1 = vadd.f32 %v1090_v49, %v990_v24  ;;  %v2335_v62 = vunpack.c.l.s8.bf16 %v1535_v43  ;;  %v1499_v24 = vld [vmem:[%s7080_s5 + $0x840] sm:$0xff] }
 0x183   :  { %3079 = vmatprep.subr.bf16.mxu1 %v2232_v55  ;;  %v1215_v55 = vmax.f32 %v5188_v29, 0.0 }
 0x184   :  { %v1222_v2 = vmax.f32 %v1190_v1, 0.0 }
 0x185   :  { %3039 = vmatpush2.bf16.msra.mxu0 %v2167_v4  ;;  %v1503_v4 = vld [vmem:[%s7080_s5 + $0x860] sm:$0xff] }
 0x186   :  { %3080 = vmatpush2.bf16.msra.mxu1 %v2231_v34  ;;  %3040 = vmatprep.subr.bf16.mxu0 %v2164_v36  ;;  %v1217_v34 = vmax.f32 %v5186_v27, 0.0  ;;  %v2340_v36 = vunpack.c.h.s8.bf16 %v1536_v20  ;;  %v2275_v29 = vunpack.c.h.s8.bf16 %v1503_v4  ;;  %v1500_v27 = vld [vmem:[%s7080_s5 + $0x848] sm:$0xff]  ;;  %v2271_v44 = vunpack.c.l.s8.bf16 %v1503_v4 }
 0x187   :  { %3081 = vmatprep.subr.bf16.mxu1 %v2228_v52  ;;  %v1220_v52 = vmax.f32 %v1188_v0, 0.0  ;;  %v2268_v60 = vunpack.c.h.s8.bf16 %v1500_v27  ;;  %v2263_v4 = vunpack.c.l.s8.bf16 %v1499_v24 }
 0x189   :  { %3041 = vmatpush2.bf16.msra.mxu0 %v2163_v59  ;;  %v5588_v59 = vpack.c.bf16 %v1215_v55, %v1215_v55  ;;  %v5595_v3 = vpack.c.bf16 %v1220_v52, %v1220_v52 }
 0x18a   :  { %3082 = vmatpush2.bf16.msra.mxu1 %v2227_v26  ;;  %3042 = vmatprep.subr.bf16.mxu0 %v2160_v39  ;;  %v2339_v26 = vunpack.c.h.s8.bf16 %v1535_v43  ;;  %v5590_v39 = vpack.c.bf16 %v1217_v34, %v1217_v34  ;;  %v1495_v43 = vld [vmem:[%s7080_s5 + $0x820] sm:$0xff] }
 0x18b   :  { %3083 = vmatprep.subr.bf16.mxu1 %v2224_v40  ;;  %v2272_v40 = vunpack.c.l.s8.bf16 %v1504_v56  ;;  %v2267_v56 = vunpack.c.h.s8.bf16 %v1499_v24 }
 0x18d   :  { %3043 = vmatpush2.bf16.msra.mxu0 %v2159_v53  ;;  %v1532_v53 = vld [vmem:[%s7080_s5 + $0x948] sm:$0xff] }
 0x18e   :  { %3084 = vmatpush2.bf16.msra.mxu1 %v2223_v48  ;;  %3044 = vmatprep.subr.bf16.mxu0 %v2156_v54  ;;  %v5601_v48 = vpack.c.bf16 %v1222_v2, %v1222_v2  ;;  %v2328_v55 = vunpack.c.l.s8.bf16 %v1532_v53  ;;  %v1527_v2 = vld [vmem:[%s7080_s5 + $0x920] sm:$0xff] }
 0x18f   :  { %3085 = vmatprep.subr.bf16.mxu1 %v2220_v23 }
 0x191   :  { %3045 = vmatpush2.bf16.msra.mxu0 %v2155_v17  ;;  %v2332_v17 = vunpack.c.h.s8.bf16 %v1532_v53  ;;  %v2319_v53 = vunpack.c.l.s8.bf16 %v1527_v2 }
 0x192   :  { %3086 = vmatpush2.bf16.msra.mxu1 %v2219_v31  ;;  %3046 = vmatprep.subr.bf16.mxu0 %v2152_v28  ;;  %v1531_v31 = vld [vmem:[%s7080_s5 + $0x940] sm:$0xff] }
 0x193   :  { %3087 = vmatprep.subr.bf16.mxu1 %v2216_v51  ;;  %v2331_v1 = vunpack.c.h.s8.bf16 %v1531_v31  ;;  %v2327_v34 = vunpack.c.l.s8.bf16 %v1531_v31 }
 0x195   :  { %3047 = vmatpush2.bf16.msra.mxu0 %v2151_v14  ;;  %v2264_v14 = vunpack.c.l.s8.bf16 %v1500_v27 }
 0x196   :  { %3088 = vmatpush2.bf16.msra.mxu1 %v2215_v61  ;;  %3098 = vmatprep.subr.bf16.mxu0 %v2276_v5  ;;  %v1496_v61 = vld [vmem:[%s7080_s5 + $0x828] sm:$0xff] }
 0x197   :  { %3139 = vmatprep.subr.bf16.mxu1 %v2340_v36  ;;  %v1528_v5 = vld [vmem:[%s7080_s5 + $0x928] sm:$0xff]  ;;  %v2260_v36 = vunpack.c.h.s8.bf16 %v1496_v61 }
 0x198   :  { %3049 = vmatmul.mubr.bf16.vlgmr.msra.gmra.mxu0 %v5588_v59  ;;  %v2804_v30 = vpop.f32.mrf.mxu0  ;;  %v2845_v33 = vpop.f32.mrf.mxu1  ;;  %v2324_v52 = vunpack.c.h.s8.bf16 %v1528_v5  ;;  %v2320_v27 = vunpack.c.l.s8.bf16 %v1528_v5 }
 0x199   :  { %3090 = vmatmul.mubr.bf16.vlgmr.msra.gmra.mxu1 %v5590_v39  ;;  %v5604_v54 = vadd.f32 %v2845_v33, %v2804_v30  ;;  %3099 = vmatpush1.bf16.msra.mxu0 %v2275_v29  ;;  %v2259_v29 = vunpack.c.h.s8.bf16 %v1495_v43  ;;  %v1492_v30 = vld [vmem:[%s7080_s5 + $0x808] sm:$0xff] }
 0x19a   :  { %3130 = vmatprep.mubr.bf16.mxu0 %v5595_v3  ;;  %3140 = vmatpush1.bf16.msra.mxu1 %v2339_v26  ;;  %v2806_v23 = vpop.f32.mrf.mxu0  ;;  %v2847_v35 = vpop.f32.mrf.mxu1  ;;  %v2323_v26 = vunpack.c.h.s8.bf16 %v1527_v2  ;;  %v1524_v33 = vld [vmem:[%s7080_s5 + $0x908] sm:$0xff] }
 0x19b   :  { %3171 = vmatprep.mubr.bf16.mxu1 %v5601_v48  ;;  %v5611_v49 = vadd.f32 %v2847_v35, %v2806_v23  ;;  %3100 = vmatprep.subr.bf16.mxu0 %v2272_v40  ;;  %v2256_v40 = vunpack.c.l.s8.bf16 %v1496_v61  ;;  %v1491_v23 = vld [vmem:[%s7080_s5 + $0x800] sm:$0xff]  ;;  %v2316_v35 = vunpack.c.h.s8.bf16 %v1524_v33  ;;  %v2312_v31 = vunpack.c.l.s8.bf16 %v1524_v33 }
 0x19c   :  { %3141 = vmatprep.subr.bf16.mxu1 %v2336_v37  ;;  %v2808_v28 = vpop.f32.mrf.mxu0  ;;  %v2849_v51 = vpop.f32.mrf.mxu1  ;;  %v2255_v37 = vunpack.c.l.s8.bf16 %v1495_v43  ;;  %v1548_v43 = vld [vmem:[%s7080_s5 + $0x9c8] sm:$0xff] }
 0x19d   :  { %3101 = vmatpush1.bf16.msra.mxu0 %v2271_v44  ;;  %v2252_v44 = vunpack.c.h.s8.bf16 %v1492_v30  ;;  %v1520_v28 = vld [vmem:[%s7080_s5 + $0x8e8] sm:$0xff] }
 0x19e   :  { %3142 = vmatpush1.bf16.msra.mxu1 %v2335_v62  ;;  %v2809_v0 = vpop.f32.mrf.mxu0  ;;  %v2850_v20 = vpop.f32.mrf.mxu1  ;;  %3102 = vmatprep.subr.bf16.mxu0 %v2268_v60  ;;  %v1523_v62 = vld [vmem:[%s7080_s5 + $0x900] sm:$0xff]  ;;  %v2251_v60 = vunpack.c.h.s8.bf16 %v1491_v23  ;;  %v1552_v51 = vld [vmem:[%s7080_s5 + $0x9e8] sm:$0xff] }
 0x19f   :  { %3143 = vmatprep.subr.bf16.mxu1 %v2332_v17  ;;  %v2315_v24 = vunpack.c.h.s8.bf16 %v1523_v62  ;;  %v2248_v17 = vunpack.c.l.s8.bf16 %v1492_v30  ;;  %v2311_v0 = vunpack.c.l.s8.bf16 %v1523_v62  ;;  %v2308_v20 = vunpack.c.h.s8.bf16 %v1520_v28 }
 0x1a1   :  { %3103 = vmatpush1.bf16.msra.mxu0 %v2267_v56  ;;  %v2247_v56 = vunpack.c.l.s8.bf16 %v1491_v23  ;;  %v1544_v23 = vld [vmem:[%s7080_s5 + $0x9a8] sm:$0xff] }
 0x1a2   :  { %3144 = vmatpush1.bf16.msra.mxu1 %v2331_v1  ;;  %3104 = vmatprep.subr.bf16.mxu0 %v2264_v14  ;;  %v1519_v1 = vld [vmem:[%s7080_s5 + $0x8e0] sm:$0xff]  ;;  %v2372_v14 = vunpack.c.h.s8.bf16 %v1552_v51 }
 0x1a3   :  { %3145 = vmatprep.subr.bf16.mxu1 %v2328_v55  ;;  %v1551_v55 = vld [vmem:[%s7080_s5 + $0x9e0] sm:$0xff]  ;;  %v2307_v61 = vunpack.c.h.s8.bf16 %v1519_v1 }
 0x1a4   :  { %v2371_v5 = vunpack.c.h.s8.bf16 %v1551_v55  ;;  %v2367_v2 = vunpack.c.l.s8.bf16 %v1551_v55  ;;  %v1508_v55 = vld [vmem:[%s7080_s5 + $0x888] sm:$0xff] }
 0x1a5   :  { %3105 = vmatpush1.bf16.msra.mxu0 %v2263_v4  ;;  %v2304_v4 = vunpack.c.l.s8.bf16 %v1520_v28 }
 0x1a6   :  { %3146 = vmatpush1.bf16.msra.mxu1 %v2327_v34  ;;  %3106 = vmatprep.subr.bf16.mxu0 %v2260_v36  ;;  %v2368_v34 = vunpack.c.l.s8.bf16 %v1552_v51  ;;  %v1516_v36 = vld [vmem:[%s7080_s5 + $0x8c8] sm:$0xff]  ;;  %v4695_v51 = vld [vmem:[%s7081_s3 + $0x10] sm:$0xff] }
 0x1a7   :  { %3147 = vmatprep.subr.bf16.mxu1 %v2324_v52  ;;  %v2303_v52 = vunpack.c.l.s8.bf16 %v1519_v1  ;;  %v886_v1 = vrot.slane %v4695_v51, %v5036_v13 }
 0x1a9   :  { %3107 = vmatpush1.bf16.msra.mxu0 %v2259_v29  ;;  %v2300_v29 = vunpack.c.h.s8.bf16 %v1516_v36 }
 0x1aa   :  { %3148 = vmatpush1.bf16.msra.mxu1 %v2323_v26  ;;  %3108 = vmatprep.subr.bf16.mxu0 %v2256_v40  ;;  %v1515_v26 = vld [vmem:[%s7080_s5 + $0x8c0] sm:$0xff]  ;;  %v2364_v40 = vunpack.c.h.s8.bf16 %v1548_v43 }
 0x1ab   :  { %3149 = vmatprep.subr.bf16.mxu1 %v2320_v27  ;;  %v1547_v27 = vld [vmem:[%s7080_s5 + $0x9c0] sm:$0xff]  ;;  %v2299_v30 = vunpack.c.h.s8.bf16 %v1515_v26 }
 0x1ac   :  { %v2363_v33 = vunpack.c.h.s8.bf16 %v1547_v27  ;;  %v2359_v62 = vunpack.c.l.s8.bf16 %v1547_v27 }
 0x1ad   :  { %3109 = vmatpush1.bf16.msra.mxu0 %v2255_v37  ;;  %v2296_v37 = vunpack.c.l.s8.bf16 %v1516_v36 }
 0x1ae   :  { %3150 = vmatpush1.bf16.msra.mxu1 %v2319_v53  ;;  %3110 = vmatprep.subr.bf16.mxu0 %v2252_v44  ;;  %v2360_v53 = vunpack.c.l.s8.bf16 %v1548_v43  ;;  %v1512_v44 = vld [vmem:[%s7080_s5 + $0x8a8] sm:$0xff] }
 0x1af   :  { %3151 = vmatprep.subr.bf16.mxu1 %v2316_v35  ;;  %v2295_v35 = vunpack.c.l.s8.bf16 %v1515_v26 }
 0x1b1   :  { %3111 = vmatpush1.bf16.msra.mxu0 %v2251_v60  ;;  %v2292_v60 = vunpack.c.h.s8.bf16 %v1512_v44 }
 0x1b2   :  { %3152 = vmatpush1.bf16.msra.mxu1 %v2315_v24  ;;  %3112 = vmatprep.subr.bf16.mxu0 %v2248_v17  ;;  %v1511_v24 = vld [vmem:[%s7080_s5 + $0x8a0] sm:$0xff]  ;;  %v2356_v17 = vunpack.c.h.s8.bf16 %v1544_v23 }
 0x1b3   :  { %3153 = vmatprep.subr.bf16.mxu1 %v2312_v31  ;;  %v1543_v31 = vld [vmem:[%s7080_s5 + $0x9a0] sm:$0xff]  ;;  %v2291_v28 = vunpack.c.h.s8.bf16 %v1511_v24 }
 0x1b4   :  { %v2351_v43 = vunpack.c.l.s8.bf16 %v1543_v31 }
 0x1b5   :  { %3113 = vmatpush1.bf16.msra.mxu0 %v2247_v56  ;;  %v878_v56 = vrot.slane %v4695_v51, %v5034_v12  ;;  %v1599_v51 = vld [vmem:[%s7080_s5 + $0xb60] sm:$0xff] }
 0x1b6   :  { %3154 = vmatpush1.bf16.msra.mxu1 %v2311_v0  ;;  %3114 = vmatprep.subr.bf16.mxu0 %v2308_v20  ;;  %v2355_v0 = vunpack.c.h.s8.bf16 %v1543_v31  ;;  %v2288_v20 = vunpack.c.l.s8.bf16 %v1512_v44 }
 0x1b7   :  { %3155 = vmatprep.subr.bf16.mxu1 %v2372_v14  ;;  %v2352_v14 = vunpack.c.l.s8.bf16 %v1544_v23  ;;  %v1600_v23 = vld [vmem:[%s7080_s5 + $0xb68] sm:$0xff] }
 0x1b9   :  { %3115 = vmatpush2.bf16.msra.mxu0 %v2307_v61  ;;  %v1540_v61 = vld [vmem:[%s7080_s5 + $0x988] sm:$0xff] }
 0x1ba   :  { %3156 = vmatpush2.bf16.msra.mxu1 %v2371_v5  ;;  %3116 = vmatprep.subr.bf16.mxu0 %v2304_v4  ;;  %v2287_v5 = vunpack.c.l.s8.bf16 %v1511_v24  ;;  %v987_v4 = vmul.f32 %v878_v56, %v5198_v50  ;;  %v2348_v50 = vunpack.c.h.s8.bf16 %v1540_v61  ;;  %v2344_v44 = vunpack.c.l.s8.bf16 %v1540_v61 }
 0x1bb   :  { %3157 = vmatprep.subr.bf16.mxu1 %v2368_v34  ;;  %v4696_v34 = vld [vmem:[%s7082_s4 + $0x10] sm:$0xff]  ;;  %v1224_v56 = vmax.f32 %v5254_v21, 0.0 }
 0x1bc   :  { %v1078_v36 = vrot.slane %v4696_v34, %v5034_v12  ;;  %v1086_v26 = vrot.slane %v4696_v34, %v5036_v13 }
 0x1bd   :  { %3117 = vmatpush2.bf16.msra.mxu0 %v2303_v52  ;;  %v2284_v52 = vunpack.c.h.s8.bf16 %v1508_v55 }
 0x1be   :  { %3158 = vmatpush2.bf16.msra.mxu1 %v2367_v2  ;;  %3118 = vmatprep.subr.bf16.mxu0 %v2300_v29  ;;  %v1507_v2 = vld [vmem:[%s7080_s5 + $0x880] sm:$0xff]  ;;  %v989_v29 = vmul.f32 %v886_v1, %v5196_v46  ;;  %v1568_v46 = vld [vmem:[%s7080_s5 + $0xa68] sm:$0xff] }
 0x1bf   :  { %3159 = vmatprep.subr.bf16.mxu1 %v2364_v40  ;;  %v1539_v40 = vld [vmem:[%s7080_s5 + $0x980] sm:$0xff]  ;;  %v2283_v27 = vunpack.c.h.s8.bf16 %v1507_v2  ;;  %v2404_v24 = vunpack.c.h.s8.bf16 %v1568_v46  ;;  %v2400_v61 = vunpack.c.l.s8.bf16 %v1568_v46 }
 0x1c1   :  { %3119 = vmatpush2.bf16.msra.mxu0 %v2299_v30  ;;  %v1187_v30 = vadd.f32 %v1078_v36, %v987_v4  ;;  %v5721_v4 = vpack.c.bf16 %v1224_v56, %v1224_v56  ;;  %v1596_v36 = vld [vmem:[%s7080_s5 + $0xb48] sm:$0xff] }
 0x1c2   :  { %3160 = vmatpush2.bf16.msra.mxu1 %v2363_v33  ;;  %3120 = vmatprep.subr.bf16.mxu0 %v2296_v37  ;;  %v2347_v33 = vunpack.c.h.s8.bf16 %v1539_v40  ;;  %v2280_v37 = vunpack.c.l.s8.bf16 %v1508_v55 }
 0x1c3   :  { %3161 = vmatprep.subr.bf16.mxu1 %v2360_v53  ;;  %v1189_v53 = vadd.f32 %v1086_v26, %v989_v29 }
 0x1c5   :  { %3121 = vmatpush2.bf16.msra.mxu0 %v2295_v35  ;;  %v2279_v35 = vunpack.c.l.s8.bf16 %v1507_v2  ;;  %v1221_v31 = vmax.f32 %v1189_v53, 0.0 }
 0x1c6   :  { %3162 = vmatpush2.bf16.msra.mxu1 %v2359_v62  ;;  %3122 = vmatprep.subr.bf16.mxu0 %v2292_v60  ;;  %v1219_v62 = vmax.f32 %v1187_v30, 0.0  ;;  %v2343_v60 = vunpack.c.l.s8.bf16 %v1539_v40 }
 0x1c7   :  { %3163 = vmatprep.subr.bf16.mxu1 %v2356_v17  ;;  %v1567_v17 = vld [vmem:[%s7080_s5 + $0xa60] sm:$0xff]  ;;  %v5716_v55 = vpack.c.bf16 %v1221_v31, %v1221_v31  ;;  %v1592_v31 = vld [vmem:[%s7080_s5 + $0xb28] sm:$0xff] }
 0x1c8   :  { %v5714_v1 = vpack.c.bf16 %v1219_v62, %v1219_v62  ;;  %v2399_v2 = vunpack.c.l.s8.bf16 %v1567_v17 }
 0x1c9   :  { %3123 = vmatpush2.bf16.msra.mxu0 %v2291_v28  ;;  %v2468_v28 = vunpack.c.h.s8.bf16 %v1600_v23 }
 0x1ca   :  { %3164 = vmatpush2.bf16.msra.mxu1 %v2355_v0  ;;  %3124 = vmatprep.subr.bf16.mxu0 %v2288_v20  ;;  %v1226_v0 = vmax.f32 %v5252_v19, 0.0  ;;  %v2403_v20 = vunpack.c.h.s8.bf16 %v1567_v17  ;;  %v2464_v19 = vunpack.c.l.s8.bf16 %v1600_v23  ;;  %v1560_v17 = vld [vmem:[%s7080_s5 + $0xa28] sm:$0xff] }
 0x1cb   :  { %3165 = vmatprep.subr.bf16.mxu1 %v2352_v14  ;;  %v2467_v14 = vunpack.c.h.s8.bf16 %v1599_v51  ;;  %v2388_v56 = vunpack.c.h.s8.bf16 %v1560_v17 }
 0x1cd   :  { %3125 = vmatpush2.bf16.msra.mxu0 %v2287_v5  ;;  %v1564_v5 = vld [vmem:[%s7080_s5 + $0xa48] sm:$0xff] }
 0x1ce   :  { %3166 = vmatpush2.bf16.msra.mxu1 %v2351_v43  ;;  %3126 = vmatprep.subr.bf16.mxu0 %v2284_v52  ;;  %v5727_v43 = vpack.c.bf16 %v1226_v0, %v1226_v0  ;;  %v2396_v40 = vunpack.c.h.s8.bf16 %v1564_v5  ;;  %v1559_v0 = vld [vmem:[%s7080_s5 + $0xa20] sm:$0xff] }
 0x1cf   :  { %3167 = vmatprep.subr.bf16.mxu1 %v2348_v50  ;;  %v2463_v50 = vunpack.c.l.s8.bf16 %v1599_v51 }
 0x1d1   :  { %3127 = vmatpush2.bf16.msra.mxu0 %v2283_v27  ;;  %v1563_v27 = vld [vmem:[%s7080_s5 + $0xa40] sm:$0xff] }
 0x1d2   :  { %3168 = vmatpush2.bf16.msra.mxu1 %v2347_v33  ;;  %3128 = vmatprep.subr.bf16.mxu0 %v2280_v37  ;;  %v2460_v33 = vunpack.c.h.s8.bf16 %v1596_v36  ;;  %v1595_v37 = vld [vmem:[%s7080_s5 + $0xb40] sm:$0xff]  ;;  %v2395_v23 = vunpack.c.h.s8.bf16 %v1563_v27 }
 0x1d3   :  { %3169 = vmatprep.subr.bf16.mxu1 %v2344_v44  ;;  %v2455_v51 = vunpack.c.l.s8.bf16 %v1595_v37 }
 0x1d5   :  { %3129 = vmatpush2.bf16.msra.mxu0 %v2279_v35 }
 0x1d6   :  { %3170 = vmatpush2.bf16.msra.mxu1 %v2343_v60  ;;  %3180 = vmatprep.subr.bf16.mxu0 %v2404_v24  ;;  %v2459_v60 = vunpack.c.h.s8.bf16 %v1595_v37  ;;  %v2392_v24 = vunpack.c.l.s8.bf16 %v1564_v5 }
 0x1d7   :  { %3221 = vmatprep.subr.bf16.mxu1 %v2468_v28  ;;  %v2391_v28 = vunpack.c.l.s8.bf16 %v1563_v27 }
 0x1d8   :  { %v2886_v21 = vpop.f32.mrf.mxu0  ;;  %v2927_v34 = vpop.f32.mrf.mxu1  ;;  %3131 = vmatmul.mubr.bf16.vlgmr.msra.gmra.mxu0 %v5714_v1 }
 0x1d9   :  { %v2887_v52 = vadd.f32 %v2886_v21, %v5604_v54  ;;  %3172 = vmatmul.mubr.bf16.vlgmr.msra.gmra.mxu1 %v5716_v55  ;;  %3181 = vmatpush1.bf16.msra.mxu0 %v2403_v20  ;;  %v2452_v20 = vunpack.c.h.s8.bf16 %v1592_v31  ;;  %v2384_v21 = vunpack.c.l.s8.bf16 %v1560_v17 }
 0x1da   :  { %3212 = vmatprep.mubr.bf16.mxu0 %v5721_v4  ;;  %3222 = vmatpush1.bf16.msra.mxu1 %v2467_v14  ;;  %v2888_v29 = vpop.f32.mrf.mxu0  ;;  %v2929_v26 = vpop.f32.mrf.mxu1  ;;  %v1591_v14 = vld [vmem:[%s7080_s5 + $0xb20] sm:$0xff] }
 0x1db   :  { %v5735_v30 = vadd.f32 %v2927_v34, %v2887_v52  ;;  %3253 = vmatprep.mubr.bf16.mxu1 %v5727_v43  ;;  %v2889_v54 = vadd.f32 %v2888_v29, %v5611_v49  ;;  %3182 = vmatprep.subr.bf16.mxu0 %v2400_v61  ;;  %v2456_v49 = vunpack.c.l.s8.bf16 %v1596_v36  ;;  %v2387_v61 = vunpack.c.h.s8.bf16 %v1559_v0  ;;  %v1588_v36 = vld [vmem:[%s7080_s5 + $0xb08] sm:$0xff] }
 0x1dc   :  { %v2890_v53 = vpop.f32.mrf.mxu0  ;;  %v2931_v44 = vpop.f32.mrf.mxu1  ;;  %3223 = vmatprep.subr.bf16.mxu1 %v2464_v19  ;;  %v2451_v5 = vunpack.c.h.s8.bf16 %v1591_v14  ;;  %v2448_v34 = vunpack.c.l.s8.bf16 %v1592_v31  ;;  %v1556_v19 = vld [vmem:[%s7080_s5 + $0xa08] sm:$0xff]  ;;  %v2383_v52 = vunpack.c.l.s8.bf16 %v1559_v0  ;;  %v2440_v37 = vunpack.c.l.s8.bf16 %v1588_v36 }
 0x1dd   :  { %v5742_v46 = vadd.f32 %v2929_v26, %v2889_v54  ;;  %3183 = vmatpush1.bf16.msra.mxu0 %v2399_v2  ;;  %v2447_v2 = vunpack.c.l.s8.bf16 %v1591_v14  ;;  %v2380_v29 = vunpack.c.h.s8.bf16 %v1556_v19  ;;  %v1555_v26 = vld [vmem:[%s7080_s5 + $0xa00] sm:$0xff]  ;;  %v1584_v53 = vld [vmem:[%s7080_s5 + $0xae8] sm:$0xff] }
 0x1de   :  { %3224 = vmatpush1.bf16.msra.mxu1 %v2463_v50  ;;  %v2891_v35 = vpop.f32.mrf.mxu0  ;;  %v2932_v62 = vpop.f32.mrf.mxu1  ;;  %3184 = vmatprep.subr.bf16.mxu0 %v2396_v40  ;;  %v2444_v50 = vunpack.c.h.s8.bf16 %v1588_v36  ;;  %v1587_v40 = vld [vmem:[%s7080_s5 + $0xb00] sm:$0xff]  ;;  %v2379_v27 = vunpack.c.h.s8.bf16 %v1555_v26  ;;  %v1616_v44 = vld [vmem:[%s7080_s5 + $0xbe8] sm:$0xff] }
 0x1df   :  { %3225 = vmatprep.subr.bf16.mxu1 %v2460_v33  ;;  %v2443_v54 = vunpack.c.h.s8.bf16 %v1587_v40  ;;  %v2376_v33 = vunpack.c.l.s8.bf16 %v1556_v19  ;;  %v2439_v35 = vunpack.c.l.s8.bf16 %v1587_v40  ;;  %v2436_v62 = vunpack.c.h.s8.bf16 %v1584_v53  ;;  %v1612_v0 = vld [vmem:[%s7080_s5 + $0xbc8] sm:$0xff] }
 0x1e1   :  { %3185 = vmatpush1.bf16.msra.mxu0 %v2395_v23  ;;  %v2375_v23 = vunpack.c.l.s8.bf16 %v1555_v26  ;;  %v1608_v26 = vld [vmem:[%s7080_s5 + $0xba8] sm:$0xff] }
 0x1e2   :  { %3226 = vmatpush1.bf16.msra.mxu1 %v2459_v60  ;;  %3186 = vmatprep.subr.bf16.mxu0 %v2392_v24  ;;  %v1583_v60 = vld [vmem:[%s7080_s5 + $0xae0] sm:$0xff]  ;;  %v2500_v24 = vunpack.c.h.s8.bf16 %v1616_v44 }
 0x1e3   :  { %3227 = vmatprep.subr.bf16.mxu1 %v2456_v49  ;;  %v1615_v49 = vld [vmem:[%s7080_s5 + $0xbe0] sm:$0xff]  ;;  %v2435_v17 = vunpack.c.h.s8.bf16 %v1583_v60 }
 0x1e4   :  { %v2499_v31 = vunpack.c.h.s8.bf16 %v1615_v49  ;;  %v2495_v14 = vunpack.c.l.s8.bf16 %v1615_v49  ;;  %v1604_v49 = vld [vmem:[%s7080_s5 + $0xb88] sm:$0xff] }
 0x1e5   :  { %3187 = vmatpush1.bf16.msra.mxu0 %v2391_v28  ;;  %v2432_v28 = vunpack.c.l.s8.bf16 %v1584_v53 }
 0x1e6   :  { %3228 = vmatpush1.bf16.msra.mxu1 %v2455_v51  ;;  %3188 = vmatprep.subr.bf16.mxu0 %v2388_v56  ;;  %v2496_v51 = vunpack.c.l.s8.bf16 %v1616_v44  ;;  %v1580_v56 = vld [vmem:[%s7080_s5 + $0xac8] sm:$0xff] }
 0x1e7   :  { %3229 = vmatprep.subr.bf16.mxu1 %v2452_v20  ;;  %v2431_v20 = vunpack.c.l.s8.bf16 %v1583_v60  ;;  %v5810_v60 = vld [vmem:[%s7081_s3 + $0x18] sm:$0xff] }
 0x1e9   :  { %3189 = vmatpush1.bf16.msra.mxu0 %v2387_v61  ;;  %v2428_v61 = vunpack.c.h.s8.bf16 %v1580_v56 }
 0x1ea   :  { %3230 = vmatpush1.bf16.msra.mxu1 %v2451_v5  ;;  %3190 = vmatprep.subr.bf16.mxu0 %v2384_v21  ;;  %v1579_v5 = vld [vmem:[%s7080_s5 + $0xac0] sm:$0xff]  ;;  %v2492_v21 = vunpack.c.h.s8.bf16 %v1612_v0 }
 0x1eb   :  { %3231 = vmatprep.subr.bf16.mxu1 %v2448_v34  ;;  %v1611_v34 = vld [vmem:[%s7080_s5 + $0xbc0] sm:$0xff]  ;;  %v2427_v19 = vunpack.c.h.s8.bf16 %v1579_v5 }
 0x1ec   :  { %v2491_v36 = vunpack.c.h.s8.bf16 %v1611_v34  ;;  %v2487_v40 = vunpack.c.l.s8.bf16 %v1611_v34 }
 0x1ed   :  { %3191 = vmatpush1.bf16.msra.mxu0 %v2383_v52  ;;  %v2424_v52 = vunpack.c.l.s8.bf16 %v1580_v56  ;;  %v1571_v56 = vld [vmem:[%s7080_s5 + $0xa80] sm:$0xff] }
 0x1ee   :  { %3232 = vmatpush1.bf16.msra.mxu1 %v2447_v2  ;;  %3192 = vmatprep.subr.bf16.mxu0 %v2380_v29  ;;  %v2488_v2 = vunpack.c.l.s8.bf16 %v1612_v0  ;;  %v1576_v29 = vld [vmem:[%s7080_s5 + $0xaa8] sm:$0xff]  ;;  %v2476_v0 = vunpack.c.h.s8.bf16 %v1604_v49 }
 0x1ef   :  { %3233 = vmatprep.subr.bf16.mxu1 %v2444_v50  ;;  %v2423_v50 = vunpack.c.l.s8.bf16 %v1579_v5 }
 0x1f1   :  { %3193 = vmatpush1.bf16.msra.mxu0 %v2379_v27  ;;  %v2420_v27 = vunpack.c.h.s8.bf16 %v1576_v29 }
 0x1f2   :  { %3234 = vmatpush1.bf16.msra.mxu1 %v2443_v54  ;;  %3194 = vmatprep.subr.bf16.mxu0 %v2376_v33  ;;  %v1575_v54 = vld [vmem:[%s7080_s5 + $0xaa0] sm:$0xff]  ;;  %v2484_v33 = vunpack.c.h.s8.bf16 %v1608_v26 }
 0x1f3   :  { %3235 = vmatprep.subr.bf16.mxu1 %v2440_v37  ;;  %v1607_v37 = vld [vmem:[%s7080_s5 + $0xba0] sm:$0xff]  ;;  %v2419_v53 = vunpack.c.h.s8.bf16 %v1575_v54 }
 0x1f4   :  { %v2483_v44 = vunpack.c.h.s8.bf16 %v1607_v37 }
 0x1f5   :  { %3195 = vmatpush1.bf16.msra.mxu0 %v2375_v23  ;;  %v2416_v23 = vunpack.c.l.s8.bf16 %v1576_v29 }
 0x1f6   :  { %3236 = vmatpush1.bf16.msra.mxu1 %v2439_v35  ;;  %3196 = vmatprep.subr.bf16.mxu0 %v2436_v62  ;;  %v2480_v35 = vunpack.c.l.s8.bf16 %v1608_v26  ;;  %v1572_v62 = vld [vmem:[%s7080_s5 + $0xa88] sm:$0xff] }
 0x1f7   :  { %3237 = vmatprep.subr.bf16.mxu1 %v2500_v24  ;;  %v914_v24 = vrot.slane %v5810_v60, %v5043_v15 }
 0x1f9   :  { %3197 = vmatpush2.bf16.msra.mxu0 %v2435_v17  ;;  %v922_v17 = vrot.slane %v5810_v60, %v5045_v16 }
 0x1fa   :  { %3238 = vmatpush2.bf16.msra.mxu1 %v2499_v31  ;;  %3198 = vmatprep.subr.bf16.mxu0 %v2432_v28  ;;  %v2415_v31 = vunpack.c.l.s8.bf16 %v1575_v54  ;;  %v2479_v28 = vunpack.c.l.s8.bf16 %v1607_v37  ;;  %v1225_v37 = vmax.f32 %v5248_v63, 0.0  ;;  %v1628_v63 = vld [vmem:[%s7080_s5 + $0xc48] sm:$0xff] }
 0x1fb   :  { %3239 = vmatprep.subr.bf16.mxu1 %v2496_v51  ;;  %v2412_v51 = vunpack.c.h.s8.bf16 %v1572_v62 }
 0x1fd   :  { %3199 = vmatpush2.bf16.msra.mxu0 %v2431_v20  ;;  %v1603_v20 = vld [vmem:[%s7080_s5 + $0xb80] sm:$0xff] }
 0x1fe   :  { %3240 = vmatpush2.bf16.msra.mxu1 %v2495_v14  ;;  %3200 = vmatprep.subr.bf16.mxu0 %v2428_v61  ;;  %v996_v14 = vmul.f32 %v914_v24, %v5268_v41  ;;  %v5829_v61 = vld [vmem:[%s7082_s4 + $0x18] sm:$0xff]  ;;  %v2472_v41 = vunpack.c.l.s8.bf16 %v1604_v49  ;;  %v5852_v49 = vpack.c.bf16 %v1225_v37, %v1225_v37  ;;  %v2520_v37 = vunpack.c.l.s8.bf16 %v1628_v63 }
 0x1ff   :  { %3241 = vmatprep.subr.bf16.mxu1 %v2492_v21  ;;  %v1114_v5 = vrot.slane %v5829_v61, %v5043_v15  ;;  %v998_v21 = vmul.f32 %v922_v17, %v5266_v38  ;;  %v1122_v34 = vrot.slane %v5829_v61, %v5045_v16  ;;  %v1664_v38 = vld [vmem:[%s7080_s5 + $0xd68] sm:$0xff] }
 0x201   :  { %3201 = vmatpush2.bf16.msra.mxu0 %v2427_v19  ;;  %v2411_v19 = vunpack.c.h.s8.bf16 %v1571_v56  ;;  %v1196_v29 = vadd.f32 %v1114_v5, %v996_v14  ;;  %v1198_v26 = vadd.f32 %v1122_v34, %v998_v21 }
 0x202   :  { %3242 = vmatpush2.bf16.msra.mxu1 %v2491_v36  ;;  %3202 = vmatprep.subr.bf16.mxu0 %v2424_v52  ;;  %v2475_v36 = vunpack.c.h.s8.bf16 %v1603_v20  ;;  %v2408_v52 = vunpack.c.l.s8.bf16 %v1572_v62 }
 0x203   :  { %3243 = vmatprep.subr.bf16.mxu1 %v2488_v2  ;;  %v1632_v2 = vld [vmem:[%s7080_s5 + $0xc68] sm:$0xff] }
 0x204   :  { %v2532_v54 = vunpack.c.h.s8.bf16 %v1632_v2  ;;  %v2528_v17 = vunpack.c.l.s8.bf16 %v1632_v2 }
 0x205   :  { %3203 = vmatpush2.bf16.msra.mxu0 %v2423_v50  ;;  %v2407_v50 = vunpack.c.l.s8.bf16 %v1571_v56  ;;  %v2592_v56 = vunpack.c.l.s8.bf16 %v1664_v38 }
 0x206   :  { %3244 = vmatpush2.bf16.msra.mxu1 %v2487_v40  ;;  %3204 = vmatprep.subr.bf16.mxu0 %v2420_v27  ;;  %v1223_v40 = vmax.f32 %v5250_v9, 0.0  ;;  %v2471_v27 = vunpack.c.l.s8.bf16 %v1603_v20 }
 0x207   :  { %3245 = vmatprep.subr.bf16.mxu1 %v2484_v33  ;;  %v1631_v33 = vld [vmem:[%s7080_s5 + $0xc60] sm:$0xff] }
 0x208   :  { %v2531_v9 = vunpack.c.h.s8.bf16 %v1631_v33  ;;  %v5850_v62 = vpack.c.bf16 %v1223_v40, %v1223_v40  ;;  %v2527_v5 = vunpack.c.l.s8.bf16 %v1631_v33 }
 0x209   :  { %3205 = vmatpush2.bf16.msra.mxu0 %v2419_v53  ;;  %v2596_v53 = vunpack.c.h.s8.bf16 %v1664_v38 }
 0x20a   :  { %3246 = vmatpush2.bf16.msra.mxu1 %v2483_v44  ;;  %3206 = vmatprep.subr.bf16.mxu0 %v2416_v23  ;;  %v1663_v44 = vld [vmem:[%s7080_s5 + $0xd60] sm:$0xff]  ;;  %v1228_v23 = vmax.f32 %v1196_v29, 0.0 }
 0x20b   :  { %3247 = vmatprep.subr.bf16.mxu1 %v2480_v35  ;;  %v1230_v35 = vmax.f32 %v1198_v26, 0.0  ;;  %v2595_v24 = vunpack.c.h.s8.bf16 %v1663_v44  ;;  %v1659_v29 = vld [vmem:[%s7080_s5 + $0xd40] sm:$0xff] }
 0x20c   :  { %v2587_v33 = vunpack.c.h.s8.bf16 %v1659_v29 }
 0x20d   :  { %3207 = vmatpush2.bf16.msra.mxu0 %v2415_v31  ;;  %v5857_v31 = vpack.c.bf16 %v1228_v23, %v1228_v23  ;;  %v5863_v20 = vpack.c.bf16 %v1230_v35, %v1230_v35  ;;  %v2583_v35 = vunpack.c.l.s8.bf16 %v1659_v29 }
 0x20e   :  { %3248 = vmatpush2.bf16.msra.mxu1 %v2479_v28  ;;  %3208 = vmatprep.subr.bf16.mxu0 %v2412_v51 }
 0x20f   :  { %3249 = vmatprep.subr.bf16.mxu1 %v2476_v0  ;;  %v1660_v0 = vld [vmem:[%s7080_s5 + $0xd48] sm:$0xff] }
 0x210   :  { %v2588_v2 = vunpack.c.h.s8.bf16 %v1660_v0 }
 0x211   :  { %3209 = vmatpush2.bf16.msra.mxu0 %v2411_v19  ;;  %v2591_v19 = vunpack.c.l.s8.bf16 %v1663_v44  ;;  %v1656_v44 = vld [vmem:[%s7080_s5 + $0xd28] sm:$0xff] }
 0x212   :  { %3250 = vmatpush2.bf16.msra.mxu1 %v2475_v36  ;;  %3210 = vmatprep.subr.bf16.mxu0 %v2408_v52  ;;  %v2524_v36 = vunpack.c.h.s8.bf16 %v1628_v63  ;;  %v1627_v52 = vld [vmem:[%s7080_s5 + $0xc40] sm:$0xff] }
 0x213   :  { %3251 = vmatprep.subr.bf16.mxu1 %v2472_v41  ;;  %v2523_v40 = vunpack.c.h.s8.bf16 %v1627_v52  ;;  %v2519_v23 = vunpack.c.l.s8.bf16 %v1627_v52  ;;  %v1655_v63 = vld [vmem:[%s7080_s5 + $0xd20] sm:$0xff] }
 0x215   :  { %3211 = vmatpush2.bf16.msra.mxu0 %v2407_v50 }
 0x216   :  { %3252 = vmatpush2.bf16.msra.mxu1 %v2471_v27  ;;  %3262 = vmatprep.subr.bf16.mxu0 %v2532_v54 }
 0x217   :  { %3303 = vmatprep.subr.bf16.mxu1 %v2596_v53  ;;  %v1624_v53 = vld [vmem:[%s7080_s5 + $0xc28] sm:$0xff] }
 0x218   :  { %v2968_v28 = vpop.f32.mrf.mxu0  ;;  %v3009_v51 = vpop.f32.mrf.mxu1  ;;  %3213 = vmatmul.mubr.bf16.vlgmr.msra.gmra.mxu0 %v5850_v62 }
 0x219   :  { %v2969_v14 = vadd.f32 %v2968_v28, %v5735_v30  ;;  %3254 = vmatmul.mubr.bf16.vlgmr.msra.gmra.mxu1 %v5852_v49  ;;  %3263 = vmatpush1.bf16.msra.mxu0 %v2531_v9  ;;  %v2516_v9 = vunpack.c.h.s8.bf16 %v1624_v53 }
 0x21a   :  { %3294 = vmatprep.mubr.bf16.mxu0 %v5857_v31  ;;  %3304 = vmatpush1.bf16.msra.mxu1 %v2595_v24  ;;  %v2970_v21 = vpop.f32.mrf.mxu0  ;;  %v3011_v34 = vpop.f32.mrf.mxu1  ;;  %v1623_v24 = vld [vmem:[%s7080_s5 + $0xc20] sm:$0xff] }
 0x21b   :  { %v5871_v41 = vadd.f32 %v3009_v51, %v2969_v14  ;;  %3335 = vmatprep.mubr.bf16.mxu1 %v5863_v20  ;;  %v2971_v30 = vadd.f32 %v2970_v21, %v5742_v46  ;;  %3264 = vmatprep.subr.bf16.mxu0 %v2528_v17  ;;  %v2584_v46 = vunpack.c.l.s8.bf16 %v1660_v0  ;;  %v2580_v17 = vunpack.c.h.s8.bf16 %v1656_v44  ;;  %v1620_v14 = vld [vmem:[%s7080_s5 + $0xc08] sm:$0xff] }
 0x21c   :  { %v2972_v38 = vpop.f32.mrf.mxu0  ;;  %v3013_v26 = vpop.f32.mrf.mxu1  ;;  %3305 = vmatprep.subr.bf16.mxu1 %v2592_v56  ;;  %v2515_v28 = vunpack.c.h.s8.bf16 %v1623_v24  ;;  %v2579_v51 = vunpack.c.h.s8.bf16 %v1655_v63  ;;  %v2512_v56 = vunpack.c.l.s8.bf16 %v1624_v53  ;;  %v2576_v0 = vunpack.c.l.s8.bf16 %v1656_v44  ;;  %v1679_v44 = vld [vmem:[%s7080_s5 + $0xde0] sm:$0xff] }
 0x21d   :  { %v5878_v50 = vadd.f32 %v3011_v34, %v2971_v30  ;;  %3265 = vmatpush1.bf16.msra.mxu0 %v2527_v5  ;;  %v1652_v5 = vld [vmem:[%s7080_s5 + $0xd08] sm:$0xff]  ;;  %v2511_v21 = vunpack.c.l.s8.bf16 %v1623_v24  ;;  %v2575_v34 = vunpack.c.l.s8.bf16 %v1655_v63  ;;  %v1651_v30 = vld [vmem:[%s7080_s5 + $0xd00] sm:$0xff]  ;;  %v2504_v38 = vunpack.c.l.s8.bf16 %v1620_v14 }
 0x21e   :  { %3306 = vmatpush1.bf16.msra.mxu1 %v2591_v19  ;;  %v2973_v27 = vpop.f32.mrf.mxu0  ;;  %v3014_v54 = vpop.f32.mrf.mxu1  ;;  %3266 = vmatprep.subr.bf16.mxu0 %v2524_v36  ;;  %v2508_v19 = vunpack.c.h.s8.bf16 %v1620_v14  ;;  %v1619_v36 = vld [vmem:[%s7080_s5 + $0xc00] sm:$0xff]  ;;  %v2572_v52 = vunpack.c.h.s8.bf16 %v1652_v5  ;;  %v2571_v29 = vunpack.c.h.s8.bf16 %v1651_v30  ;;  %v2568_v26 = vunpack.c.l.s8.bf16 %v1652_v5  ;;  %v1676_v63 = vld [vmem:[%s7080_s5 + $0xdc8] sm:$0xff] }
 0x21f   :  { %3307 = vmatprep.subr.bf16.mxu1 %v2588_v2  ;;  %v2507_v2 = vunpack.c.h.s8.bf16 %v1619_v36  ;;  %v1680_v27 = vld [vmem:[%s7080_s5 + $0xde8] sm:$0xff]  ;;  %v2503_v54 = vunpack.c.l.s8.bf16 %v1619_v36  ;;  %v2620_v14 = vunpack.c.h.s8.bf16 %v1676_v63  ;;  %v1675_v5 = vld [vmem:[%s7080_s5 + $0xdc0] sm:$0xff]  ;;  %v2616_v36 = vunpack.c.l.s8.bf16 %v1676_v63 }
 0x220   :  { %v2628_v53 = vunpack.c.h.s8.bf16 %v1680_v27  ;;  %v2624_v24 = vunpack.c.l.s8.bf16 %v1680_v27  ;;  %v1671_v27 = vld [vmem:[%s7080_s5 + $0xda0] sm:$0xff] }
 0x221   :  { %3267 = vmatpush1.bf16.msra.mxu0 %v2523_v40  ;;  %v1648_v40 = vld [vmem:[%s7080_s5 + $0xce8] sm:$0xff] }
 0x222   :  { %3308 = vmatpush1.bf16.msra.mxu1 %v2587_v33  ;;  %3268 = vmatprep.subr.bf16.mxu0 %v2520_v37  ;;  %v2567_v33 = vunpack.c.l.s8.bf16 %v1651_v30  ;;  %v2564_v37 = vunpack.c.h.s8.bf16 %v1648_v40  ;;  %v1672_v30 = vld [vmem:[%s7080_s5 + $0xda8] sm:$0xff] }
 0x223   :  { %3309 = vmatprep.subr.bf16.mxu1 %v2584_v46  ;;  %v1647_v46 = vld [vmem:[%s7080_s5 + $0xce0] sm:$0xff] }
 0x225   :  { %3269 = vmatpush1.bf16.msra.mxu0 %v2519_v23  ;;  %v2563_v23 = vunpack.c.h.s8.bf16 %v1647_v46 }
 0x226   :  { %3310 = vmatpush1.bf16.msra.mxu1 %v2583_v35  ;;  %3270 = vmatprep.subr.bf16.mxu0 %v2516_v9  ;;  %v2627_v35 = vunpack.c.h.s8.bf16 %v1679_v44  ;;  %v2560_v9 = vunpack.c.l.s8.bf16 %v1648_v40  ;;  %v2612_v40 = vunpack.c.h.s8.bf16 %v1672_v30 }
 0x227   :  { %3311 = vmatprep.subr.bf16.mxu1 %v2580_v17  ;;  %v1644_v17 = vld [vmem:[%s7080_s5 + $0xcc8] sm:$0xff] }
 0x229   :  { %3271 = vmatpush1.bf16.msra.mxu0 %v2515_v28  ;;  %v2559_v28 = vunpack.c.l.s8.bf16 %v1647_v46 }
 0x22a   :  { %3312 = vmatpush1.bf16.msra.mxu1 %v2579_v51  ;;  %3272 = vmatprep.subr.bf16.mxu0 %v2512_v56  ;;  %v2623_v51 = vunpack.c.l.s8.bf16 %v1679_v44  ;;  %v2556_v56 = vunpack.c.h.s8.bf16 %v1644_v17  ;;  %v2608_v44 = vunpack.c.l.s8.bf16 %v1672_v30 }
 0x22b   :  { %3313 = vmatprep.subr.bf16.mxu1 %v2576_v0  ;;  %v1643_v0 = vld [vmem:[%s7080_s5 + $0xcc0] sm:$0xff] }
 0x22d   :  { %3273 = vmatpush1.bf16.msra.mxu0 %v2511_v21  ;;  %v2555_v21 = vunpack.c.h.s8.bf16 %v1643_v0 }
 0x22e   :  { %3314 = vmatpush1.bf16.msra.mxu1 %v2575_v34  ;;  %3274 = vmatprep.subr.bf16.mxu0 %v2508_v19  ;;  %v2619_v34 = vunpack.c.h.s8.bf16 %v1675_v5  ;;  %v2552_v19 = vunpack.c.l.s8.bf16 %v1644_v17  ;;  %v1110_v17 = vrot.slane %v5829_v61, %v5034_v12 }
 0x22f   :  { %3315 = vmatprep.subr.bf16.mxu1 %v2572_v52  ;;  %v1640_v52 = vld [vmem:[%s7080_s5 + $0xca8] sm:$0xff] }
 0x230   :  { %v2544_v46 = vunpack.c.l.s8.bf16 %v1640_v52 }
 0x231   :  { %3275 = vmatpush1.bf16.msra.mxu0 %v2507_v2  ;;  %v2551_v2 = vunpack.c.l.s8.bf16 %v1643_v0 }
 0x232   :  { %3316 = vmatpush1.bf16.msra.mxu1 %v2571_v29  ;;  %3276 = vmatprep.subr.bf16.mxu0 %v2504_v38  ;;  %v2615_v29 = vunpack.c.l.s8.bf16 %v1675_v5  ;;  %v2548_v38 = vunpack.c.h.s8.bf16 %v1640_v52 }
 0x233   :  { %3317 = vmatprep.subr.bf16.mxu1 %v2568_v26  ;;  %v1639_v26 = vld [vmem:[%s7080_s5 + $0xca0] sm:$0xff] }
 0x235   :  { %3277 = vmatpush1.bf16.msra.mxu0 %v2503_v54  ;;  %v2547_v54 = vunpack.c.h.s8.bf16 %v1639_v26 }
 0x236   :  { %3318 = vmatpush1.bf16.msra.mxu1 %v2567_v33  ;;  %3278 = vmatprep.subr.bf16.mxu0 %v2564_v37  ;;  %v910_v33 = vrot.slane %v5810_v60, %v5034_v12  ;;  %v2611_v37 = vunpack.c.h.s8.bf16 %v1671_v27 }
 0x237   :  { %3319 = vmatprep.subr.bf16.mxu1 %v2628_v53  ;;  %v918_v53 = vrot.slane %v5810_v60, %v5036_v13  ;;  %v2607_v60 = vunpack.c.l.s8.bf16 %v1671_v27  ;;  %v1727_v27 = vld [vmem:[%s7080_s5 + $0xf60] sm:$0xff] }
 0x239   :  { %3279 = vmatpush2.bf16.msra.mxu0 %v2563_v23  ;;  %v1636_v23 = vld [vmem:[%s7080_s5 + $0xc88] sm:$0xff] }
 0x23a   :  { %3320 = vmatpush2.bf16.msra.mxu1 %v2627_v35  ;;  %3280 = vmatprep.subr.bf16.mxu0 %v2560_v9  ;;  %v1668_v35 = vld [vmem:[%s7080_s5 + $0xd88] sm:$0xff]  ;;  %v2543_v9 = vunpack.c.l.s8.bf16 %v1639_v26  ;;  %v2540_v63 = vunpack.c.h.s8.bf16 %v1636_v23 }
 0x23b   :  { %3321 = vmatprep.subr.bf16.mxu1 %v2624_v24  ;;  %v995_v24 = vmul.f32 %v910_v33, %v5264_v18  ;;  %v2604_v0 = vunpack.c.h.s8.bf16 %v1668_v35  ;;  %v1667_v18 = vld [vmem:[%s7080_s5 + $0xd80] sm:$0xff]  ;;  %v1234_v33 = vmax.f32 %v5310_v32, 0.0 }
 0x23d   :  { %3281 = vmatpush2.bf16.msra.mxu0 %v2559_v28  ;;  %v1635_v28 = vld [vmem:[%s7080_s5 + $0xc80] sm:$0xff]  ;;  %v1195_v5 = vadd.f32 %v1110_v17, %v995_v24  ;;  %v1724_v24 = vld [vmem:[%s7080_s5 + $0xf48] sm:$0xff]  ;;  %v5989_v17 = vpack.c.bf16 %v1234_v33, %v1234_v33 }
 0x23e   :  { %3322 = vmatpush2.bf16.msra.mxu1 %v2623_v51  ;;  %3282 = vmatprep.subr.bf16.mxu0 %v2556_v56  ;;  %v997_v51 = vmul.f32 %v918_v53, %v5262_v8  ;;  %v1118_v56 = vrot.slane %v5829_v61, %v5036_v13  ;;  %v1696_v8 = vld [vmem:[%s7080_s5 + $0xe68] sm:$0xff]  ;;  %v2535_v52 = vunpack.c.l.s8.bf16 %v1635_v28  ;;  %v2723_v53 = vunpack.c.h.s8.bf16 %v1727_v27  ;;  %v1687_v33 = vld [vmem:[%s7080_s5 + $0xe20] sm:$0xff] }
 0x23f   :  { %3323 = vmatprep.subr.bf16.mxu1 %v2620_v14  ;;  %v2539_v14 = vunpack.c.h.s8.bf16 %v1635_v28  ;;  %v1728_v61 = vld [vmem:[%s7080_s5 + $0xf68] sm:$0xff]  ;;  %v1227_v30 = vmax.f32 %v1195_v5, 0.0 }
 0x240   :  { %v2720_v32 = vunpack.c.l.s8.bf16 %v1728_v61 }
 0x241   :  { %3283 = vmatpush2.bf16.msra.mxu0 %v2555_v21  ;;  %v2603_v21 = vunpack.c.h.s8.bf16 %v1667_v18 }
 0x242   :  { %3324 = vmatpush2.bf16.msra.mxu1 %v2619_v34  ;;  %3284 = vmatprep.subr.bf16.mxu0 %v2552_v19  ;;  %v2536_v34 = vunpack.c.l.s8.bf16 %v1636_v23  ;;  %v1197_v19 = vadd.f32 %v1118_v56, %v997_v51  ;;  %v2656_v23 = vunpack.c.l.s8.bf16 %v1696_v8  ;;  %v2719_v56 = vunpack.c.l.s8.bf16 %v1727_v27 }
 0x243   :  { %3325 = vmatprep.subr.bf16.mxu1 %v2616_v36  ;;  %v2600_v36 = vunpack.c.l.s8.bf16 %v1668_v35  ;;  %v1692_v35 = vld [vmem:[%s7080_s5 + $0xe48] sm:$0xff] }
 0x244   :  { %v1229_v26 = vmax.f32 %v1197_v19, 0.0 }
 0x245   :  { %3285 = vmatpush2.bf16.msra.mxu0 %v2551_v2  ;;  %v2599_v2 = vunpack.c.l.s8.bf16 %v1667_v18  ;;  %v1691_v18 = vld [vmem:[%s7080_s5 + $0xe40] sm:$0xff] }
 0x246   :  { %3326 = vmatpush2.bf16.msra.mxu1 %v2615_v29  ;;  %3286 = vmatprep.subr.bf16.mxu0 %v2548_v38  ;;  %v2660_v29 = vunpack.c.h.s8.bf16 %v1696_v8  ;;  %v1695_v38 = vld [vmem:[%s7080_s5 + $0xe60] sm:$0xff] }
 0x247   :  { %3327 = vmatprep.subr.bf16.mxu1 %v2612_v40  ;;  %v2724_v40 = vunpack.c.h.s8.bf16 %v1728_v61  ;;  %v2655_v28 = vunpack.c.l.s8.bf16 %v1695_v38  ;;  %v2651_v61 = vunpack.c.h.s8.bf16 %v1691_v18 }
 0x249   :  { %3287 = vmatpush2.bf16.msra.mxu0 %v2547_v54  ;;  %v1232_v54 = vmax.f32 %v5312_v58, 0.0 }
 0x24a   :  { %3328 = vmatpush2.bf16.msra.mxu1 %v2611_v37  ;;  %3288 = vmatprep.subr.bf16.mxu0 %v2544_v46  ;;  %v2659_v37 = vunpack.c.h.s8.bf16 %v1695_v38  ;;  %v5976_v46 = vpack.c.bf16 %v1227_v30, %v1227_v30  ;;  %v1688_v38 = vld [vmem:[%s7080_s5 + $0xe28] sm:$0xff] }
 0x24b   :  { %3329 = vmatprep.subr.bf16.mxu1 %v2608_v44  ;;  %v5978_v44 = vpack.c.bf16 %v1229_v26, %v1229_v26  ;;  %v1720_v26 = vld [vmem:[%s7080_s5 + $0xf28] sm:$0xff] }
 0x24d   :  { %3289 = vmatpush2.bf16.msra.mxu0 %v2543_v9  ;;  %v5983_v9 = vpack.c.bf16 %v1232_v54, %v1232_v54  ;;  %v2644_v54 = vunpack.c.h.s8.bf16 %v1688_v38 }
 0x24e   :  { %3330 = vmatpush2.bf16.msra.mxu1 %v2607_v60  ;;  %3290 = vmatprep.subr.bf16.mxu0 %v2540_v63 }
 0x24f   :  { %3331 = vmatprep.subr.bf16.mxu1 %v2604_v0  ;;  %v2652_v0 = vunpack.c.h.s8.bf16 %v1692_v35 }
 0x251   :  { %3291 = vmatpush2.bf16.msra.mxu0 %v2539_v14 }
 0x252   :  { %3332 = vmatpush2.bf16.msra.mxu1 %v2603_v21  ;;  %3292 = vmatprep.subr.bf16.mxu0 %v2536_v34  ;;  %v2716_v21 = vunpack.c.h.s8.bf16 %v1724_v24  ;;  %v1723_v34 = vld [vmem:[%s7080_s5 + $0xf40] sm:$0xff] }
 0x253   :  { %3333 = vmatprep.subr.bf16.mxu1 %v2600_v36  ;;  %v2715_v30 = vunpack.c.h.s8.bf16 %v1723_v34  ;;  %v2711_v27 = vunpack.c.l.s8.bf16 %v1723_v34 }
 0x255   :  { %3293 = vmatpush2.bf16.msra.mxu0 %v2535_v52 }
 0x256   :  { %3334 = vmatpush2.bf16.msra.mxu1 %v2599_v2  ;;  %3344 = vmatprep.subr.bf16.mxu0 %v2660_v29  ;;  %v2648_v2 = vunpack.c.l.s8.bf16 %v1692_v35  ;;  %v2712_v29 = vunpack.c.l.s8.bf16 %v1724_v24  ;;  %v1684_v24 = vld [vmem:[%s7080_s5 + $0xe08] sm:$0xff] }
 0x257   :  { %3385 = vmatprep.subr.bf16.mxu1 %v2724_v40  ;;  %v2647_v40 = vunpack.c.l.s8.bf16 %v1691_v18  ;;  %v1715_v18 = vld [vmem:[%s7080_s5 + $0xf00] sm:$0xff] }
 0x258   :  { %v3050_v58 = vpop.f32.mrf.mxu0  ;;  %3295 = vmatmul.mubr.bf16.vlgmr.msra.gmra.mxu0 %v5976_v46 }
 0x259   :  { %v3051_v60 = vadd.f32 %v3050_v58, %v5871_v41  ;;  %v3091_v63 = vpop.f32.mrf.mxu1  ;;  %3336 = vmatmul.mubr.bf16.vlgmr.msra.gmra.mxu1 %v5978_v44  ;;  %3345 = vmatpush1.bf16.msra.mxu0 %v2659_v37  ;;  %v2708_v37 = vunpack.c.h.s8.bf16 %v1720_v26  ;;  %v2640_v58 = vunpack.c.l.s8.bf16 %v1688_v38 }
 0x25a   :  { %3376 = vmatprep.mubr.bf16.mxu0 %v5983_v9  ;;  %3386 = vmatpush1.bf16.msra.mxu1 %v2723_v53  ;;  %v3052_v51 = vpop.f32.mrf.mxu0  ;;  %v1719_v53 = vld [vmem:[%s7080_s5 + $0xf20] sm:$0xff] }
 0x25b   :  { %v5997_v14 = vadd.f32 %v3091_v63, %v3051_v60  ;;  %4584 = vmatprep.mubr.msk.bf16.mxu1 %vm143_vm0, %v5989_v17  ;;  %v3053_v41 = vadd.f32 %v3052_v51, %v5878_v50  ;;  %v3093_v5 = vpop.f32.mrf.mxu1  ;;  %3346 = vmatprep.subr.bf16.mxu0 %v2656_v23  ;;  %v2643_v23 = vunpack.c.h.s8.bf16 %v1687_v33  ;;  %v2707_v35 = vunpack.c.h.s8.bf16 %v1719_v53  ;;  %v1716_v60 = vld [vmem:[%s7080_s5 + $0xf08] sm:$0xff] }
 0x25c   :  { %v3054_v19 = vpop.f32.mrf.mxu0  ;;  %3387 = vmatprep.subr.bf16.mxu1 %v2720_v32  ;;  %v2704_v32 = vunpack.c.l.s8.bf16 %v1720_v26  ;;  %v2639_v63 = vunpack.c.l.s8.bf16 %v1687_v33  ;;  %v2636_v51 = vunpack.c.h.s8.bf16 %v1684_v24  ;;  %v2696_v34 = vunpack.c.l.s8.bf16 %v1716_v60  ;;  %v1250_v33 = vld [vmem:[%s7080_s5 + $0x78] sm:$0xff] }
 0x25d   :  { %v6005_v36 = vadd.f32 %v3093_v5, %v3053_v41  ;;  %v3095_v8 = vpop.f32.mrf.mxu1  ;;  %3347 = vmatpush1.bf16.msra.mxu0 %v2655_v28  ;;  %v2703_v28 = vunpack.c.l.s8.bf16 %v1719_v53  ;;  %v2699_v5 = vunpack.c.h.s8.bf16 %v1715_v18  ;;  %v1712_v19 = vld [vmem:[%s7080_s5 + $0xee8] sm:$0xff] }
 0x25e   :  { %3388 = vmatpush1.bf16.msra.mxu1 %v2719_v56  ;;  %v3055_v52 = vpop.f32.mrf.mxu0  ;;  %3348 = vmatprep.subr.bf16.mxu0 %v2652_v0  ;;  %v1683_v56 = vld [vmem:[%s7080_s5 + $0xe00] sm:$0xff]  ;;  %v2700_v0 = vunpack.c.h.s8.bf16 %v1716_v60  ;;  %v1732_v8 = vld [vmem:[%s7080_s5 + $0xf88] sm:$0xff] }
 0x25f   :  { %v3096_v50 = vpop.f32.mrf.mxu1  ;;  %3389 = vmatprep.subr.bf16.mxu1 %v2716_v21  ;;  %v2635_v41 = vunpack.c.h.s8.bf16 %v1683_v56  ;;  %v2632_v21 = vunpack.c.l.s8.bf16 %v1684_v24  ;;  %v2695_v52 = vunpack.c.l.s8.bf16 %v1715_v18  ;;  %v1249_v24 = vld [vmem:[%s7080_s5 + $0x70] sm:$0xff] }
 0x260   :  { %v2732_v50 = vunpack.c.h.s8.bf16 %v1732_v8 }
 0x261   :  { %3349 = vmatpush1.bf16.msra.mxu0 %v2651_v61  ;;  %v2631_v61 = vunpack.c.l.s8.bf16 %v1683_v56  ;;  %v1762_v56 = vunpack.c.l.s8.bf16 %v1250_v33 }
 0x262   :  { %3390 = vmatpush1.bf16.msra.mxu1 %v2715_v30  ;;  %3350 = vmatprep.subr.bf16.mxu0 %v2648_v2  ;;  %v2692_v30 = vunpack.c.h.s8.bf16 %v1712_v19  ;;  %v1711_v2 = vld [vmem:[%s7080_s5 + $0xee0] sm:$0xff] }
 0x263   :  { %3391 = vmatprep.subr.bf16.mxu1 %v2712_v29  ;;  %v1731_v29 = vld [vmem:[%s7080_s5 + $0xf80] sm:$0xff]  ;;  %v2691_v38 = vunpack.c.h.s8.bf16 %v1711_v2 }
 0x264   :  { %v2731_v26 = vunpack.c.h.s8.bf16 %v1731_v29  ;;  %v2727_v53 = vunpack.c.l.s8.bf16 %v1731_v29  ;;  %v1242_v29 = vld [vmem:[%s7080_s5 + $0x38] sm:$0xff] }
 0x265   :  { %3351 = vmatpush1.bf16.msra.mxu0 %v2647_v40  ;;  %v2688_v40 = vunpack.c.l.s8.bf16 %v1712_v19 }
 0x266   :  { %3392 = vmatpush1.bf16.msra.mxu1 %v2711_v27  ;;  %3352 = vmatprep.subr.bf16.mxu0 %v2644_v54  ;;  %v2728_v27 = vunpack.c.l.s8.bf16 %v1732_v8  ;;  %v1708_v54 = vld [vmem:[%s7080_s5 + $0xec8] sm:$0xff]  ;;  %v1245_v8 = vld [vmem:[%s7080_s5 + $0x50] sm:$0xff] }
 0x267   :  { %3393 = vmatprep.subr.bf16.mxu1 %v2708_v37  ;;  %v2687_v37 = vunpack.c.l.s8.bf16 %v1711_v2 }
 0x269   :  { %3353 = vmatpush1.bf16.msra.mxu0 %v2643_v23  ;;  %v2684_v23 = vunpack.c.h.s8.bf16 %v1708_v54 }
 0x26a   :  { %3394 = vmatpush1.bf16.msra.mxu1 %v2707_v35  ;;  %3354 = vmatprep.subr.bf16.mxu0 %v2640_v58  ;;  %v1707_v35 = vld [vmem:[%s7080_s5 + $0xec0] sm:$0xff]  ;;  %v1233_v58 = vmax.f32 %v5306_v10, 0.0  ;;  %v1704_v10 = vld [vmem:[%s7080_s5 + $0xea8] sm:$0xff] }
 0x26b   :  { %3395 = vmatprep.subr.bf16.mxu1 %v2704_v32  ;;  %v1766_v32 = vunpack.c.h.s8.bf16 %v1250_v33  ;;  %v2683_v60 = vunpack.c.h.s8.bf16 %v1707_v35  ;;  %v2679_v18 = vunpack.c.l.s8.bf16 %v1707_v35  ;;  %v1241_v33 = vld [vmem:[%s7080_s5 + $0x30] sm:$0xff]  ;;  %v1746_v35 = vunpack.c.l.s8.bf16 %v1242_v29 }
 0x26d   :  { %3355 = vmatpush1.bf16.msra.mxu0 %v2639_v63  ;;  %v1765_v63 = vunpack.c.h.s8.bf16 %v1249_v24 }
 0x26e   :  { %3396 = vmatpush1.bf16.msra.mxu1 %v2703_v28  ;;  %3356 = vmatprep.subr.bf16.mxu0 %v2636_v51  ;;  %v6056_v28 = vpack.c.bf16 %v1233_v58, %v1233_v58  ;;  %v2680_v51 = vunpack.c.l.s8.bf16 %v1708_v54  ;;  %v1750_v54 = vunpack.c.h.s8.bf16 %v1242_v29  ;;  %v1282_v58 = vld [vmem:[%s7080_s5 + $0x178] sm:$0xff] }
 0x26f   :  { %3397 = vmatprep.subr.bf16.mxu1 %v2700_v0  ;;  %v1246_v0 = vld [vmem:[%s7080_s5 + $0x58] sm:$0xff] }
 0x270   :  { %v1758_v19 = vunpack.c.h.s8.bf16 %v1246_v0  ;;  %v1754_v2 = vunpack.c.l.s8.bf16 %v1246_v0  ;;  %v1237_v0 = vld [vmem:[%s7080_s5 + $0x10] sm:$0xff] }
 0x271   :  { %3357 = vmatpush1.bf16.msra.mxu0 %v2635_v41  ;;  %v7108_v41 = vld [vmem:[#allocation4_spill] sm:$0xff]  ;;  %v1737_v29 = vunpack.c.l.s8.bf16 %v1237_v0 }
 0x272   :  { %3398 = vmatpush1.bf16.msra.mxu1 %v2699_v5  ;;  %3358 = vmatprep.subr.bf16.mxu0 %v2632_v21  ;;  %v1761_v5 = vunpack.c.l.s8.bf16 %v1249_v24  ;;  %v2676_v21 = vunpack.c.h.s8.bf16 %v1704_v10 }
 0x273   :  { %3399 = vmatprep.subr.bf16.mxu1 %v2696_v34  ;;  %v1703_v34 = vld [vmem:[%s7080_s5 + $0xea0] sm:$0xff] }
 0x275   :  { %3359 = vmatpush1.bf16.msra.mxu0 %v2631_v61  ;;  %v2675_v61 = vunpack.c.h.s8.bf16 %v1703_v34 }
 0x276   :  { %3400 = vmatpush1.bf16.msra.mxu1 %v2695_v52  ;;  %3360 = vmatprep.subr.bf16.mxu0 %v2692_v30  ;;  %v1757_v52 = vunpack.c.h.s8.bf16 %v1245_v8  ;;  %v2672_v30 = vunpack.c.l.s8.bf16 %v1704_v10 }
 0x277   :  { %3413 = vmatprep.subr.bf16.mxu1 %v2732_v50  ;;  %v1700_v50 = vld [vmem:[%s7080_s5 + $0xe88] sm:$0xff] }
 0x279   :  { %3361 = vmatpush2.bf16.msra.mxu0 %v2691_v38  ;;  %v2671_v38 = vunpack.c.l.s8.bf16 %v1703_v34  ;;  %v1278_v34 = vld [vmem:[%s7080_s5 + $0x158] sm:$0xff] }
 0x27a   :  { %3414 = vmatpush2.bf16.msra.mxu1 %v2731_v26  ;;  %3362 = vmatprep.subr.bf16.mxu0 %v2688_v40  ;;  %v1753_v26 = vunpack.c.l.s8.bf16 %v1245_v8  ;;  %v2668_v40 = vunpack.c.h.s8.bf16 %v1700_v50  ;;  %v1266_v8 = vld [vmem:[%s7080_s5 + $0xf8] sm:$0xff] }
 0x27b   :  { %3415 = vmatprep.subr.bf16.mxu1 %v2728_v27  ;;  %v1699_v27 = vld [vmem:[%s7080_s5 + $0xe80] sm:$0xff] }
 0x27c   :  { %v2663_v24 = vunpack.c.l.s8.bf16 %v1699_v27 }
 0x27d   :  { %3363 = vmatpush2.bf16.msra.mxu0 %v2687_v37  ;;  %v2667_v37 = vunpack.c.h.s8.bf16 %v1699_v27 }
 0x27e   :  { %3416 = vmatpush2.bf16.msra.mxu1 %v2727_v53  ;;  %3364 = vmatprep.subr.bf16.mxu0 %v2684_v23  ;;  %v1749_v53 = vunpack.c.h.s8.bf16 %v1241_v33  ;;  %v2664_v23 = vunpack.c.l.s8.bf16 %v1700_v50 }
 0x27f   :  { %3426 = vmatprep.subr.bf16.mxu1 %v1766_v32  ;;  %v1238_v32 = vld [vmem:[%s7080_s5 + $0x18] sm:$0xff] }
 0x280   :  { %v1742_v10 = vunpack.c.h.s8.bf16 %v1238_v32 }
 0x281   :  { %3418 = vmatmul.mubr.bf16.vlgmr.msra.gmra.mxu1 %v6056_v28  ;;  %3365 = vmatpush2.bf16.msra.mxu0 %v2683_v60  ;;  %v1231_v60 = vmax.f32 %v5308_v57, 0.0  ;;  %v1741_v57 = vunpack.c.h.s8.bf16 %v1237_v0 }
 0x282   :  { %3427 = vmatpush1.bf16.msra.mxu1 %v1765_v63  ;;  %3458 = vmatprep.mubr.bf16.mxu1 %v7108_v41  ;;  %v1745_v63 = vunpack.c.l.s8.bf16 %v1241_v33  ;;  %v1265_v33 = vld [vmem:[%s7080_s5 + $0xf0] sm:$0xff] }
 0x283   :  { %3366 = vmatprep.subr.bf16.mxu0 %v2680_v51  ;;  %3428 = vmatprep.subr.bf16.mxu1 %v1762_v56  ;;  %v1830_v51 = vunpack.c.h.s8.bf16 %v1282_v58  ;;  %v1281_v56 = vld [vmem:[%s7080_s5 + $0x170] sm:$0xff]  ;;  %v6097_v41 = vpack.c.bf16 %v1231_v60, %v1231_v60 }
 0x285   :  { %3367 = vmatpush2.bf16.msra.mxu0 %v2679_v18  ;;  %v1829_v18 = vunpack.c.h.s8.bf16 %v1281_v56 }
 0x286   :  { %3429 = vmatpush1.bf16.msra.mxu1 %v1761_v5  ;;  %3368 = vmatprep.subr.bf16.mxu0 %v2676_v21  ;;  %v1826_v5 = vunpack.c.l.s8.bf16 %v1282_v58  ;;  %v1738_v21 = vunpack.c.l.s8.bf16 %v1238_v32  ;;  %v1797_v32 = vunpack.c.h.s8.bf16 %v1265_v33 }
 0x287   :  { %3430 = vmatprep.subr.bf16.mxu1 %v1758_v19 }
 0x289   :  { %3369 = vmatpush2.bf16.msra.mxu0 %v2675_v61 }
 0x28a   :  { %3431 = vmatpush1.bf16.msra.mxu1 %v1757_v52  ;;  %3370 = vmatprep.subr.bf16.mxu0 %v2672_v30  ;;  %v7109_v30 = vld [vmem:[#allocation5_spill] sm:$0xff] }
 0x28b   :  { %3432 = vmatprep.subr.bf16.mxu1 %v1754_v2  ;;  %v1825_v2 = vunpack.c.l.s8.bf16 %v1281_v56 }
 0x28d   :  { %3371 = vmatpush2.bf16.msra.mxu0 %v2671_v38  ;;  %v1822_v38 = vunpack.c.h.s8.bf16 %v1278_v34 }
 0x28e   :  { %3433 = vmatpush1.bf16.msra.mxu1 %v1753_v26  ;;  %3372 = vmatprep.subr.bf16.mxu0 %v2668_v40  ;;  %v1277_v26 = vld [vmem:[%s7080_s5 + $0x150] sm:$0xff] }
 0x28f   :  { %3434 = vmatprep.subr.bf16.mxu1 %v1750_v54  ;;  %v1817_v56 = vunpack.c.l.s8.bf16 %v1277_v26 }
 0x291   :  { %3373 = vmatpush2.bf16.msra.mxu0 %v2667_v37 }
 0x292   :  { %3435 = vmatpush1.bf16.msra.mxu1 %v1749_v53  ;;  %3374 = vmatprep.subr.bf16.mxu0 %v2664_v23 }
 0x293   :  { %3436 = vmatprep.subr.bf16.mxu1 %v1746_v35  ;;  %v1821_v35 = vunpack.c.h.s8.bf16 %v1277_v26  ;;  %v1257_v26 = vld [vmem:[%s7080_s5 + $0xb0] sm:$0xff] }
 0x295   :  { %3375 = vmatpush2.bf16.msra.mxu0 %v2663_v24  ;;  %v1818_v24 = vunpack.c.l.s8.bf16 %v1278_v34 }
 0x296   :  { %3437 = vmatpush1.bf16.msra.mxu1 %v1745_v63  ;;  %3467 = vmatprep.subr.bf16.mxu0 %v1830_v51  ;;  %v1274_v63 = vld [vmem:[%s7080_s5 + $0x138] sm:$0xff] }
 0x297   :  { %3438 = vmatprep.subr.bf16.mxu1 %v1742_v10  ;;  %v1262_v51 = vld [vmem:[%s7080_s5 + $0xd8] sm:$0xff]  ;;  %v1793_v10 = vunpack.c.l.s8.bf16 %v1265_v33  ;;  %v1814_v0 = vunpack.c.h.s8.bf16 %v1274_v63 }
 0x298   :  { %v3132_v19 = vpop.f32.mrf.mxu0  ;;  %3377 = vmatmul.mubr.bf16.vlgmr.msra.gmra.mxu0 %v6097_v41 }
 0x299   :  { %v3133_v61 = vadd.f32 %v3132_v19, %v5997_v14  ;;  %v3173_v52 = vpop.f32.mrf.mxu1  ;;  %3468 = vmatpush1.bf16.msra.mxu0 %v1829_v18  ;;  %3499 = vmatprep.mubr.bf16.mxu0 %v7109_v30  ;;  %v1798_v14 = vunpack.c.h.s8.bf16 %v1266_v8  ;;  %v1273_v18 = vld [vmem:[%s7080_s5 + $0x130] sm:$0xff]  ;;  %v1810_v19 = vunpack.c.l.s8.bf16 %v1274_v63 }
 0x29a   :  { %3439 = vmatpush1.bf16.msra.mxu1 %v1741_v57  ;;  %v3134_v50 = vpop.f32.mrf.mxu0  ;;  %3469 = vmatprep.subr.bf16.mxu0 %v1826_v5  ;;  %v1790_v57 = vunpack.c.h.s8.bf16 %v1262_v51  ;;  %v1261_v5 = vld [vmem:[%s7080_s5 + $0xd0] sm:$0xff]  ;;  %v1809_v30 = vunpack.c.l.s8.bf16 %v1273_v18 }
 0x29b   :  { %v6111_v40 = vadd.f32 %v3173_v52, %v3133_v61  ;;  %v3135_v27 = vadd.f32 %v3134_v50, %v6005_v36  ;;  %v3175_v54 = vpop.f32.mrf.mxu1  ;;  %3440 = vmatprep.subr.bf16.mxu1 %v1738_v21  ;;  %v1794_v36 = vunpack.c.l.s8.bf16 %v1266_v8  ;;  %v1813_v21 = vunpack.c.h.s8.bf16 %v1273_v18  ;;  %v1270_v61 = vld [vmem:[%s7080_s5 + $0x118] sm:$0xff] }
 0x29c   :  { %v3136_v37 = vpop.f32.mrf.mxu0  ;;  %v1789_v34 = vunpack.c.h.s8.bf16 %v1261_v5  ;;  %v1786_v8 = vunpack.c.l.s8.bf16 %v1262_v51  ;;  %v1258_v52 = vld [vmem:[%s7080_s5 + $0xb8] sm:$0xff]  ;;  %v1806_v50 = vunpack.c.h.s8.bf16 %v1270_v61 }
 0x29d   :  { %v6117_v53 = vadd.f32 %v3175_v54, %v3135_v27  ;;  %v3177_v23 = vpop.f32.mrf.mxu1  ;;  %3470 = vmatpush1.bf16.msra.mxu0 %v1825_v2  ;;  %v1785_v2 = vunpack.c.l.s8.bf16 %v1261_v5  ;;  %v1781_v54 = vunpack.c.h.s8.bf16 %v1257_v26  ;;  %v1778_v33 = vunpack.c.l.s8.bf16 %v1258_v52  ;;  %v1298_v37 = vld [vmem:[%s7080_s5 + $0x1f8] sm:$0xff] }
 0x29e   :  { %3441 = vmatpush1.bf16.msra.mxu1 %v1737_v29  ;;  %v3137_v58 = vpop.f32.mrf.mxu0  ;;  %3471 = vmatprep.subr.bf16.mxu0 %v1822_v38  ;;  %v1269_v29 = vld [vmem:[%s7080_s5 + $0x110] sm:$0xff]  ;;  %v1782_v38 = vunpack.c.h.s8.bf16 %v1258_v52  ;;  %v1254_v23 = vld [vmem:[%s7080_s5 + $0x98] sm:$0xff] }
 0x29f   :  { %v3178_v60 = vpop.f32.mrf.mxu1  ;;  %3442 = vmatprep.subr.bf16.mxu1 %v1798_v14  ;;  %v1805_v27 = vunpack.c.h.s8.bf16 %v1269_v29  ;;  %v1802_v14 = vunpack.c.l.s8.bf16 %v1270_v61  ;;  %v1777_v58 = vunpack.c.l.s8.bf16 %v1257_v26  ;;  %v1314_v18 = vld [vmem:[%s7080_s5 + $0x278] sm:$0xff] }
 0x2a0   :  { %v1774_v60 = vunpack.c.h.s8.bf16 %v1254_v23 }
 0x2a1   :  { %3472 = vmatpush1.bf16.msra.mxu0 %v1821_v35  ;;  %v1801_v35 = vunpack.c.l.s8.bf16 %v1269_v29  ;;  %v1310_v29 = vld [vmem:[%s7080_s5 + $0x258] sm:$0xff] }
 0x2a2   :  { %3443 = vmatpush2.bf16.msra.mxu1 %v1797_v32  ;;  %3473 = vmatprep.subr.bf16.mxu0 %v1818_v24  ;;  %v1862_v32 = vunpack.c.h.s8.bf16 %v1298_v37  ;;  %v1297_v24 = vld [vmem:[%s7080_s5 + $0x1f0] sm:$0xff] }
 0x2a3   :  { %3444 = vmatprep.subr.bf16.mxu1 %v1794_v36  ;;  %v1253_v36 = vld [vmem:[%s7080_s5 + $0x90] sm:$0xff]  ;;  %v1861_v63 = vunpack.c.h.s8.bf16 %v1297_v24 }
 0x2a4   :  { %v1773_v51 = vunpack.c.h.s8.bf16 %v1253_v36  ;;  %v1769_v5 = vunpack.c.l.s8.bf16 %v1253_v36  ;;  %v1306_v36 = vld [vmem:[%s7080_s5 + $0x238] sm:$0xff] }
 0x2a5   :  { %3474 = vmatpush1.bf16.msra.mxu0 %v1817_v56  ;;  %v1858_v56 = vunpack.c.l.s8.bf16 %v1298_v37  ;;  %v1886_v37 = vunpack.c.h.s8.bf16 %v1310_v29 }
 0x2a6   :  { %3445 = vmatpush2.bf16.msra.mxu1 %v1793_v10  ;;  %3475 = vmatprep.subr.bf16.mxu0 %v1814_v0  ;;  %v1770_v10 = vunpack.c.l.s8.bf16 %v1254_v23  ;;  %v1294_v0 = vld [vmem:[%s7080_s5 + $0x1d8] sm:$0xff]  ;;  %v1309_v23 = vld [vmem:[%s7080_s5 + $0x250] sm:$0xff] }
 0x2a7   :  { %3446 = vmatprep.subr.bf16.mxu1 %v1790_v57  ;;  %v1857_v57 = vunpack.c.l.s8.bf16 %v1297_v24  ;;  %v1882_v24 = vunpack.c.l.s8.bf16 %v1310_v29  ;;  %v1301_v29 = vld [vmem:[%s7080_s5 + $0x210] sm:$0xff] }
 0x2a9   :  { %3476 = vmatpush1.bf16.msra.mxu0 %v1813_v21  ;;  %v1854_v21 = vunpack.c.h.s8.bf16 %v1294_v0 }
 0x2aa   :  { %3447 = vmatpush2.bf16.msra.mxu1 %v1789_v34  ;;  %3477 = vmatprep.subr.bf16.mxu0 %v1810_v19  ;;  %v1293_v34 = vld [vmem:[%s7080_s5 + $0x1d0] sm:$0xff]  ;;  %v1894_v19 = vunpack.c.h.s8.bf16 %v1314_v18 }
 0x2ab   :  { %3448 = vmatprep.subr.bf16.mxu1 %v1786_v8  ;;  %v1313_v8 = vld [vmem:[%s7080_s5 + $0x270] sm:$0xff]  ;;  %v1853_v61 = vunpack.c.h.s8.bf16 %v1293_v34  ;;  %v1849_v26 = vunpack.c.l.s8.bf16 %v1293_v34  ;;  %v1874_v34 = vunpack.c.l.s8.bf16 %v1306_v36 }
 0x2ac   :  { %v1893_v52 = vunpack.c.h.s8.bf16 %v1313_v8 }
 0x2ad   :  { %3478 = vmatpush1.bf16.msra.mxu0 %v1809_v30  ;;  %v1850_v30 = vunpack.c.l.s8.bf16 %v1294_v0  ;;  %v1878_v0 = vunpack.c.h.s8.bf16 %v1306_v36  ;;  %v1865_v36 = vunpack.c.l.s8.bf16 %v1301_v29 }
 0x2ae   :  { %3449 = vmatpush2.bf16.msra.mxu1 %v1785_v2  ;;  %3479 = vmatprep.subr.bf16.mxu0 %v1806_v50  ;;  %v1890_v2 = vunpack.c.l.s8.bf16 %v1314_v18  ;;  %v1290_v50 = vld [vmem:[%s7080_s5 + $0x1b8] sm:$0xff]  ;;  %v1305_v18 = vld [vmem:[%s7080_s5 + $0x230] sm:$0xff] }
 0x2af   :  { %3450 = vmatprep.subr.bf16.mxu1 %v1782_v38  ;;  %v7110_v38 = vld [vmem:[#allocation3_spill] sm:$0xff] }
 0x2b1   :  { %3480 = vmatpush1.bf16.msra.mxu0 %v1805_v27  ;;  %v7111_v27 = vld [vmem:[#allocation8_spill] sm:$0xff] }
 0x2b2   :  { %3451 = vmatpush2.bf16.msra.mxu1 %v1781_v54  ;;  %3481 = vmatprep.subr.bf16.mxu0 %v1802_v14  ;;  %v1889_v54 = vunpack.c.l.s8.bf16 %v1313_v8  ;;  %v1846_v14 = vunpack.c.h.s8.bf16 %v1290_v50  ;;  %v1302_v8 = vld [vmem:[%s7080_s5 + $0x218] sm:$0xff] }
 0x2b3   :  { %3452 = vmatprep.subr.bf16.mxu1 %v1778_v33  ;;  %v1289_v33 = vld [vmem:[%s7080_s5 + $0x1b0] sm:$0xff] }
 0x2b5   :  { %3482 = vmatpush1.bf16.msra.mxu0 %v1801_v35  ;;  %v1845_v35 = vunpack.c.h.s8.bf16 %v1289_v33 }
 0x2b6   :  { %3453 = vmatpush2.bf16.msra.mxu1 %v1777_v58  ;;  %3483 = vmatprep.subr.bf16.mxu0 %v1862_v32  ;;  %v1885_v58 = vunpack.c.h.s8.bf16 %v1309_v23  ;;  %v1842_v32 = vunpack.c.l.s8.bf16 %v1290_v50  ;;  %v1870_v50 = vunpack.c.h.s8.bf16 %v1302_v8 }
 0x2b7   :  { %3454 = vmatprep.subr.bf16.mxu1 %v1774_v60  ;;  %v1286_v60 = vld [vmem:[%s7080_s5 + $0x198] sm:$0xff] }
 0x2b9   :  { %3484 = vmatpush2.bf16.msra.mxu0 %v1861_v63  ;;  %v1841_v63 = vunpack.c.l.s8.bf16 %v1289_v33 }
 0x2ba   :  { %3455 = vmatpush2.bf16.msra.mxu1 %v1773_v51  ;;  %3485 = vmatprep.subr.bf16.mxu0 %v1858_v56  ;;  %v1881_v51 = vunpack.c.l.s8.bf16 %v1309_v23  ;;  %v1838_v56 = vunpack.c.h.s8.bf16 %v1286_v60  ;;  %v1330_v23 = vld [vmem:[%s7080_s5 + $0x2f8] sm:$0xff] }
 0x2bb   :  { %3456 = vmatprep.subr.bf16.mxu1 %v1770_v10  ;;  %v1285_v10 = vld [vmem:[%s7080_s5 + $0x190] sm:$0xff] }
 0x2bd   :  { %3486 = vmatpush2.bf16.msra.mxu0 %v1857_v57  ;;  %v1837_v57 = vunpack.c.h.s8.bf16 %v1285_v10 }
 0x2be   :  { %3457 = vmatpush2.bf16.msra.mxu1 %v1769_v5  ;;  %3487 = vmatprep.subr.bf16.mxu0 %v1854_v21  ;;  %v1877_v5 = vunpack.c.h.s8.bf16 %v1305_v18  ;;  %v1834_v21 = vunpack.c.l.s8.bf16 %v1286_v60 }
 0x2bf   :  { %3508 = vmatprep.subr.bf16.mxu1 %v1894_v19  ;;  %v1346_v19 = vld [vmem:[%s7080_s5 + $0x378] sm:$0xff] }
 0x2c1   :  { %3459 = vmatmul.mubr.bf16.vlgmr.msra.gmra.mxu1 %v7110_v38  ;;  %3488 = vmatpush2.bf16.msra.mxu0 %v1853_v61  ;;  %v1833_v61 = vunpack.c.l.s8.bf16 %v1285_v10 }
 0x2c2   :  { %3509 = vmatpush1.bf16.msra.mxu1 %v1893_v52  ;;  %3540 = vmatprep.mubr.bf16.mxu1 %v7111_v27  ;;  %v1873_v52 = vunpack.c.l.s8.bf16 %v1305_v18  ;;  %v1954_v27 = vunpack.c.l.s8.bf16 %v1346_v19  ;;  %v1329_v18 = vld [vmem:[%s7080_s5 + $0x2f0] sm:$0xff] }
 0x2c3   :  { %3489 = vmatprep.subr.bf16.mxu0 %v1850_v30  ;;  %3510 = vmatprep.subr.bf16.mxu1 %v1890_v2  ;;  %v1958_v30 = vunpack.c.h.s8.bf16 %v1346_v19  ;;  %v1345_v2 = vld [vmem:[%s7080_s5 + $0x370] sm:$0xff] }
 0x2c4   :  { %v1957_v38 = vunpack.c.h.s8.bf16 %v1345_v2 }
 0x2c5   :  { %3490 = vmatpush2.bf16.msra.mxu0 %v1849_v26  ;;  %v1869_v26 = vunpack.c.h.s8.bf16 %v1301_v29  ;;  %v1921_v29 = vunpack.c.l.s8.bf16 %v1329_v18 }
 0x2c6   :  { %3511 = vmatpush1.bf16.msra.mxu1 %v1889_v54  ;;  %3491 = vmatprep.subr.bf16.mxu0 %v1846_v14  ;;  %v1866_v54 = vunpack.c.l.s8.bf16 %v1302_v8  ;;  %v1342_v14 = vld [vmem:[%s7080_s5 + $0x358] sm:$0xff]  ;;  %v1925_v8 = vunpack.c.h.s8.bf16 %v1329_v18 }
 0x2c7   :  { %3512 = vmatprep.subr.bf16.mxu1 %v1886_v37  ;;  %v7112_v37 = vld [vmem:[#allocation6_spill] sm:$0xff] }
 0x2c9   :  { %3492 = vmatpush2.bf16.msra.mxu0 %v1845_v35 }
 0x2ca   :  { %3513 = vmatpush1.bf16.msra.mxu1 %v1885_v58  ;;  %3493 = vmatprep.subr.bf16.mxu0 %v1842_v32  ;;  %v7113_v32 = vld [vmem:[#allocation7_spill] sm:$0xff] }
 0x2cb   :  { %3514 = vmatprep.subr.bf16.mxu1 %v1882_v24  ;;  %v1953_v24 = vunpack.c.l.s8.bf16 %v1345_v2  ;;  %v1326_v2 = vld [vmem:[%s7080_s5 + $0x2d8] sm:$0xff] }
 0x2cd   :  { %3494 = vmatpush2.bf16.msra.mxu0 %v1841_v63  ;;  %v1950_v63 = vunpack.c.h.s8.bf16 %v1342_v14 }
 0x2ce   :  { %3515 = vmatpush1.bf16.msra.mxu1 %v1881_v51  ;;  %3495 = vmatprep.subr.bf16.mxu0 %v1838_v56  ;;  %v1341_v51 = vld [vmem:[%s7080_s5 + $0x350] sm:$0xff] }
 0x2cf   :  { %3516 = vmatprep.subr.bf16.mxu1 %v1878_v0 }
 0x2d1   :  { %3496 = vmatpush2.bf16.msra.mxu0 %v1837_v57 }
 0x2d2   :  { %3517 = vmatpush1.bf16.msra.mxu1 %v1877_v5  ;;  %3497 = vmatprep.subr.bf16.mxu0 %v1834_v21 }
 0x2d3   :  { %3518 = vmatprep.subr.bf16.mxu1 %v1874_v34  ;;  %v1949_v34 = vunpack.c.h.s8.bf16 %v1341_v51 }
 0x2d5   :  { %3498 = vmatpush2.bf16.msra.mxu0 %v1833_v61  ;;  %v1946_v61 = vunpack.c.l.s8.bf16 %v1342_v14 }
 0x2d6   :  { %3519 = vmatpush1.bf16.msra.mxu1 %v1873_v52  ;;  %3549 = vmatprep.subr.bf16.mxu0 %v1958_v30  ;;  %v1338_v30 = vld [vmem:[%s7080_s5 + $0x338] sm:$0xff] }
 0x2d7   :  { %3520 = vmatprep.subr.bf16.mxu1 %v1870_v50  ;;  %v1945_v50 = vunpack.c.l.s8.bf16 %v1341_v51  ;;  %v1321_v51 = vld [vmem:[%s7080_s5 + $0x2b0] sm:$0xff] }
 0x2d8   :  { %v3214_v33 = vpop.f32.mrf.mxu0  ;;  %3500 = vmatmul.mubr.bf16.vlgmr.msra.gmra.mxu0 %v7112_v37  ;;  %v1938_v37 = vunpack.c.l.s8.bf16 %v1338_v30 }
 0x2d9   :  { %v3215_v35 = vadd.f32 %v3214_v33, %v6111_v40  ;;  %v3255_v58 = vpop.f32.mrf.mxu1  ;;  %3550 = vmatpush1.bf16.msra.mxu0 %v1957_v38  ;;  %3581 = vmatprep.mubr.bf16.mxu0 %v7113_v32  ;;  %v1926_v40 = vunpack.c.h.s8.bf16 %v1330_v23  ;;  %v1942_v38 = vunpack.c.h.s8.bf16 %v1338_v30 }
 0x2da   :  { %3521 = vmatpush1.bf16.msra.mxu1 %v1869_v26  ;;  %v3216_v60 = vpop.f32.mrf.mxu0  ;;  %3551 = vmatprep.subr.bf16.mxu0 %v1954_v27  ;;  %v1337_v26 = vld [vmem:[%s7080_s5 + $0x330] sm:$0xff]  ;;  %v1918_v27 = vunpack.c.h.s8.bf16 %v1326_v2 }
 0x2db   :  { %v6217_v56 = vadd.f32 %v3255_v58, %v3215_v35  ;;  %v3217_v10 = vadd.f32 %v3216_v60, %v6117_v53  ;;  %v3257_v0 = vpop.f32.mrf.mxu1  ;;  %3522 = vmatprep.subr.bf16.mxu1 %v1866_v54  ;;  %v1922_v53 = vunpack.c.l.s8.bf16 %v1330_v23  ;;  %v1325_v54 = vld [vmem:[%s7080_s5 + $0x2d0] sm:$0xff]  ;;  %v1941_v14 = vunpack.c.h.s8.bf16 %v1337_v26  ;;  %v1334_v35 = vld [vmem:[%s7080_s5 + $0x318] sm:$0xff] }
 0x2dc   :  { %v3218_v57 = vpop.f32.mrf.mxu0  ;;  %v1917_v33 = vunpack.c.h.s8.bf16 %v1325_v54  ;;  %v1914_v23 = vunpack.c.l.s8.bf16 %v1326_v2  ;;  %v1322_v58 = vld [vmem:[%s7080_s5 + $0x2b8] sm:$0xff]  ;;  %v1937_v32 = vunpack.c.l.s8.bf16 %v1337_v26  ;;  %v1934_v60 = vunpack.c.h.s8.bf16 %v1334_v35 }
 0x2dd   :  { %v6223_v5 = vadd.f32 %v3257_v0, %v3217_v10  ;;  %v3259_v21 = vpop.f32.mrf.mxu1  ;;  %3552 = vmatpush1.bf16.msra.mxu0 %v1953_v24  ;;  %v1913_v24 = vunpack.c.l.s8.bf16 %v1325_v54  ;;  %v1909_v0 = vunpack.c.h.s8.bf16 %v1321_v51  ;;  %v1906_v18 = vunpack.c.l.s8.bf16 %v1322_v58  ;;  %v1362_v57 = vld [vmem:[%s7080_s5 + $0x3f8] sm:$0xff] }
 0x2de   :  { %3523 = vmatpush1.bf16.msra.mxu1 %v1865_v36  ;;  %v3219_v19 = vpop.f32.mrf.mxu0  ;;  %3553 = vmatprep.subr.bf16.mxu0 %v1950_v63  ;;  %v1333_v36 = vld [vmem:[%s7080_s5 + $0x310] sm:$0xff]  ;;  %v1910_v63 = vunpack.c.h.s8.bf16 %v1322_v58  ;;  %v1318_v21 = vld [vmem:[%s7080_s5 + $0x298] sm:$0xff] }
 0x2df   :  { %v3260_v52 = vpop.f32.mrf.mxu1  ;;  %3524 = vmatprep.subr.bf16.mxu1 %v1926_v40  ;;  %v1933_v10 = vunpack.c.h.s8.bf16 %v1333_v36  ;;  %v1930_v40 = vunpack.c.l.s8.bf16 %v1334_v35  ;;  %v1905_v19 = vunpack.c.l.s8.bf16 %v1321_v51  ;;  %v1378_v26 = vld [vmem:[%s7080_s5 + $0x478] sm:$0xff] }
 0x2e0   :  { %v1902_v52 = vunpack.c.h.s8.bf16 %v1318_v21 }
 0x2e1   :  { %3554 = vmatpush1.bf16.msra.mxu0 %v1949_v34  ;;  %v1929_v34 = vunpack.c.l.s8.bf16 %v1333_v36  ;;  %v1374_v36 = vld [vmem:[%s7080_s5 + $0x458] sm:$0xff] }
 0x2e2   :  { %3525 = vmatpush2.bf16.msra.mxu1 %v1925_v8  ;;  %3555 = vmatprep.subr.bf16.mxu0 %v1946_v61  ;;  %v1990_v8 = vunpack.c.h.s8.bf16 %v1362_v57  ;;  %v1361_v61 = vld [vmem:[%s7080_s5 + $0x3f0] sm:$0xff] }
 0x2e3   :  { %3526 = vmatprep.subr.bf16.mxu1 %v1922_v53  ;;  %v1317_v53 = vld [vmem:[%s7080_s5 + $0x290] sm:$0xff]  ;;  %v1989_v30 = vunpack.c.h.s8.bf16 %v1361_v61 }
 0x2e4   :  { %v1901_v2 = vunpack.c.h.s8.bf16 %v1317_v53  ;;  %v1897_v54 = vunpack.c.l.s8.bf16 %v1317_v53  ;;  %v1349_v53 = vld [vmem:[%s7080_s5 + $0x390] sm:$0xff] }
 0x2e5   :  { %3556 = vmatpush1.bf16.msra.mxu0 %v1945_v50  ;;  %v1986_v50 = vunpack.c.l.s8.bf16 %v1362_v57 }
 0x2e6   :  { %3527 = vmatpush2.bf16.msra.mxu1 %v1921_v29  ;;  %3557 = vmatprep.subr.bf16.mxu0 %v1942_v38  ;;  %v1898_v29 = vunpack.c.l.s8.bf16 %v1318_v21  ;;  %v1358_v38 = vld [vmem:[%s7080_s5 + $0x3d8] sm:$0xff] }
 0x2e7   :  { %3528 = vmatprep.subr.bf16.mxu1 %v1918_v27  ;;  %v1985_v27 = vunpack.c.l.s8.bf16 %v1361_v61 }
 0x2e9   :  { %3558 = vmatpush1.bf16.msra.mxu0 %v1941_v14  ;;  %v1982_v14 = vunpack.c.h.s8.bf16 %v1358_v38 }
 0x2ea   :  { %3529 = vmatpush2.bf16.msra.mxu1 %v1917_v33  ;;  %3559 = vmatprep.subr.bf16.mxu0 %v1938_v37  ;;  %v1357_v33 = vld [vmem:[%s7080_s5 + $0x3d0] sm:$0xff]  ;;  %v2022_v37 = vunpack.c.h.s8.bf16 %v1378_v26 }
 0x2eb   :  { %3530 = vmatprep.subr.bf16.mxu1 %v1914_v23  ;;  %v1377_v23 = vld [vmem:[%s7080_s5 + $0x470] sm:$0xff]  ;;  %v1981_v35 = vunpack.c.h.s8.bf16 %v1357_v33 }
 0x2ec   :  { %v2021_v58 = vunpack.c.h.s8.bf16 %v1377_v23  ;;  %v2017_v51 = vunpack.c.l.s8.bf16 %v1377_v23  ;;  %v1409_v23 = vld [vmem:[%s7080_s5 + $0x570] sm:$0xff] }
 0x2ed   :  { %3560 = vmatpush1.bf16.msra.mxu0 %v1937_v32  ;;  %v1978_v32 = vunpack.c.l.s8.bf16 %v1358_v38 }
 0x2ee   :  { %3531 = vmatpush2.bf16.msra.mxu1 %v1913_v24  ;;  %3561 = vmatprep.subr.bf16.mxu0 %v1934_v60  ;;  %v2018_v24 = vunpack.c.l.s8.bf16 %v1378_v26  ;;  %v1354_v60 = vld [vmem:[%s7080_s5 + $0x3b8] sm:$0xff] }
 0x2ef   :  { %3532 = vmatprep.subr.bf16.mxu1 %v1910_v63  ;;  %v1977_v63 = vunpack.c.l.s8.bf16 %v1357_v33  ;;  %v1970_v21 = vunpack.c.l.s8.bf16 %v1354_v60 }
 0x2f1   :  { %3562 = vmatpush1.bf16.msra.mxu0 %v1933_v10  ;;  %v1974_v10 = vunpack.c.h.s8.bf16 %v1354_v60 }
 0x2f2   :  { %3533 = vmatpush2.bf16.msra.mxu1 %v1909_v0  ;;  %3563 = vmatprep.subr.bf16.mxu0 %v1930_v40  ;;  %v1353_v0 = vld [vmem:[%s7080_s5 + $0x3b0] sm:$0xff]  ;;  %v2014_v40 = vunpack.c.h.s8.bf16 %v1374_v36 }
 0x2f3   :  { %3534 = vmatprep.subr.bf16.mxu1 %v1906_v18  ;;  %v1373_v18 = vld [vmem:[%s7080_s5 + $0x450] sm:$0xff] }
 0x2f4   :  { %v2013_v57 = vunpack.c.h.s8.bf16 %v1373_v18  ;;  %v2009_v61 = vunpack.c.l.s8.bf16 %v1373_v18  ;;  %v2081_v18 = vunpack.c.l.s8.bf16 %v1409_v23 }
 0x2f5   :  { %3564 = vmatpush1.bf16.msra.mxu0 %v1929_v34  ;;  %v1350_v34 = vld [vmem:[%s7080_s5 + $0x398] sm:$0xff] }
 0x2f6   :  { %3535 = vmatpush2.bf16.msra.mxu1 %v1905_v19  ;;  %3565 = vmatprep.subr.bf16.mxu0 %v1990_v8  ;;  %v1370_v19 = vld [vmem:[%s7080_s5 + $0x438] sm:$0xff]  ;;  %v1969_v8 = vunpack.c.l.s8.bf16 %v1353_v0  ;;  %v1962_v38 = vunpack.c.l.s8.bf16 %v1350_v34 }
 0x2f7   :  { %3536 = vmatprep.subr.bf16.mxu1 %v1902_v52  ;;  %v1966_v52 = vunpack.c.h.s8.bf16 %v1350_v34  ;;  %v2002_v26 = vunpack.c.l.s8.bf16 %v1370_v19 }
 0x2f9   :  { %3566 = vmatpush2.bf16.msra.mxu0 %v1989_v30  ;;  %v2006_v30 = vunpack.c.h.s8.bf16 %v1370_v19 }
 0x2fa   :  { %3537 = vmatpush2.bf16.msra.mxu1 %v1901_v2  ;;  %3567 = vmatprep.subr.bf16.mxu0 %v1986_v50  ;;  %v1369_v2 = vld [vmem:[%s7080_s5 + $0x430] sm:$0xff]  ;;  %v1965_v50 = vunpack.c.h.s8.bf16 %v1349_v53 }
 0x2fb   :  { %3538 = vmatprep.subr.bf16.mxu1 %v1898_v29  ;;  %v2005_v29 = vunpack.c.h.s8.bf16 %v1369_v2  ;;  %v2001_v33 = vunpack.c.l.s8.bf16 %v1369_v2 }
 0x2fd   :  { %3568 = vmatpush2.bf16.msra.mxu0 %v1985_v27  ;;  %v1410_v27 = vld [vmem:[%s7080_s5 + $0x578] sm:$0xff] }
 0x2fe   :  { %3539 = vmatpush2.bf16.msra.mxu1 %v1897_v54  ;;  %3569 = vmatprep.subr.bf16.mxu0 %v1982_v14  ;;  %v1366_v54 = vld [vmem:[%s7080_s5 + $0x418] sm:$0xff]  ;;  %v1961_v14 = vunpack.c.l.s8.bf16 %v1349_v53  ;;  %v2082_v60 = vunpack.c.l.s8.bf16 %v1410_v27 }
 0x2ff   :  { %3590 = vmatprep.subr.bf16.mxu1 %v2022_v37  ;;  %v2086_v37 = vunpack.c.h.s8.bf16 %v1410_v27 }
 0x301   :  { %3541 = vmatmul.mubr.bf16.vlgmr.msra.gmra.mxu1 %v5340_v45  ;;  %3570 = vmatpush2.bf16.msra.mxu0 %v1981_v35  ;;  %v1973_v45 = vunpack.c.h.s8.bf16 %v1353_v0  ;;  %v1998_v35 = vunpack.c.h.s8.bf16 %v1366_v54 }
 0x302   :  { %3591 = vmatpush1.bf16.msra.mxu1 %v2021_v58  ;;  %3622 = vmatprep.mubr.bf16.mxu1 %v5352_v25  ;;  %v2010_v25 = vunpack.c.l.s8.bf16 %v1374_v36  ;;  %v1365_v58 = vld [vmem:[%s7080_s5 + $0x410] sm:$0xff]  ;;  %v1994_v36 = vunpack.c.l.s8.bf16 %v1366_v54 }
 0x303   :  { %3571 = vmatprep.subr.bf16.mxu0 %v1978_v32  ;;  %3592 = vmatprep.subr.bf16.mxu1 %v2018_v24  ;;  %v2085_v32 = vunpack.c.h.s8.bf16 %v1409_v23  ;;  %v1997_v24 = vunpack.c.h.s8.bf16 %v1365_v58  ;;  %v1389_v23 = vld [vmem:[%s7080_s5 + $0x4d0] sm:$0xff] }
 0x305   :  { %3572 = vmatpush2.bf16.msra.mxu0 %v1977_v63  ;;  %v1406_v63 = vld [vmem:[%s7080_s5 + $0x558] sm:$0xff] }
 0x306   :  { %3593 = vmatpush1.bf16.msra.mxu1 %v2017_v51  ;;  %3573 = vmatprep.subr.bf16.mxu0 %v1974_v10  ;;  %v1394_v10 = vld [vmem:[%s7080_s5 + $0x4f8] sm:$0xff] }
 0x307   :  { %3594 = vmatprep.subr.bf16.mxu1 %v2014_v40 }
 0x309   :  { %3574 = vmatpush2.bf16.msra.mxu0 %v1973_v45 }
 0x30a   :  { %3595 = vmatpush1.bf16.msra.mxu1 %v2013_v57  ;;  %3575 = vmatprep.subr.bf16.mxu0 %v1970_v21  ;;  %v1993_v57 = vunpack.c.l.s8.bf16 %v1365_v58  ;;  %v2078_v21 = vunpack.c.h.s8.bf16 %v1406_v63  ;;  %v2045_v58 = vunpack.c.h.s8.bf16 %v1389_v23 }
 0x30b   :  { %3596 = vmatprep.subr.bf16.mxu1 %v2010_v25 }
 0x30d   :  { %3576 = vmatpush2.bf16.msra.mxu0 %v1969_v8 }
 0x30e   :  { %3597 = vmatpush1.bf16.msra.mxu1 %v2009_v61  ;;  %3577 = vmatprep.subr.bf16.mxu0 %v1966_v52 }
 0x30f   :  { %3598 = vmatprep.subr.bf16.mxu1 %v2006_v30 }
 0x311   :  { %3578 = vmatpush2.bf16.msra.mxu0 %v1965_v50  ;;  %v2074_v50 = vunpack.c.l.s8.bf16 %v1406_v63 }
 0x312   :  { %3599 = vmatpush1.bf16.msra.mxu1 %v2005_v29  ;;  %3579 = vmatprep.subr.bf16.mxu0 %v1962_v38  ;;  %v1402_v38 = vld [vmem:[%s7080_s5 + $0x538] sm:$0xff] }
 0x313   :  { %3600 = vmatprep.subr.bf16.mxu1 %v2002_v26  ;;  %v1390_v26 = vld [vmem:[%s7080_s5 + $0x4d8] sm:$0xff] }
 0x315   :  { %3580 = vmatpush2.bf16.msra.mxu0 %v1961_v14  ;;  %v2070_v14 = vunpack.c.h.s8.bf16 %v1402_v38 }
 0x316   :  { %3601 = vmatpush1.bf16.msra.mxu1 %v2001_v33  ;;  %3631 = vmatprep.subr.bf16.mxu0 %v2086_v37  ;;  %v1401_v33 = vld [vmem:[%s7080_s5 + $0x530] sm:$0xff]  ;;  %v2046_v37 = vunpack.c.h.s8.bf16 %v1390_v26 }
 0x317   :  { %3602 = vmatprep.subr.bf16.mxu1 %v1998_v35  ;;  %v2069_v35 = vunpack.c.h.s8.bf16 %v1401_v33  ;;  %v2065_v63 = vunpack.c.l.s8.bf16 %v1401_v33  ;;  %v1421_v33 = vld [vmem:[%s7080_s5 + $0x5d0] sm:$0xff] }
 0x318   :  { %v3296_v51 = vpop.f32.mrf.mxu0  ;;  %3582 = vmatmul.mubr.bf16.vlgmr.msra.gmra.mxu0 %v5342_v22  ;;  %v1405_v22 = vld [vmem:[%s7080_s5 + $0x550] sm:$0xff] }
 0x319   :  { %v3297_v0 = vadd.f32 %v3296_v51, %v6217_v56  ;;  %v3337_v40 = vpop.f32.mrf.mxu1  ;;  %3632 = vmatpush1.bf16.msra.mxu0 %v2085_v32  ;;  %3663 = vmatprep.mubr.bf16.mxu0 %v5350_v47  ;;  %v2054_v56 = vunpack.c.h.s8.bf16 %v1394_v10  ;;  %v1393_v47 = vld [vmem:[%s7080_s5 + $0x4f0] sm:$0xff]  ;;  %v2077_v53 = vunpack.c.h.s8.bf16 %v1405_v22  ;;  %v2073_v27 = vunpack.c.l.s8.bf16 %v1405_v22 }
 0x31a   :  { %3603 = vmatpush1.bf16.msra.mxu1 %v1997_v24  ;;  %v3298_v45 = vpop.f32.mrf.mxu0  ;;  %3633 = vmatprep.subr.bf16.mxu0 %v2082_v60  ;;  %v2053_v2 = vunpack.c.h.s8.bf16 %v1393_v47  ;;  %v2049_v54 = vunpack.c.l.s8.bf16 %v1393_v47  ;;  %v2066_v32 = vunpack.c.l.s8.bf16 %v1402_v38  ;;  %v2042_v24 = vunpack.c.l.s8.bf16 %v1390_v26  ;;  %v1398_v60 = vld [vmem:[%s7080_s5 + $0x518] sm:$0xff] }
 0x31b   :  { %v6323_v25 = vadd.f32 %v3337_v40, %v3297_v0  ;;  %v3299_v34 = vadd.f32 %v3298_v45, %v6223_v5  ;;  %v3339_v19 = vpop.f32.mrf.mxu1  ;;  %3604 = vmatprep.subr.bf16.mxu1 %v1994_v36  ;;  %v2050_v5 = vunpack.c.l.s8.bf16 %v1394_v10  ;;  %v1386_v36 = vld [vmem:[%s7080_s5 + $0x4b8] sm:$0xff]  ;;  %v2041_v51 = vunpack.c.l.s8.bf16 %v1389_v23  ;;  %v1397_v0 = vld [vmem:[%s7080_s5 + $0x510] sm:$0xff] }
 0x31c   :  { %v3300_v8 = vpop.f32.mrf.mxu0  ;;  %v2062_v10 = vunpack.c.h.s8.bf16 %v1398_v60  ;;  %v2038_v40 = vunpack.c.h.s8.bf16 %v1386_v36  ;;  %v2061_v45 = vunpack.c.h.s8.bf16 %v1397_v0  ;;  %v2034_v22 = vunpack.c.l.s8.bf16 %v1386_v36  ;;  %v1422_v38 = vld [vmem:[%s7080_s5 + $0x5d8] sm:$0xff]  ;;  %v1441_v23 = vld [vmem:[%s7080_s5 + $0x670] sm:$0xff] }
 0x31d   :  { %v6329_v61 = vadd.f32 %v3339_v19, %v3299_v34  ;;  %v3341_v52 = vpop.f32.mrf.mxu1  ;;  %3634 = vmatpush1.bf16.msra.mxu0 %v2081_v18  ;;  %v1385_v18 = vld [vmem:[%s7080_s5 + $0x4b0] sm:$0xff]  ;;  %v1426_v34 = vld [vmem:[%s7080_s5 + $0x5f8] sm:$0xff] }
 0x31e   :  { %3605 = vmatpush1.bf16.msra.mxu1 %v1993_v57  ;;  %v3301_v30 = vpop.f32.mrf.mxu0  ;;  %3635 = vmatprep.subr.bf16.mxu0 %v2078_v21  ;;  %v2037_v57 = vunpack.c.h.s8.bf16 %v1385_v18  ;;  %v2058_v21 = vunpack.c.l.s8.bf16 %v1398_v60  ;;  %v1382_v19 = vld [vmem:[%s7080_s5 + $0x498] sm:$0xff]  ;;  %v2033_v47 = vunpack.c.l.s8.bf16 %v1385_v18  ;;  %v2118_v8 = vunpack.c.h.s8.bf16 %v1426_v34  ;;  %v1425_v52 = vld [vmem:[%s7080_s5 + $0x5f0] sm:$0xff] }
 0x31f   :  { %v3342_v29 = vpop.f32.mrf.mxu1  ;;  %3606 = vmatprep.subr.bf16.mxu1 %v2054_v56  ;;  %v2057_v56 = vunpack.c.l.s8.bf16 %v1397_v0  ;;  %v1381_v30 = vld [vmem:[%s7080_s5 + $0x490] sm:$0xff]  ;;  %v1442_v26 = vld [vmem:[%s7080_s5 + $0x678] sm:$0xff] }
 0x320   :  { %v2114_v29 = vunpack.c.l.s8.bf16 %v1426_v34  ;;  %v1418_v60 = vld [vmem:[%s7080_s5 + $0x5b8] sm:$0xff] }
 0x321   :  { %3636 = vmatpush1.bf16.msra.mxu0 %v2077_v53  ;;  %v2030_v53 = vunpack.c.h.s8.bf16 %v1382_v19  ;;  %v1438_v36 = vld [vmem:[%s7080_s5 + $0x658] sm:$0xff]  ;;  %v2102_v0 = vunpack.c.h.s8.bf16 %v1418_v60 }
 0x322   :  { %3607 = vmatpush2.bf16.msra.mxu1 %v2053_v2  ;;  %3637 = vmatprep.subr.bf16.mxu0 %v2074_v50  ;;  %v2117_v2 = vunpack.c.h.s8.bf16 %v1425_v52  ;;  %v2029_v50 = vunpack.c.h.s8.bf16 %v1381_v30 }
 0x323   :  { %3608 = vmatprep.subr.bf16.mxu1 %v2050_v5  ;;  %v2026_v5 = vunpack.c.l.s8.bf16 %v1382_v19  ;;  %v2138_v19 = vunpack.c.l.s8.bf16 %v1438_v36 }
 0x325   :  { %3638 = vmatpush1.bf16.msra.mxu0 %v2073_v27  ;;  %v2113_v27 = vunpack.c.l.s8.bf16 %v1425_v52 }
 0x326   :  { %3609 = vmatpush2.bf16.msra.mxu1 %v2049_v54  ;;  %3639 = vmatprep.subr.bf16.mxu0 %v2070_v14  ;;  %v2025_v54 = vunpack.c.l.s8.bf16 %v1381_v30  ;;  %v2110_v14 = vunpack.c.h.s8.bf16 %v1422_v38  ;;  %v1413_v30 = vld [vmem:[%s7080_s5 + $0x590] sm:$0xff] }
 0x327   :  { %3610 = vmatprep.subr.bf16.mxu1 %v2046_v37  ;;  %v2150_v37 = vunpack.c.h.s8.bf16 %v1442_v26 }
 0x329   :  { %3640 = vmatpush1.bf16.msra.mxu0 %v2069_v35  ;;  %v2109_v35 = vunpack.c.h.s8.bf16 %v1421_v33 }
 0x32a   :  { %3611 = vmatpush2.bf16.msra.mxu1 %v2045_v58  ;;  %3641 = vmatprep.subr.bf16.mxu0 %v2066_v32  ;;  %v2149_v58 = vunpack.c.h.s8.bf16 %v1441_v23  ;;  %v2106_v32 = vunpack.c.l.s8.bf16 %v1422_v38 }
 0x32b   :  { %3612 = vmatprep.subr.bf16.mxu1 %v2042_v24  ;;  %v2146_v24 = vunpack.c.l.s8.bf16 %v1442_v26 }
 0x32d   :  { %3642 = vmatpush1.bf16.msra.mxu0 %v2065_v63 }
 0x32e   :  { %3613 = vmatpush2.bf16.msra.mxu1 %v2041_v51  ;;  %3643 = vmatprep.subr.bf16.mxu0 %v2062_v10  ;;  %v2105_v51 = vunpack.c.l.s8.bf16 %v1421_v33  ;;  %v2145_v10 = vunpack.c.l.s8.bf16 %v1441_v23  ;;  %v1473_v23 = vld [vmem:[%s7080_s5 + $0x770] sm:$0xff] }
 0x32f   :  { %3614 = vmatprep.subr.bf16.mxu1 %v2038_v40  ;;  %v1417_v40 = vld [vmem:[%s7080_s5 + $0x5b0] sm:$0xff] }
 0x331   :  { %3644 = vmatpush1.bf16.msra.mxu0 %v2061_v45  ;;  %v2142_v45 = vunpack.c.h.s8.bf16 %v1438_v36 }
 0x332   :  { %3615 = vmatpush2.bf16.msra.mxu1 %v2037_v57  ;;  %3645 = vmatprep.subr.bf16.mxu0 %v2058_v21  ;;  %v2101_v21 = vunpack.c.h.s8.bf16 %v1417_v40 }
 0x333   :  { %3616 = vmatprep.subr.bf16.mxu1 %v2034_v22  ;;  %v2098_v22 = vunpack.c.l.s8.bf16 %v1418_v60 }
 0x335   :  { %3646 = vmatpush1.bf16.msra.mxu0 %v2057_v56  ;;  %v1414_v56 = vld [vmem:[%s7080_s5 + $0x598] sm:$0xff] }
 0x336   :  { %3617 = vmatpush2.bf16.msra.mxu1 %v2033_v47  ;;  %3647 = vmatprep.subr.bf16.mxu0 %v2118_v8  ;;  %v1434_v47 = vld [vmem:[%s7080_s5 + $0x638] sm:$0xff]  ;;  %v2097_v8 = vunpack.c.l.s8.bf16 %v1417_v40  ;;  %v2090_v38 = vunpack.c.l.s8.bf16 %v1414_v56 }
 0x337   :  { %3618 = vmatprep.subr.bf16.mxu1 %v2030_v53  ;;  %v2094_v53 = vunpack.c.h.s8.bf16 %v1414_v56  ;;  %v2130_v26 = vunpack.c.l.s8.bf16 %v1434_v47 }
 0x339   :  { %3648 = vmatpush2.bf16.msra.mxu0 %v2117_v2  ;;  %v2134_v2 = vunpack.c.h.s8.bf16 %v1434_v47 }
 0x33a   :  { %3619 = vmatpush2.bf16.msra.mxu1 %v2029_v50  ;;  %3649 = vmatprep.subr.bf16.mxu0 %v2114_v29  ;;  %v1433_v50 = vld [vmem:[%s7080_s5 + $0x630] sm:$0xff]  ;;  %v2093_v29 = vunpack.c.h.s8.bf16 %v1413_v30 }
 0x33b   :  { %3620 = vmatprep.subr.bf16.mxu1 %v2026_v5  ;;  %v2133_v5 = vunpack.c.h.s8.bf16 %v1433_v50  ;;  %v2129_v33 = vunpack.c.l.s8.bf16 %v1433_v50  ;;  %v1465_v50 = vld [vmem:[%s7080_s5 + $0x730] sm:$0xff] }
 0x33d   :  { %3650 = vmatpush2.bf16.msra.mxu0 %v2113_v27  ;;  %v1474_v27 = vld [vmem:[%s7080_s5 + $0x778] sm:$0xff] }
 0x33e   :  { %3621 = vmatpush2.bf16.msra.mxu1 %v2025_v54  ;;  %3651 = vmatprep.subr.bf16.mxu0 %v2110_v14  ;;  %v1430_v54 = vld [vmem:[%s7080_s5 + $0x618] sm:$0xff]  ;;  %v2089_v14 = vunpack.c.l.s8.bf16 %v1413_v30  ;;  %v2210_v60 = vunpack.c.l.s8.bf16 %v1474_v27 }
 0x33f   :  { %3672 = vmatprep.subr.bf16.mxu1 %v2150_v37  ;;  %v2214_v37 = vunpack.c.h.s8.bf16 %v1474_v27  ;;  %v2122_v36 = vunpack.c.l.s8.bf16 %v1430_v54 }
 0x341   :  { %v6385_v63 = vpop.f32.mrf.mxu1  ;;  %3623 = vmatmul.mubr.bf16.vlgmr.msra.gmra.mxu1 %v5470_v42  ;;  %3652 = vmatpush2.bf16.msra.mxu0 %v2109_v35  ;;  %v1437_v42 = vld [vmem:[%s7080_s5 + $0x650] sm:$0xff]  ;;  %v2126_v35 = vunpack.c.h.s8.bf16 %v1430_v54 }
 0x342   :  { %3673 = vmatpush1.bf16.msra.mxu1 %v2149_v58  ;;  %3704 = vmatprep.mubr.bf16.mxu1 %v5472_v11  ;;  %v2141_v11 = vunpack.c.h.s8.bf16 %v1437_v42  ;;  %v2137_v52 = vunpack.c.l.s8.bf16 %v1437_v42  ;;  %v1429_v58 = vld [vmem:[%s7080_s5 + $0x610] sm:$0xff] }
 0x343   :  { %v6392_v18 = vpop.f32.mrf.mxu1  ;;  %3653 = vmatprep.subr.bf16.mxu0 %v2106_v32  ;;  %3674 = vmatprep.subr.bf16.mxu1 %v2146_v24  ;;  %v2213_v32 = vunpack.c.h.s8.bf16 %v1473_v23  ;;  %v2125_v24 = vunpack.c.h.s8.bf16 %v1429_v58 }
 0x345   :  { %v3423_v57 = vpop.f32.mrf.mxu1  ;;  %3654 = vmatpush2.bf16.msra.mxu0 %v2105_v51  ;;  %v1470_v51 = vld [vmem:[%s7080_s5 + $0x758] sm:$0xff] }
 0x346   :  { %3675 = vmatpush1.bf16.msra.mxu1 %v2145_v10  ;;  %3655 = vmatprep.subr.bf16.mxu0 %v2102_v0  ;;  %v1458_v0 = vld [vmem:[%s7080_s5 + $0x6f8] sm:$0xff]  ;;  %v2121_v57 = vunpack.c.l.s8.bf16 %v1429_v58  ;;  %v1461_v58 = vld [vmem:[%s7080_s5 + $0x710] sm:$0xff] }
 0x347   :  { %v3424_v34 = vpop.f32.mrf.mxu1  ;;  %3676 = vmatprep.subr.bf16.mxu1 %v2142_v45  ;;  %v2209_v45 = vunpack.c.l.s8.bf16 %v1473_v23 }
 0x349   :  { %3656 = vmatpush2.bf16.msra.mxu0 %v2101_v21  ;;  %v2206_v21 = vunpack.c.h.s8.bf16 %v1470_v51 }
 0x34a   :  { %3677 = vmatpush1.bf16.msra.mxu1 %v2141_v11  ;;  %3657 = vmatprep.subr.bf16.mxu0 %v2098_v22  ;;  %v1469_v11 = vld [vmem:[%s7080_s5 + $0x750] sm:$0xff] }
 0x34b   :  { %3678 = vmatprep.subr.bf16.mxu1 %v2138_v19  ;;  %v2205_v56 = vunpack.c.h.s8.bf16 %v1469_v11 }
 0x34d   :  { %3658 = vmatpush2.bf16.msra.mxu0 %v2097_v8 }
 0x34e   :  { %3679 = vmatpush1.bf16.msra.mxu1 %v2137_v52  ;;  %3659 = vmatprep.subr.bf16.mxu0 %v2094_v53  ;;  %v2178_v52 = vunpack.c.l.s8.bf16 %v1458_v0  ;;  %v1454_v53 = vld [vmem:[%s7080_s5 + $0x6d8] sm:$0xff] }
 0x34f   :  { %3680 = vmatprep.subr.bf16.mxu1 %v2134_v2  ;;  %v2170_v54 = vunpack.c.l.s8.bf16 %v1454_v53 }
 0x351   :  { %3660 = vmatpush2.bf16.msra.mxu0 %v2093_v29  ;;  %v2174_v29 = vunpack.c.h.s8.bf16 %v1454_v53  ;;  %v1485_v53 = vld [vmem:[%s7080_s5 + $0x7d0] sm:$0xff] }
 0x352   :  { %3681 = vmatpush1.bf16.msra.mxu1 %v2133_v5  ;;  %3661 = vmatprep.subr.bf16.mxu0 %v2090_v38  ;;  %v1453_v5 = vld [vmem:[%s7080_s5 + $0x6d0] sm:$0xff]  ;;  %v2197_v38 = vunpack.c.h.s8.bf16 %v1465_v50 }
 0x353   :  { %3682 = vmatprep.subr.bf16.mxu1 %v2130_v26  ;;  %v2173_v26 = vunpack.c.h.s8.bf16 %v1453_v5  ;;  %v2169_v23 = vunpack.c.l.s8.bf16 %v1453_v5 }
 0x355   :  { %3662 = vmatpush2.bf16.msra.mxu0 %v2089_v14  ;;  %v1462_v14 = vld [vmem:[%s7080_s5 + $0x718] sm:$0xff] }
 0x356   :  { %3683 = vmatpush1.bf16.msra.mxu1 %v2129_v33  ;;  %3713 = vmatprep.subr.bf16.mxu0 %v2214_v37  ;;  %v1450_v33 = vld [vmem:[%s7080_s5 + $0x6b8] sm:$0xff]  ;;  %v2193_v37 = vunpack.c.l.s8.bf16 %v1465_v50 }
 0x357   :  { %3684 = vmatprep.subr.bf16.mxu1 %v2126_v35  ;;  %v2190_v35 = vunpack.c.h.s8.bf16 %v1462_v14 }
 0x358   :  { %v3378_v10 = vpop.f32.mrf.mxu0  ;;  %3664 = vmatmul.mubr.bf16.vlgmr.msra.gmra.mxu0 %v5468_v6 }
 0x359   :  { %v3379_v40 = vadd.f32 %v3378_v10, %v6323_v25  ;;  %3714 = vmatpush1.bf16.msra.mxu0 %v2213_v32  ;;  %3745 = vmatprep.mubr.bf16.mxu0 %v5477_v7  ;;  %v2182_v25 = vunpack.c.h.s8.bf16 %v1458_v0  ;;  %v1457_v7 = vld [vmem:[%s7080_s5 + $0x6f0] sm:$0xff]  ;;  %v2166_v32 = vunpack.c.h.s8.bf16 %v1450_v33  ;;  %v2162_v10 = vunpack.c.l.s8.bf16 %v1450_v33  ;;  %v1490_v0 = vld [vmem:[%s7080_s5 + $0x7f8] sm:$0xff] }
 0x35a   :  { %3685 = vmatpush1.bf16.msra.mxu1 %v2125_v24  ;;  %v3380_v42 = vpop.f32.mrf.mxu0  ;;  %3715 = vmatprep.subr.bf16.mxu0 %v2210_v60  ;;  %v2181_v8 = vunpack.c.h.s8.bf16 %v1457_v7  ;;  %v2177_v30 = vunpack.c.l.s8.bf16 %v1457_v7  ;;  %v1449_v24 = vld [vmem:[%s7080_s5 + $0x6b0] sm:$0xff]  ;;  %v2189_v60 = vunpack.c.h.s8.bf16 %v1461_v58 }
 0x35b   :  { %v6434_v6 = vadd.f32 %v6385_v63, %v3379_v40  ;;  %v3381_v22 = vadd.f32 %v3380_v42, %v6329_v61  ;;  %3686 = vmatprep.subr.bf16.mxu1 %v2122_v36  ;;  %v2202_v63 = vunpack.c.l.s8.bf16 %v1470_v51  ;;  %v1466_v61 = vld [vmem:[%s7080_s5 + $0x738] sm:$0xff]  ;;  %v2165_v36 = vunpack.c.h.s8.bf16 %v1449_v24 }
 0x35c   :  { %v3382_v34 = vpop.f32.mrf.mxu0  ;;  %v2198_v2 = vunpack.c.h.s8.bf16 %v1466_v61  ;;  %v2194_v27 = vunpack.c.l.s8.bf16 %v1466_v61  ;;  %v2186_v51 = vunpack.c.l.s8.bf16 %v1462_v14  ;;  %v1446_v40 = vld [vmem:[%s7080_s5 + $0x698] sm:$0xff]  ;;  %v2161_v42 = vunpack.c.l.s8.bf16 %v1449_v24 }
 0x35d   :  { %v6441_v19 = vadd.f32 %v6392_v18, %v3381_v22  ;;  %3716 = vmatpush1.bf16.msra.mxu0 %v2209_v45  ;;  %v2201_v18 = vunpack.c.l.s8.bf16 %v1469_v11  ;;  %v2185_v45 = vunpack.c.l.s8.bf16 %v1461_v58  ;;  %v2158_v11 = vunpack.c.h.s8.bf16 %v1446_v40  ;;  %v1445_v22 = vld [vmem:[%s7080_s5 + $0x690] sm:$0xff] }
 0x35e   :  { %3687 = vmatpush1.bf16.msra.mxu1 %v2121_v57  ;;  %v3383_v47 = vpop.f32.mrf.mxu0  ;;  %3717 = vmatprep.subr.bf16.mxu0 %v2206_v21  ;;  %v2246_v57 = vunpack.c.h.s8.bf16 %v1490_v0  ;;  %v1489_v21 = vld [vmem:[%s7080_s5 + $0x7f0] sm:$0xff]  ;;  %v2157_v7 = vunpack.c.h.s8.bf16 %v1445_v22  ;;  %v2242_v34 = vunpack.c.l.s8.bf16 %v1490_v0 }
 0x35f   :  { %3688 = vmatprep.subr.bf16.mxu1 %v2182_v25  ;;  %v2245_v25 = vunpack.c.h.s8.bf16 %v1489_v21  ;;  %v1486_v47 = vld [vmem:[%s7080_s5 + $0x7d8] sm:$0xff] }
 0x360   :  { %v2238_v61 = vunpack.c.h.s8.bf16 %v1486_v47 }
 0x361   :  { %3718 = vmatpush1.bf16.msra.mxu0 %v2205_v56  ;;  %v2154_v56 = vunpack.c.l.s8.bf16 %v1446_v40 }
 0x362   :  { %3689 = vmatpush2.bf16.msra.mxu1 %v2181_v8  ;;  %3719 = vmatprep.subr.bf16.mxu0 %v2202_v63  ;;  %v1506_v8 = vld [vmem:[%s7080_s5 + $0x878] sm:$0xff]  ;;  %v2241_v63 = vunpack.c.l.s8.bf16 %v1489_v21  ;;  %v1497_v21 = vld [vmem:[%s7080_s5 + $0x830] sm:$0xff] }
 0x363   :  { %3690 = vmatprep.subr.bf16.mxu1 %v2178_v52  ;;  %v2153_v52 = vunpack.c.l.s8.bf16 %v1445_v22  ;;  %v2274_v5 = vunpack.c.l.s8.bf16 %v1506_v8  ;;  %v2261_v22 = vunpack.c.h.s8.bf16 %v1497_v21 }
 0x365   :  { %3720 = vmatpush1.bf16.msra.mxu0 %v2201_v18  ;;  %v2278_v18 = vunpack.c.h.s8.bf16 %v1506_v8  ;;  %v2257_v8 = vunpack.c.l.s8.bf16 %v1497_v21 }
 0x366   :  { %3691 = vmatpush2.bf16.msra.mxu1 %v2177_v30  ;;  %3721 = vmatprep.subr.bf16.mxu0 %v2198_v2  ;;  %v1505_v30 = vld [vmem:[%s7080_s5 + $0x870] sm:$0xff]  ;;  %v2237_v2 = vunpack.c.h.s8.bf16 %v1485_v53 }
 0x367   :  { %3692 = vmatprep.subr.bf16.mxu1 %v2174_v29  ;;  %v2277_v50 = vunpack.c.h.s8.bf16 %v1505_v30  ;;  %v2234_v29 = vunpack.c.l.s8.bf16 %v1486_v47  ;;  %v2273_v14 = vunpack.c.l.s8.bf16 %v1505_v30 }
 0x369   :  { %3722 = vmatpush1.bf16.msra.mxu0 %v2197_v38  ;;  %v1482_v38 = vld [vmem:[%s7080_s5 + $0x7b8] sm:$0xff] }
 0x36a   :  { %3693 = vmatpush2.bf16.msra.mxu1 %v2173_v26  ;;  %3723 = vmatprep.subr.bf16.mxu0 %v2194_v27  ;;  %v1502_v26 = vld [vmem:[%s7080_s5 + $0x858] sm:$0xff]  ;;  %v2230_v33 = vunpack.c.h.s8.bf16 %v1482_v38  ;;  %v2226_v24 = vunpack.c.l.s8.bf16 %v1482_v38 }
 0x36b   :  { %3694 = vmatprep.subr.bf16.mxu1 %v2170_v54  ;;  %v2233_v54 = vunpack.c.l.s8.bf16 %v1485_v53  ;;  %v1493_v53 = vld [vmem:[%s7080_s5 + $0x810] sm:$0xff]  ;;  %v1522_v38 = vld [vmem:[%s7080_s5 + $0x8f8] sm:$0xff] }
 0x36c   :  { %v2253_v30 = vunpack.c.h.s8.bf16 %v1493_v53 }
 0x36d   :  { %3724 = vmatpush1.bf16.msra.mxu0 %v2193_v37  ;;  %v1481_v37 = vld [vmem:[%s7080_s5 + $0x7b0] sm:$0xff] }
 0x36e   :  { %3695 = vmatpush2.bf16.msra.mxu1 %v2169_v23  ;;  %3725 = vmatprep.subr.bf16.mxu0 %v2190_v35  ;;  %v2270_v35 = vunpack.c.h.s8.bf16 %v1502_v26  ;;  %v2225_v0 = vunpack.c.l.s8.bf16 %v1481_v37 }
 0x36f   :  { %3696 = vmatprep.subr.bf16.mxu1 %v2166_v32  ;;  %v2229_v32 = vunpack.c.h.s8.bf16 %v1481_v37 }
 0x371   :  { %3726 = vmatpush1.bf16.msra.mxu0 %v2189_v60 }
 0x372   :  { %3697 = vmatpush2.bf16.msra.mxu1 %v2165_v36  ;;  %3727 = vmatprep.subr.bf16.mxu0 %v2186_v51  ;;  %v2266_v36 = vunpack.c.l.s8.bf16 %v1502_v26  ;;  %v1478_v51 = vld [vmem:[%s7080_s5 + $0x798] sm:$0xff] }
 0x373   :  { %3698 = vmatprep.subr.bf16.mxu1 %v2162_v10  ;;  %v1498_v10 = vld [vmem:[%s7080_s5 + $0x838] sm:$0xff] }
 0x375   :  { %3728 = vmatpush1.bf16.msra.mxu0 %v2185_v45  ;;  %v2222_v45 = vunpack.c.h.s8.bf16 %v1478_v51 }
 0x376   :  { %3699 = vmatpush2.bf16.msra.mxu1 %v2161_v42  ;;  %3729 = vmatprep.subr.bf16.mxu0 %v2246_v57  ;;  %v1477_v42 = vld [vmem:[%s7080_s5 + $0x790] sm:$0xff]  ;;  %v2262_v57 = vunpack.c.h.s8.bf16 %v1498_v10 }
 0x377   :  { %3700 = vmatprep.subr.bf16.mxu1 %v2158_v11  ;;  %v2221_v11 = vunpack.c.h.s8.bf16 %v1477_v42  ;;  %v2217_v47 = vunpack.c.l.s8.bf16 %v1477_v42  ;;  %v1517_v42 = vld [vmem:[%s7080_s5 + $0x8d0] sm:$0xff] }
 0x378   :  { %v2301_v21 = vunpack.c.h.s8.bf16 %v1517_v42 }
 0x379   :  { %3730 = vmatpush2.bf16.msra.mxu0 %v2245_v25  ;;  %v2218_v25 = vunpack.c.l.s8.bf16 %v1478_v51 }
 0x37a   :  { %3701 = vmatpush2.bf16.msra.mxu1 %v2157_v7  ;;  %3731 = vmatprep.subr.bf16.mxu0 %v2242_v34  ;;  %v2258_v7 = vunpack.c.l.s8.bf16 %v1498_v10  ;;  %v1538_v34 = vld [vmem:[%s7080_s5 + $0x978] sm:$0xff] }
 0x37b   :  { %3702 = vmatprep.subr.bf16.mxu1 %v2154_v56  ;;  %v1494_v56 = vld [vmem:[%s7080_s5 + $0x818] sm:$0xff] }
 0x37d   :  { %3732 = vmatpush2.bf16.msra.mxu0 %v2241_v63  ;;  %v2342_v63 = vunpack.c.h.s8.bf16 %v1538_v34 }
 0x37e   :  { %3703 = vmatpush2.bf16.msra.mxu1 %v2153_v52  ;;  %3733 = vmatprep.subr.bf16.mxu0 %v2238_v61  ;;  %v1537_v52 = vld [vmem:[%s7080_s5 + $0x970] sm:$0xff]  ;;  %v2254_v61 = vunpack.c.h.s8.bf16 %v1494_v56 }
 0x37f   :  { %3754 = vmatprep.subr.bf16.mxu1 %v2278_v18  ;;  %v2341_v18 = vunpack.c.h.s8.bf16 %v1537_v52 }
 0x381   :  { %v6497_v27 = vpop.f32.mrf.mxu1  ;;  %3705 = vmatmul.mubr.bf16.vlgmr.msra.gmra.mxu1 %v5588_v59  ;;  %3734 = vmatpush2.bf16.msra.mxu0 %v2237_v2  ;;  %v1501_v59 = vld [vmem:[%s7080_s5 + $0x850] sm:$0xff]  ;;  %v2338_v2 = vunpack.c.l.s8.bf16 %v1538_v34 }
 0x382   :  { %3755 = vmatpush1.bf16.msra.mxu1 %v2277_v50  ;;  %3786 = vmatprep.mubr.bf16.mxu1 %v5595_v3  ;;  %v2269_v3 = vunpack.c.h.s8.bf16 %v1501_v59  ;;  %v2265_v40 = vunpack.c.l.s8.bf16 %v1501_v59  ;;  %v2250_v50 = vunpack.c.l.s8.bf16 %v1494_v56  ;;  %v2310_v59 = vunpack.c.h.s8.bf16 %v1522_v38 }
 0x383   :  { %v6504_v23 = vpop.f32.mrf.mxu1  ;;  %3735 = vmatprep.subr.bf16.mxu0 %v2234_v29  ;;  %3756 = vmatprep.subr.bf16.mxu1 %v2274_v5  ;;  %v1534_v29 = vld [vmem:[%s7080_s5 + $0x958] sm:$0xff]  ;;  %v2297_v56 = vunpack.c.l.s8.bf16 %v1517_v42 }
 0x384   :  { %v2334_v37 = vunpack.c.h.s8.bf16 %v1534_v29  ;;  %v1566_v42 = vld [vmem:[%s7080_s5 + $0xa58] sm:$0xff] }
 0x385   :  { %v3464_v58 = vpop.f32.mrf.mxu1  ;;  %3736 = vmatpush2.bf16.msra.mxu0 %v2233_v54  ;;  %v2337_v54 = vunpack.c.l.s8.bf16 %v1537_v52  ;;  %v1513_v52 = vld [vmem:[%s7080_s5 + $0x8b0] sm:$0xff] }
 0x386   :  { %3757 = vmatpush1.bf16.msra.mxu1 %v2273_v14  ;;  %3737 = vmatprep.subr.bf16.mxu0 %v2230_v33  ;;  %v2249_v33 = vunpack.c.l.s8.bf16 %v1493_v53  ;;  %v2293_v53 = vunpack.c.h.s8.bf16 %v1513_v52 }
 0x387   :  { %v3465_v60 = vpop.f32.mrf.mxu1  ;;  %3758 = vmatprep.subr.bf16.mxu1 %v2270_v35 }
 0x388   :  { %v2306_v60 = vunpack.c.l.s8.bf16 %v1522_v38 }
 0x389   :  { %3738 = vmatpush2.bf16.msra.mxu0 %v2229_v32 }
 0x38a   :  { %3759 = vmatpush1.bf16.msra.mxu1 %v2269_v3  ;;  %3739 = vmatprep.subr.bf16.mxu0 %v2226_v24  ;;  %v2330_v24 = vunpack.c.l.s8.bf16 %v1534_v29 }
 0x38b   :  { %3760 = vmatprep.subr.bf16.mxu1 %v2266_v36  ;;  %v1518_v36 = vld [vmem:[%s7080_s5 + $0x8d8] sm:$0xff] }
 0x38d   :  { %3740 = vmatpush2.bf16.msra.mxu0 %v2225_v0 }
 0x38e   :  { %3761 = vmatpush1.bf16.msra.mxu1 %v2265_v40  ;;  %3741 = vmatprep.subr.bf16.mxu0 %v2222_v45  ;;  %v1529_v40 = vld [vmem:[%s7080_s5 + $0x930] sm:$0xff]  ;;  %v2302_v45 = vunpack.c.h.s8.bf16 %v1518_v36 }
 0x38f   :  { %3762 = vmatprep.subr.bf16.mxu1 %v2262_v57  ;;  %v2325_v57 = vunpack.c.h.s8.bf16 %v1529_v40  ;;  %v2321_v34 = vunpack.c.l.s8.bf16 %v1529_v40 }
 0x391   :  { %3742 = vmatpush2.bf16.msra.mxu0 %v2221_v11 }
 0x392   :  { %3763 = vmatpush1.bf16.msra.mxu1 %v2261_v22  ;;  %3743 = vmatprep.subr.bf16.mxu0 %v2218_v25  ;;  %v2298_v22 = vunpack.c.l.s8.bf16 %v1518_v36  ;;  %v1526_v25 = vld [vmem:[%s7080_s5 + $0x918] sm:$0xff]  ;;  %v1569_v36 = vld [vmem:[%s7080_s5 + $0xa70] sm:$0xff] }
 0x393   :  { %3764 = vmatprep.subr.bf16.mxu1 %v2258_v7  ;;  %v1514_v7 = vld [vmem:[%s7080_s5 + $0x8b8] sm:$0xff] }
 0x395   :  { %3744 = vmatpush2.bf16.msra.mxu0 %v2217_v47  ;;  %v2318_v47 = vunpack.c.h.s8.bf16 %v1526_v25 }
 0x396   :  { %3765 = vmatpush1.bf16.msra.mxu1 %v2257_v8  ;;  %3795 = vmatprep.subr.bf16.mxu0 %v2342_v63  ;;  %v1525_v8 = vld [vmem:[%s7080_s5 + $0x910] sm:$0xff]  ;;  %v2294_v63 = vunpack.c.h.s8.bf16 %v1514_v7 }
 0x397   :  { %3766 = vmatprep.subr.bf16.mxu1 %v2254_v61  ;;  %v2317_v61 = vunpack.c.h.s8.bf16 %v1525_v8  ;;  %v2313_v29 = vunpack.c.l.s8.bf16 %v1525_v8 }
 0x398   :  { %v3501_v5 = vpop.f32.mrf.mxu0  ;;  %3746 = vmatmul.mubr.bf16.vlgmr.msra.gmra.mxu0 %v5590_v39  ;;  %v1533_v39 = vld [vmem:[%s7080_s5 + $0x950] sm:$0xff] }
 0x399   :  { %v6541_v26 = vadd.f32 %v3501_v5, %v6497_v27  ;;  %3796 = vmatpush1.bf16.msra.mxu0 %v2341_v18  ;;  %3827 = vmatprep.mubr.bf16.mxu0 %v5601_v48  ;;  %v1521_v27 = vld [vmem:[%s7080_s5 + $0x8f0] sm:$0xff]  ;;  %v2333_v58 = vunpack.c.h.s8.bf16 %v1533_v39  ;;  %v2329_v51 = vunpack.c.l.s8.bf16 %v1533_v39  ;;  %v2314_v18 = vunpack.c.l.s8.bf16 %v1526_v25 }
 0x39a   :  { %3767 = vmatpush1.bf16.msra.mxu1 %v2253_v30  ;;  %v3503_v14 = vpop.f32.mrf.mxu0  ;;  %3797 = vmatprep.subr.bf16.mxu0 %v2338_v2  ;;  %v2309_v3 = vunpack.c.h.s8.bf16 %v1521_v27  ;;  %v2305_v10 = vunpack.c.l.s8.bf16 %v1521_v27  ;;  %v2290_v30 = vunpack.c.l.s8.bf16 %v1514_v7  ;;  %v1554_v2 = vld [vmem:[%s7080_s5 + $0x9f8] sm:$0xff]  ;;  %v2289_v5 = vunpack.c.l.s8.bf16 %v1513_v52  ;;  %v1545_v7 = vld [vmem:[%s7080_s5 + $0x9b0] sm:$0xff] }
 0x39b   :  { %v6548_v35 = vadd.f32 %v3503_v14, %v6504_v23  ;;  %3768 = vmatprep.subr.bf16.mxu1 %v2250_v50  ;;  %v1530_v23 = vld [vmem:[%s7080_s5 + $0x938] sm:$0xff]  ;;  %v2374_v38 = vunpack.c.h.s8.bf16 %v1554_v2 }
 0x39c   :  { %v3505_v48 = vpop.f32.mrf.mxu0  ;;  %v2326_v0 = vunpack.c.h.s8.bf16 %v1530_v23  ;;  %v2322_v11 = vunpack.c.l.s8.bf16 %v1530_v23  ;;  %v1510_v50 = vld [vmem:[%s7080_s5 + $0x898] sm:$0xff] }
 0x39d   :  { %3798 = vmatpush1.bf16.msra.mxu0 %v2337_v54  ;;  %v1553_v54 = vld [vmem:[%s7080_s5 + $0x9f0] sm:$0xff]  ;;  %v2286_v14 = vunpack.c.h.s8.bf16 %v1510_v50  ;;  %v2282_v27 = vunpack.c.l.s8.bf16 %v1510_v50  ;;  %v1550_v48 = vld [vmem:[%s7080_s5 + $0x9d8] sm:$0xff] }
 0x39e   :  { %3769 = vmatpush1.bf16.msra.mxu1 %v2249_v33  ;;  %v3506_v32 = vpop.f32.mrf.mxu0  ;;  %3799 = vmatprep.subr.bf16.mxu0 %v2334_v37  ;;  %v1509_v33 = vld [vmem:[%s7080_s5 + $0x890] sm:$0xff]  ;;  %v2373_v37 = vunpack.c.h.s8.bf16 %v1553_v54 }
 0x39f   :  { %3770 = vmatprep.subr.bf16.mxu1 %v2310_v59  ;;  %v2285_v39 = vunpack.c.h.s8.bf16 %v1509_v33  ;;  %v2370_v59 = vunpack.c.l.s8.bf16 %v1554_v2  ;;  %v2369_v32 = vunpack.c.l.s8.bf16 %v1553_v54  ;;  %v1541_v50 = vld [vmem:[%s7080_s5 + $0x990] sm:$0xff] }
 0x3a1   :  { %3800 = vmatpush1.bf16.msra.mxu0 %v2333_v58  ;;  %v1570_v58 = vld [vmem:[%s7080_s5 + $0xa78] sm:$0xff] }
 0x3a2   :  { %3771 = vmatpush2.bf16.msra.mxu1 %v2309_v3  ;;  %3801 = vmatprep.subr.bf16.mxu0 %v2330_v24  ;;  %v2281_v3 = vunpack.c.l.s8.bf16 %v1509_v33  ;;  %v2366_v24 = vunpack.c.h.s8.bf16 %v1550_v48  ;;  %v2406_v23 = vunpack.c.h.s8.bf16 %v1570_v58  ;;  %v2402_v40 = vunpack.c.l.s8.bf16 %v1570_v58  ;;  %v1601_v58 = vld [vmem:[%s7080_s5 + $0xb70] sm:$0xff] }
 0x3a3   :  { %3772 = vmatprep.subr.bf16.mxu1 %v2306_v60  ;;  %v1549_v60 = vld [vmem:[%s7080_s5 + $0x9d0] sm:$0xff] }
 0x3a5   :  { %3802 = vmatpush1.bf16.msra.mxu0 %v2329_v51  ;;  %v2365_v51 = vunpack.c.h.s8.bf16 %v1549_v60 }
 0x3a6   :  { %3773 = vmatpush2.bf16.msra.mxu1 %v2305_v10  ;;  %3803 = vmatprep.subr.bf16.mxu0 %v2326_v0  ;;  %v2405_v10 = vunpack.c.h.s8.bf16 %v1569_v36  ;;  %v2362_v0 = vunpack.c.l.s8.bf16 %v1550_v48 }
 0x3a7   :  { %3774 = vmatprep.subr.bf16.mxu1 %v2302_v45  ;;  %v1546_v45 = vld [vmem:[%s7080_s5 + $0x9b8] sm:$0xff] }
 0x3a8   :  { %v2358_v25 = vunpack.c.h.s8.bf16 %v1546_v45 }
 0x3a9   :  { %3804 = vmatpush1.bf16.msra.mxu0 %v2325_v57 }
 0x3aa   :  { %3775 = vmatpush2.bf16.msra.mxu1 %v2301_v21  ;;  %3805 = vmatprep.subr.bf16.mxu0 %v2322_v11  ;;  %v2361_v21 = vunpack.c.l.s8.bf16 %v1549_v60 }
 0x3ab   :  { %3776 = vmatprep.subr.bf16.mxu1 %v2298_v22  ;;  %v2401_v22 = vunpack.c.l.s8.bf16 %v1569_v36 }
 0x3ad   :  { %3806 = vmatpush1.bf16.msra.mxu0 %v2321_v34 }
 0x3ae   :  { %3777 = vmatpush2.bf16.msra.mxu1 %v2297_v56  ;;  %3807 = vmatprep.subr.bf16.mxu0 %v2318_v47  ;;  %v2398_v56 = vunpack.c.h.s8.bf16 %v1566_v42 }
 0x3af   :  { %3778 = vmatprep.subr.bf16.mxu1 %v2294_v63  ;;  %v2354_v63 = vunpack.c.l.s8.bf16 %v1546_v45  ;;  %v2465_v45 = vunpack.c.l.s8.bf16 %v1601_v58 }
 0x3b1   :  { %3808 = vmatpush1.bf16.msra.mxu0 %v2317_v61  ;;  %v2394_v61 = vunpack.c.l.s8.bf16 %v1566_v42 }
 0x3b2   :  { %3779 = vmatpush2.bf16.msra.mxu1 %v2293_v53  ;;  %3809 = vmatprep.subr.bf16.mxu0 %v2314_v18  ;;  %v1542_v53 = vld [vmem:[%s7080_s5 + $0x998] sm:$0xff] }
 0x3b3   :  { %3780 = vmatprep.subr.bf16.mxu1 %v2290_v30  ;;  %v1562_v18 = vld [vmem:[%s7080_s5 + $0xa38] sm:$0xff]  ;;  %v2350_v2 = vunpack.c.h.s8.bf16 %v1542_v53 }
 0x3b4   :  { %v2386_v33 = vunpack.c.l.s8.bf16 %v1562_v18 }
 0x3b5   :  { %3810 = vmatpush1.bf16.msra.mxu0 %v2313_v29  ;;  %v2390_v29 = vunpack.c.h.s8.bf16 %v1562_v18  ;;  %v1581_v18 = vld [vmem:[%s7080_s5 + $0xad0] sm:$0xff] }
 0x3b6   :  { %3781 = vmatpush2.bf16.msra.mxu1 %v2289_v5  ;;  %3811 = vmatprep.subr.bf16.mxu0 %v2374_v38  ;;  %v1561_v5 = vld [vmem:[%s7080_s5 + $0xa30] sm:$0xff]  ;;  %v2349_v38 = vunpack.c.h.s8.bf16 %v1541_v50 }
 0x3b7   :  { %3782 = vmatprep.subr.bf16.mxu1 %v2286_v14  ;;  %v2389_v54 = vunpack.c.h.s8.bf16 %v1561_v5  ;;  %v2346_v14 = vunpack.c.l.s8.bf16 %v1542_v53 }
 0x3b9   :  { %3812 = vmatpush2.bf16.msra.mxu0 %v2373_v37  ;;  %v1602_v37 = vld [vmem:[%s7080_s5 + $0xb78] sm:$0xff] }
 0x3ba   :  { %3783 = vmatpush2.bf16.msra.mxu1 %v2285_v39  ;;  %3813 = vmatprep.subr.bf16.mxu0 %v2370_v59  ;;  %v1558_v39 = vld [vmem:[%s7080_s5 + $0xa18] sm:$0xff]  ;;  %v2345_v59 = vunpack.c.l.s8.bf16 %v1541_v50  ;;  %v2470_v48 = vunpack.c.h.s8.bf16 %v1602_v37 }
 0x3bb   :  { %3784 = vmatprep.subr.bf16.mxu1 %v2282_v27  ;;  %v2385_v27 = vunpack.c.l.s8.bf16 %v1561_v5  ;;  %v2378_v36 = vunpack.c.l.s8.bf16 %v1558_v39  ;;  %v1578_v5 = vld [vmem:[%s7080_s5 + $0xab8] sm:$0xff] }
 0x3bd   :  { %3814 = vmatpush2.bf16.msra.mxu0 %v2369_v32  ;;  %v2382_v32 = vunpack.c.h.s8.bf16 %v1558_v39  ;;  %v1577_v39 = vld [vmem:[%s7080_s5 + $0xab0] sm:$0xff] }
 0x3be   :  { %3785 = vmatpush2.bf16.msra.mxu1 %v2281_v3  ;;  %3815 = vmatprep.subr.bf16.mxu0 %v2366_v24  ;;  %v1557_v3 = vld [vmem:[%s7080_s5 + $0xa10] sm:$0xff]  ;;  %v2469_v24 = vunpack.c.h.s8.bf16 %v1601_v58  ;;  %v2418_v58 = vunpack.c.l.s8.bf16 %v1578_v5 }
 0x3bf   :  { %3836 = vmatprep.subr.bf16.mxu1 %v2406_v23  ;;  %v2381_v60 = vunpack.c.h.s8.bf16 %v1557_v3  ;;  %v2466_v23 = vunpack.c.l.s8.bf16 %v1602_v37  ;;  %v2422_v37 = vunpack.c.h.s8.bf16 %v1578_v5 }
 0x3c1   :  { %v3542_v57 = vpop.f32.mrf.mxu1  ;;  %3787 = vmatmul.mubr.bf16.vlgmr.msra.gmra.mxu1 %v5714_v1  ;;  %3816 = vmatpush2.bf16.msra.mxu0 %v2365_v51  ;;  %v1565_v1 = vld [vmem:[%s7080_s5 + $0xa50] sm:$0xff]  ;;  %v1598_v51 = vld [vmem:[%s7080_s5 + $0xb58] sm:$0xff] }
 0x3c2   :  { %v6609_v11 = vadd.f32 %v3542_v57, %v6541_v26  ;;  %3837 = vmatpush1.bf16.msra.mxu1 %v2405_v10  ;;  %3868 = vmatprep.mubr.bf16.mxu1 %v5721_v4  ;;  %v2357_v4 = vunpack.c.h.s8.bf16 %v1545_v7  ;;  %v2397_v8 = vunpack.c.h.s8.bf16 %v1565_v1  ;;  %v2393_v30 = vunpack.c.l.s8.bf16 %v1565_v1 }
 0x3c3   :  { %v3544_v34 = vpop.f32.mrf.mxu1  ;;  %3817 = vmatprep.subr.bf16.mxu0 %v2362_v0  ;;  %3838 = vmatprep.subr.bf16.mxu1 %v2402_v40  ;;  %v1586_v0 = vld [vmem:[%s7080_s5 + $0xaf8] sm:$0xff]  ;;  %v2377_v57 = vunpack.c.l.s8.bf16 %v1557_v3  ;;  %v2458_v1 = vunpack.c.l.s8.bf16 %v1598_v51 }
 0x3c4   :  { %v6619_v26 = vadd.f32 %v3544_v34, %v6548_v35  ;;  %v2353_v35 = vunpack.c.l.s8.bf16 %v1545_v7  ;;  %v1574_v3 = vld [vmem:[%s7080_s5 + $0xa98] sm:$0xff] }
 0x3c5   :  { %v3546_v47 = vpop.f32.mrf.mxu1  ;;  %3818 = vmatpush2.bf16.msra.mxu0 %v2361_v21  ;;  %v2462_v21 = vunpack.c.h.s8.bf16 %v1598_v51  ;;  %v2414_v51 = vunpack.c.h.s8.bf16 %v1574_v3 }
 0x3c6   :  { %3839 = vmatpush1.bf16.msra.mxu1 %v2401_v22  ;;  %3819 = vmatprep.subr.bf16.mxu0 %v2358_v25  ;;  %v2438_v25 = vunpack.c.h.s8.bf16 %v1586_v0  ;;  %v2434_v47 = vunpack.c.l.s8.bf16 %v1586_v0 }
 0x3c7   :  { %v3547_v52 = vpop.f32.mrf.mxu1  ;;  %3840 = vmatprep.subr.bf16.mxu1 %v2398_v56 }
 0x3c9   :  { %3820 = vmatpush2.bf16.msra.mxu0 %v2357_v4  ;;  %v1582_v4 = vld [vmem:[%s7080_s5 + $0xad8] sm:$0xff] }
 0x3ca   :  { %3841 = vmatpush1.bf16.msra.mxu1 %v2397_v8  ;;  %3821 = vmatprep.subr.bf16.mxu0 %v2354_v63  ;;  %v2430_v53 = vunpack.c.h.s8.bf16 %v1582_v4  ;;  %v2426_v50 = vunpack.c.l.s8.bf16 %v1582_v4 }
 0x3cb   :  { %3842 = vmatprep.subr.bf16.mxu1 %v2394_v61  ;;  %v1593_v61 = vld [vmem:[%s7080_s5 + $0xb30] sm:$0xff] }
 0x3cd   :  { %3822 = vmatpush2.bf16.msra.mxu0 %v2353_v35  ;;  %v2453_v35 = vunpack.c.h.s8.bf16 %v1593_v61 }
 0x3ce   :  { %3843 = vmatpush1.bf16.msra.mxu1 %v2393_v30  ;;  %3823 = vmatprep.subr.bf16.mxu0 %v2350_v2  ;;  %v2429_v30 = vunpack.c.h.s8.bf16 %v1581_v18 }
 0x3cf   :  { %3844 = vmatprep.subr.bf16.mxu1 %v2390_v29  ;;  %v1590_v29 = vld [vmem:[%s7080_s5 + $0xb18] sm:$0xff] }
 0x3d1   :  { %3824 = vmatpush2.bf16.msra.mxu0 %v2349_v38  ;;  %v2449_v38 = vunpack.c.l.s8.bf16 %v1593_v61 }
 0x3d2   :  { %3845 = vmatpush1.bf16.msra.mxu1 %v2389_v54  ;;  %3825 = vmatprep.subr.bf16.mxu0 %v2346_v14  ;;  %v2425_v54 = vunpack.c.l.s8.bf16 %v1581_v18  ;;  %v2446_v14 = vunpack.c.h.s8.bf16 %v1590_v29  ;;  %v1629_v18 = vld [vmem:[%s7080_s5 + $0xc50] sm:$0xff] }
 0x3d3   :  { %3846 = vmatprep.subr.bf16.mxu1 %v2386_v33  ;;  %v1589_v33 = vld [vmem:[%s7080_s5 + $0xb10] sm:$0xff] }
 0x3d5   :  { %3826 = vmatpush2.bf16.msra.mxu0 %v2345_v59  ;;  %v2445_v59 = vunpack.c.h.s8.bf16 %v1589_v33 }
 0x3d6   :  { %3847 = vmatpush1.bf16.msra.mxu1 %v2385_v27  ;;  %3877 = vmatprep.subr.bf16.mxu0 %v2470_v48  ;;  %v2421_v27 = vunpack.c.h.s8.bf16 %v1577_v39  ;;  %v2442_v48 = vunpack.c.l.s8.bf16 %v1590_v29 }
 0x3d7   :  { %3848 = vmatprep.subr.bf16.mxu1 %v2382_v32  ;;  %v1618_v32 = vld [vmem:[%s7080_s5 + $0xbf8] sm:$0xff] }
 0x3d8   :  { %v3583_v10 = vpop.f32.mrf.mxu0  ;;  %3828 = vmatmul.mubr.bf16.vlgmr.msra.gmra.mxu0 %v5716_v55  ;;  %v1597_v55 = vld [vmem:[%s7080_s5 + $0xb50] sm:$0xff] }
 0x3d9   :  { %v6653_v40 = vadd.f32 %v3583_v10, %v6609_v11  ;;  %3878 = vmatpush1.bf16.msra.mxu0 %v2469_v24  ;;  %3909 = vmatprep.mubr.bf16.mxu0 %v5727_v43  ;;  %v1585_v11 = vld [vmem:[%s7080_s5 + $0xaf0] sm:$0xff]  ;;  %v2461_v7 = vunpack.c.h.s8.bf16 %v1597_v55  ;;  %v2457_v8 = vunpack.c.l.s8.bf16 %v1597_v55  ;;  %v2441_v24 = vunpack.c.l.s8.bf16 %v1589_v33  ;;  %v1634_v55 = vld [vmem:[%s7080_s5 + $0xc78] sm:$0xff] }
 0x3da   :  { %3849 = vmatpush1.bf16.msra.mxu1 %v2381_v60  ;;  %v3585_v42 = vpop.f32.mrf.mxu0  ;;  %3879 = vmatprep.subr.bf16.mxu0 %v2466_v23  ;;  %v2437_v56 = vunpack.c.h.s8.bf16 %v1585_v11  ;;  %v2433_v63 = vunpack.c.l.s8.bf16 %v1585_v11  ;;  %v2417_v60 = vunpack.c.l.s8.bf16 %v1577_v39  ;;  %v2502_v23 = vunpack.c.h.s8.bf16 %v1618_v32  ;;  %v1573_v10 = vld [vmem:[%s7080_s5 + $0xa90] sm:$0xff] }
 0x3db   :  { %v6660_v22 = vadd.f32 %v3585_v42, %v6619_v26  ;;  %3850 = vmatprep.subr.bf16.mxu1 %v2378_v36  ;;  %v1594_v26 = vld [vmem:[%s7080_s5 + $0xb38] sm:$0xff]  ;;  %v1617_v36 = vld [vmem:[%s7080_s5 + $0xbf0] sm:$0xff]  ;;  %v2498_v42 = vunpack.c.l.s8.bf16 %v1618_v32  ;;  %v2409_v11 = vunpack.c.l.s8.bf16 %v1573_v10  ;;  %v2530_v4 = vunpack.c.l.s8.bf16 %v1634_v55 }
 0x3dc   :  { %v3587_v43 = vpop.f32.mrf.mxu0  ;;  %v2454_v52 = vunpack.c.h.s8.bf16 %v1594_v26  ;;  %v2450_v2 = vunpack.c.l.s8.bf16 %v1594_v26  ;;  %v2501_v0 = vunpack.c.h.s8.bf16 %v1617_v36  ;;  %v1605_v39 = vld [vmem:[%s7080_s5 + $0xb90] sm:$0xff] }
 0x3dd   :  { %3880 = vmatpush1.bf16.msra.mxu0 %v2465_v45  ;;  %v2413_v45 = vunpack.c.h.s8.bf16 %v1573_v10  ;;  %v2477_v32 = vunpack.c.h.s8.bf16 %v1605_v39  ;;  %v1621_v10 = vld [vmem:[%s7080_s5 + $0xc10] sm:$0xff] }
 0x3de   :  { %3851 = vmatpush1.bf16.msra.mxu1 %v2377_v57  ;;  %v3588_v34 = vpop.f32.mrf.mxu0  ;;  %3881 = vmatprep.subr.bf16.mxu0 %v2462_v21  ;;  %v2410_v57 = vunpack.c.l.s8.bf16 %v1574_v3  ;;  %v1614_v21 = vld [vmem:[%s7080_s5 + $0xbd8] sm:$0xff] }
 0x3df   :  { %3852 = vmatprep.subr.bf16.mxu1 %v2438_v25  ;;  %v2497_v25 = vunpack.c.l.s8.bf16 %v1617_v36  ;;  %v2494_v43 = vunpack.c.h.s8.bf16 %v1614_v21  ;;  %v2534_v34 = vunpack.c.h.s8.bf16 %v1634_v55  ;;  %v2490_v26 = vunpack.c.l.s8.bf16 %v1614_v21 }
 0x3e0   :  { %v2509_v55 = vunpack.c.h.s8.bf16 %v1621_v10 }
 0x3e1   :  { %3882 = vmatpush1.bf16.msra.mxu0 %v2461_v7  ;;  %v1613_v7 = vld [vmem:[%s7080_s5 + $0xbd0] sm:$0xff] }
 0x3e2   :  { %3853 = vmatpush2.bf16.msra.mxu1 %v2437_v56  ;;  %3883 = vmatprep.subr.bf16.mxu0 %v2458_v1  ;;  %v1633_v56 = vld [vmem:[%s7080_s5 + $0xc70] sm:$0xff]  ;;  %v2493_v1 = vunpack.c.h.s8.bf16 %v1613_v7 }
 0x3e3   :  { %3854 = vmatprep.subr.bf16.mxu1 %v2434_v47  ;;  %v2533_v47 = vunpack.c.h.s8.bf16 %v1633_v56 }
 0x3e5   :  { %3884 = vmatpush1.bf16.msra.mxu0 %v2457_v8  ;;  %v1610_v8 = vld [vmem:[%s7080_s5 + $0xbb8] sm:$0xff] }
 0x3e6   :  { %3855 = vmatpush2.bf16.msra.mxu1 %v2433_v63  ;;  %3885 = vmatprep.subr.bf16.mxu0 %v2454_v52  ;;  %v1630_v63 = vld [vmem:[%s7080_s5 + $0xc58] sm:$0xff]  ;;  %v1609_v52 = vld [vmem:[%s7080_s5 + $0xbb0] sm:$0xff] }
 0x3e7   :  { %3856 = vmatprep.subr.bf16.mxu1 %v2430_v53  ;;  %v2489_v53 = vunpack.c.l.s8.bf16 %v1613_v7  ;;  %v2526_v29 = vunpack.c.h.s8.bf16 %v1630_v63  ;;  %v2522_v33 = vunpack.c.l.s8.bf16 %v1630_v63 }
 0x3e9   :  { %3886 = vmatpush1.bf16.msra.mxu0 %v2453_v35 }
 0x3ea   :  { %3857 = vmatpush2.bf16.msra.mxu1 %v2429_v30  ;;  %3887 = vmatprep.subr.bf16.mxu0 %v2450_v2  ;;  %v2529_v30 = vunpack.c.l.s8.bf16 %v1633_v56  ;;  %v2486_v2 = vunpack.c.h.s8.bf16 %v1610_v8 }
 0x3eb   :  { %3858 = vmatprep.subr.bf16.mxu1 %v2426_v50 }
 0x3ed   :  { %3888 = vmatpush1.bf16.msra.mxu0 %v2449_v38  ;;  %v2485_v38 = vunpack.c.h.s8.bf16 %v1609_v52 }
 0x3ee   :  { %3859 = vmatpush2.bf16.msra.mxu1 %v2425_v54  ;;  %3889 = vmatprep.subr.bf16.mxu0 %v2446_v14  ;;  %v2525_v54 = vunpack.c.h.s8.bf16 %v1629_v18 }
 0x3ef   :  { %3860 = vmatprep.subr.bf16.mxu1 %v2422_v37  ;;  %v1626_v37 = vld [vmem:[%s7080_s5 + $0xc38] sm:$0xff] }
 0x3f0   :  { %v2514_v36 = vunpack.c.l.s8.bf16 %v1626_v37 }
 0x3f1   :  { %3890 = vmatpush1.bf16.msra.mxu0 %v2445_v59  ;;  %v2521_v59 = vunpack.c.l.s8.bf16 %v1629_v18 }
 0x3f2   :  { %3861 = vmatpush2.bf16.msra.mxu1 %v2421_v27  ;;  %3891 = vmatprep.subr.bf16.mxu0 %v2442_v48  ;;  %v1625_v48 = vld [vmem:[%s7080_s5 + $0xc30] sm:$0xff] }
 0x3f3   :  { %3862 = vmatprep.subr.bf16.mxu1 %v2418_v58  ;;  %v2518_v58 = vunpack.c.h.s8.bf16 %v1626_v37  ;;  %v2517_v3 = vunpack.c.h.s8.bf16 %v1625_v48 }
 0x3f5   :  { %3892 = vmatpush1.bf16.msra.mxu0 %v2441_v24 }
 0x3f6   :  { %3863 = vmatpush2.bf16.msra.mxu1 %v2417_v60  ;;  %3893 = vmatprep.subr.bf16.mxu0 %v2502_v23  ;;  %v1622_v60 = vld [vmem:[%s7080_s5 + $0xc18] sm:$0xff] }
 0x3f7   :  { %3864 = vmatprep.subr.bf16.mxu1 %v2414_v51  ;;  %v1666_v23 = vld [vmem:[%s7080_s5 + $0xd78] sm:$0xff]  ;;  %v2473_v51 = vunpack.c.l.s8.bf16 %v1605_v39 }
 0x3f8   :  { %v1642_v39 = vld [vmem:[%s7080_s5 + $0xcb8] sm:$0xff] }
 0x3f9   :  { %3894 = vmatpush2.bf16.msra.mxu0 %v2501_v0  ;;  %v2513_v0 = vunpack.c.l.s8.bf16 %v1625_v48 }
 0x3fa   :  { %3865 = vmatpush2.bf16.msra.mxu1 %v2413_v45  ;;  %3895 = vmatprep.subr.bf16.mxu0 %v2498_v42  ;;  %v2598_v45 = vunpack.c.h.s8.bf16 %v1666_v23  ;;  %v1665_v42 = vld [vmem:[%s7080_s5 + $0xd70] sm:$0xff] }
 0x3fb   :  { %3866 = vmatprep.subr.bf16.mxu1 %v2410_v57  ;;  %v2510_v57 = vunpack.c.h.s8.bf16 %v1622_v60  ;;  %v2597_v21 = vunpack.c.h.s8.bf16 %v1665_v42 }
 0x3fd   :  { %3896 = vmatpush2.bf16.msra.mxu0 %v2497_v25  ;;  %v2594_v25 = vunpack.c.l.s8.bf16 %v1666_v23 }
 0x3fe   :  { %3867 = vmatpush2.bf16.msra.mxu1 %v2409_v11  ;;  %3897 = vmatprep.subr.bf16.mxu0 %v2494_v43  ;;  %v2506_v11 = vunpack.c.l.s8.bf16 %v1622_v60  ;;  %v1662_v43 = vld [vmem:[%s7080_s5 + $0xd58] sm:$0xff] }
 0x3ff   :  { %3918 = vmatprep.subr.bf16.mxu1 %v2534_v34  ;;  %v1650_v34 = vld [vmem:[%s7080_s5 + $0xcf8] sm:$0xff] }
 0x400   :  { %v2566_v63 = vunpack.c.h.s8.bf16 %v1650_v34 }
 0x401   :  { %v3624_v61 = vpop.f32.mrf.mxu1  ;;  %3869 = vmatmul.mubr.bf16.vlgmr.msra.gmra.mxu1 %v5850_v62  ;;  %3898 = vmatpush2.bf16.msra.mxu0 %v2493_v1  ;;  %v2593_v1 = vunpack.c.l.s8.bf16 %v1665_v42 }
 0x402   :  { %v6727_v35 = vadd.f32 %v3624_v61, %v6653_v40  ;;  %3919 = vmatpush1.bf16.msra.mxu1 %v2533_v47  ;;  %3950 = vmatprep.mubr.bf16.mxu1 %v5857_v31  ;;  %v2482_v40 = vunpack.c.l.s8.bf16 %v1610_v8  ;;  %v1606_v31 = vld [vmem:[%s7080_s5 + $0xb98] sm:$0xff] }
 0x403   :  { %v3626_v50 = vpop.f32.mrf.mxu1  ;;  %3899 = vmatprep.subr.bf16.mxu0 %v2490_v26  ;;  %3920 = vmatprep.subr.bf16.mxu1 %v2530_v4  ;;  %v2478_v27 = vunpack.c.h.s8.bf16 %v1606_v31  ;;  %v2474_v24 = vunpack.c.l.s8.bf16 %v1606_v31  ;;  %v2505_v26 = vunpack.c.l.s8.bf16 %v1621_v10  ;;  %v2590_v4 = vunpack.c.h.s8.bf16 %v1662_v43  ;;  %v1638_v10 = vld [vmem:[%s7080_s5 + $0xc98] sm:$0xff] }
 0x404   :  { %v6731_v62 = vadd.f32 %v3626_v50, %v6660_v22  ;;  %v2481_v22 = vunpack.c.l.s8.bf16 %v1609_v52  ;;  %v1649_v52 = vld [vmem:[%s7080_s5 + $0xcf0] sm:$0xff]  ;;  %v1646_v50 = vld [vmem:[%s7080_s5 + $0xcd8] sm:$0xff] }
 0x405   :  { %v3628_v5 = vpop.f32.mrf.mxu1  ;;  %3900 = vmatpush2.bf16.msra.mxu0 %v2489_v53  ;;  %v2565_v18 = vunpack.c.h.s8.bf16 %v1649_v52  ;;  %v2554_v37 = vunpack.c.l.s8.bf16 %v1646_v50 }
 0x406   :  { %3921 = vmatpush1.bf16.msra.mxu1 %v2529_v30  ;;  %3901 = vmatprep.subr.bf16.mxu0 %v2486_v2  ;;  %v2562_v30 = vunpack.c.l.s8.bf16 %v1650_v34  ;;  %v1658_v2 = vld [vmem:[%s7080_s5 + $0xd38] sm:$0xff] }
 0x407   :  { %v3629_v14 = vpop.f32.mrf.mxu1  ;;  %3922 = vmatprep.subr.bf16.mxu1 %v2526_v29  ;;  %v2582_v5 = vunpack.c.h.s8.bf16 %v1658_v2  ;;  %v2578_v31 = vunpack.c.l.s8.bf16 %v1658_v2  ;;  %v1678_v34 = vld [vmem:[%s7080_s5 + $0xdd8] sm:$0xff] }
 0x409   :  { %3902 = vmatpush2.bf16.msra.mxu0 %v2485_v38  ;;  %v1657_v38 = vld [vmem:[%s7080_s5 + $0xd30] sm:$0xff] }
 0x40a   :  { %3923 = vmatpush1.bf16.msra.mxu1 %v2525_v54  ;;  %3903 = vmatprep.subr.bf16.mxu0 %v2482_v40  ;;  %v2558_v54 = vunpack.c.h.s8.bf16 %v1646_v50  ;;  %v1645_v40 = vld [vmem:[%s7080_s5 + $0xcd0] sm:$0xff]  ;;  %v2581_v14 = vunpack.c.h.s8.bf16 %v1657_v38 }
 0x40b   :  { %3924 = vmatprep.subr.bf16.mxu1 %v2522_v33  ;;  %v2557_v33 = vunpack.c.h.s8.bf16 %v1645_v40 }
 0x40d   :  { %3904 = vmatpush2.bf16.msra.mxu0 %v2481_v22  ;;  %v1654_v22 = vld [vmem:[%s7080_s5 + $0xd18] sm:$0xff] }
 0x40e   :  { %3925 = vmatpush1.bf16.msra.mxu1 %v2521_v59  ;;  %3905 = vmatprep.subr.bf16.mxu0 %v2478_v27  ;;  %v2577_v59 = vunpack.c.l.s8.bf16 %v1657_v38  ;;  %v2553_v27 = vunpack.c.l.s8.bf16 %v1645_v40  ;;  %v2574_v48 = vunpack.c.h.s8.bf16 %v1654_v22  ;;  %v2570_v23 = vunpack.c.l.s8.bf16 %v1654_v22  ;;  %v1673_v38 = vld [vmem:[%s7080_s5 + $0xdb0] sm:$0xff] }
 0x40f   :  { %3926 = vmatprep.subr.bf16.mxu1 %v2518_v58  ;;  %v1653_v58 = vld [vmem:[%s7080_s5 + $0xd10] sm:$0xff] }
 0x411   :  { %3906 = vmatpush2.bf16.msra.mxu0 %v2477_v32  ;;  %v2550_v32 = vunpack.c.h.s8.bf16 %v1642_v39 }
 0x412   :  { %3927 = vmatpush1.bf16.msra.mxu1 %v2517_v3  ;;  %3907 = vmatprep.subr.bf16.mxu0 %v2474_v24  ;;  %v1641_v3 = vld [vmem:[%s7080_s5 + $0xcb0] sm:$0xff]  ;;  %v2573_v24 = vunpack.c.h.s8.bf16 %v1653_v58 }
 0x413   :  { %3928 = vmatprep.subr.bf16.mxu1 %v2514_v36  ;;  %v2549_v60 = vunpack.c.h.s8.bf16 %v1641_v3  ;;  %v2546_v36 = vunpack.c.l.s8.bf16 %v1642_v39  ;;  %v1670_v39 = vld [vmem:[%s7080_s5 + $0xd98] sm:$0xff] }
 0x415   :  { %3908 = vmatpush2.bf16.msra.mxu0 %v2473_v51  ;;  %v1682_v51 = vld [vmem:[%s7080_s5 + $0xdf8] sm:$0xff] }
 0x416   :  { %3929 = vmatpush1.bf16.msra.mxu1 %v2513_v0  ;;  %3959 = vmatprep.subr.bf16.mxu0 %v2598_v45  ;;  %v2569_v0 = vunpack.c.l.s8.bf16 %v1653_v58  ;;  %v2545_v45 = vunpack.c.l.s8.bf16 %v1641_v3  ;;  %v2630_v42 = vunpack.c.h.s8.bf16 %v1682_v51  ;;  %v1669_v58 = vld [vmem:[%s7080_s5 + $0xd90] sm:$0xff] }
 0x417   :  { %3930 = vmatprep.subr.bf16.mxu1 %v2510_v57  ;;  %v1681_v57 = vld [vmem:[%s7080_s5 + $0xdf0] sm:$0xff] }
 0x418   :  { %v3665_v7 = vpop.f32.mrf.mxu0  ;;  %3910 = vmatmul.mubr.bf16.vlgmr.msra.gmra.mxu0 %v5852_v49  ;;  %v1661_v49 = vld [vmem:[%s7080_s5 + $0xd50] sm:$0xff] }
 0x419   :  { %v6765_v56 = vadd.f32 %v3665_v7, %v6727_v35  ;;  %3960 = vmatpush1.bf16.msra.mxu0 %v2597_v21  ;;  %3991 = vmatprep.mubr.bf16.mxu0 %v5863_v20  ;;  %v2589_v61 = vunpack.c.h.s8.bf16 %v1661_v49  ;;  %v2586_v35 = vunpack.c.l.s8.bf16 %v1662_v43  ;;  %v2585_v29 = vunpack.c.l.s8.bf16 %v1661_v49  ;;  %v1677_v49 = vld [vmem:[%s7080_s5 + $0xdd0] sm:$0xff] }
 0x41a   :  { %3931 = vmatpush1.bf16.msra.mxu1 %v2509_v55  ;;  %v3667_v47 = vpop.f32.mrf.mxu0  ;;  %3961 = vmatprep.subr.bf16.mxu0 %v2594_v25  ;;  %v2542_v21 = vunpack.c.h.s8.bf16 %v1638_v10  ;;  %v1637_v55 = vld [vmem:[%s7080_s5 + $0xc90] sm:$0xff]  ;;  %v2629_v25 = vunpack.c.h.s8.bf16 %v1681_v57  ;;  %v2626_v43 = vunpack.c.l.s8.bf16 %v1682_v51  ;;  %v2538_v7 = vunpack.c.l.s8.bf16 %v1638_v10  ;;  %v1730_v51 = vld [vmem:[%s7080_s5 + $0xf78] sm:$0xff] }
 0x41b   :  { %v6772_v8 = vadd.f32 %v3667_v47, %v6731_v62  ;;  %3932 = vmatprep.subr.bf16.mxu1 %v2506_v11  ;;  %v2561_v62 = vunpack.c.l.s8.bf16 %v1649_v52  ;;  %v2541_v11 = vunpack.c.h.s8.bf16 %v1637_v55  ;;  %v2625_v47 = vunpack.c.l.s8.bf16 %v1681_v57  ;;  %v1697_v52 = vld [vmem:[%s7080_s5 + $0xe70] sm:$0xff]  ;;  %v1686_v10 = vld [vmem:[%s7080_s5 + $0xe18] sm:$0xff] }
 0x41c   :  { %v3669_v20 = vpop.f32.mrf.mxu0  ;;  %v2617_v50 = vunpack.c.l.s8.bf16 %v1677_v49  ;;  %v1689_v3 = vld [vmem:[%s7080_s5 + $0xe30] sm:$0xff] }
 0x41d   :  { %3962 = vmatpush1.bf16.msra.mxu0 %v2593_v1  ;;  %v1698_v1 = vld [vmem:[%s7080_s5 + $0xe78] sm:$0xff]  ;;  %v2621_v20 = vunpack.c.h.s8.bf16 %v1677_v49  ;;  %v1729_v57 = vld [vmem:[%s7080_s5 + $0xf70] sm:$0xff] }
 0x41e   :  { %3933 = vmatpush1.bf16.msra.mxu1 %v2505_v26  ;;  %v3670_v53 = vpop.f32.mrf.mxu0  ;;  %3963 = vmatprep.subr.bf16.mxu0 %v2590_v4  ;;  %v2537_v26 = vunpack.c.l.s8.bf16 %v1637_v55  ;;  %v2622_v4 = vunpack.c.h.s8.bf16 %v1678_v34  ;;  %v1685_v55 = vld [vmem:[%s7080_s5 + $0xe10] sm:$0xff] }
 0x41f   :  { %3934 = vmatprep.subr.bf16.mxu1 %v2566_v63  ;;  %v2662_v63 = vunpack.c.h.s8.bf16 %v1698_v1  ;;  %v2618_v53 = vunpack.c.l.s8.bf16 %v1678_v34  ;;  %v1726_v34 = vld [vmem:[%s7080_s5 + $0xf58] sm:$0xff] }
 0x421   :  { %3964 = vmatpush1.bf16.msra.mxu0 %v2589_v61  ;;  %v2661_v61 = vunpack.c.h.s8.bf16 %v1697_v52 }
 0x422   :  { %3935 = vmatpush2.bf16.msra.mxu1 %v2565_v18  ;;  %3965 = vmatprep.subr.bf16.mxu0 %v2586_v35  ;;  %v2658_v18 = vunpack.c.l.s8.bf16 %v1698_v1  ;;  %v1674_v35 = vld [vmem:[%s7080_s5 + $0xdb8] sm:$0xff] }
 0x423   :  { %3936 = vmatprep.subr.bf16.mxu1 %v2562_v30  ;;  %v1694_v30 = vld [vmem:[%s7080_s5 + $0xe58] sm:$0xff] }
 0x424   :  { %v2654_v40 = vunpack.c.h.s8.bf16 %v1694_v30  ;;  %v2650_v22 = vunpack.c.l.s8.bf16 %v1694_v30 }
 0x425   :  { %3966 = vmatpush1.bf16.msra.mxu0 %v2585_v29 }
 0x426   :  { %3937 = vmatpush2.bf16.msra.mxu1 %v2561_v62  ;;  %3967 = vmatprep.subr.bf16.mxu0 %v2582_v5  ;;  %v2657_v62 = vunpack.c.l.s8.bf16 %v1697_v52  ;;  %v2614_v5 = vunpack.c.h.s8.bf16 %v1674_v35  ;;  %v2718_v52 = vunpack.c.h.s8.bf16 %v1726_v34 }
 0x427   :  { %3938 = vmatprep.subr.bf16.mxu1 %v2558_v54 }
 0x429   :  { %3968 = vmatpush1.bf16.msra.mxu0 %v2581_v14 }
 0x42a   :  { %3939 = vmatpush2.bf16.msra.mxu1 %v2557_v33  ;;  %3969 = vmatprep.subr.bf16.mxu0 %v2578_v31  ;;  %v2610_v31 = vunpack.c.l.s8.bf16 %v1674_v35 }
 0x42b   :  { %3940 = vmatprep.subr.bf16.mxu1 %v2554_v37 }
 0x42d   :  { %3970 = vmatpush1.bf16.msra.mxu0 %v2577_v59  ;;  %v1690_v59 = vld [vmem:[%s7080_s5 + $0xe38] sm:$0xff] }
 0x42e   :  { %3941 = vmatpush2.bf16.msra.mxu1 %v2553_v27  ;;  %3971 = vmatprep.subr.bf16.mxu0 %v2574_v48  ;;  %v2606_v48 = vunpack.c.h.s8.bf16 %v1670_v39 }
 0x42f   :  { %3942 = vmatprep.subr.bf16.mxu1 %v2550_v32  ;;  %v2646_v32 = vunpack.c.h.s8.bf16 %v1690_v59 }
 0x431   :  { %3972 = vmatpush1.bf16.msra.mxu0 %v2573_v24  ;;  %v2605_v24 = vunpack.c.h.s8.bf16 %v1669_v58 }
 0x432   :  { %3943 = vmatpush2.bf16.msra.mxu1 %v2549_v60  ;;  %3973 = vmatprep.subr.bf16.mxu0 %v2570_v23  ;;  %v2645_v60 = vunpack.c.h.s8.bf16 %v1689_v3  ;;  %v2602_v23 = vunpack.c.l.s8.bf16 %v1670_v39  ;;  %v1706_v39 = vld [vmem:[%s7080_s5 + $0xeb8] sm:$0xff] }
 0x433   :  { %3944 = vmatprep.subr.bf16.mxu1 %v2546_v36  ;;  %v2642_v36 = vunpack.c.l.s8.bf16 %v1690_v59 }
 0x435   :  { %3974 = vmatpush1.bf16.msra.mxu0 %v2569_v0  ;;  %v2601_v0 = vunpack.c.l.s8.bf16 %v1669_v58  ;;  %v2678_v58 = vunpack.c.h.s8.bf16 %v1706_v39 }
 0x436   :  { %3945 = vmatpush2.bf16.msra.mxu1 %v2545_v45  ;;  %3975 = vmatprep.subr.bf16.mxu0 %v2630_v42  ;;  %v2641_v45 = vunpack.c.l.s8.bf16 %v1689_v3  ;;  %v2726_v42 = vunpack.c.h.s8.bf16 %v1730_v51 }
 0x437   :  { %3946 = vmatprep.subr.bf16.mxu1 %v2542_v21  ;;  %v2638_v21 = vunpack.c.h.s8.bf16 %v1686_v10 }
 0x439   :  { %3976 = vmatpush2.bf16.msra.mxu0 %v2629_v25  ;;  %v2725_v25 = vunpack.c.h.s8.bf16 %v1729_v57 }
 0x43a   :  { %3947 = vmatpush2.bf16.msra.mxu1 %v2541_v11  ;;  %3977 = vmatprep.subr.bf16.mxu0 %v2626_v43  ;;  %v2637_v11 = vunpack.c.h.s8.bf16 %v1685_v55  ;;  %v2722_v43 = vunpack.c.l.s8.bf16 %v1730_v51  ;;  %v1734_v51 = vld [vmem:[%s7080_s5 + $0xf98] sm:$0xff] }
 0x43b   :  { %3948 = vmatprep.subr.bf16.mxu1 %v2538_v7  ;;  %v2634_v7 = vunpack.c.l.s8.bf16 %v1686_v10 }
 0x43d   :  { %3978 = vmatpush2.bf16.msra.mxu0 %v2625_v47  ;;  %v1714_v47 = vld [vmem:[%s7080_s5 + $0xef8] sm:$0xff] }
 0x43e   :  { %3949 = vmatpush2.bf16.msra.mxu1 %v2537_v26  ;;  %3979 = vmatprep.subr.bf16.mxu0 %v2622_v4  ;;  %v2721_v4 = vunpack.c.l.s8.bf16 %v1729_v57  ;;  %v2734_v57 = vunpack.c.h.s8.bf16 %v1734_v51 }
 0x43f   :  { %4000 = vmatprep.subr.bf16.mxu1 %v2662_v63  ;;  %v2633_v63 = vunpack.c.l.s8.bf16 %v1685_v55  ;;  %v6939_v55 = vld [vmem:[%s7086_s7] sm:$0xf] }
 0x441   :  { %v3706_v2 = vpop.f32.mrf.mxu1  ;;  %3951 = vmatmul.mubr.bf16.vlgmr.msra.gmra.mxu1 %v5976_v46  ;;  %3980 = vmatpush2.bf16.msra.mxu0 %v2621_v20  ;;  %v1693_v46 = vld [vmem:[%s7080_s5 + $0xe50] sm:$0xff] }
 0x442   :  { %v6833_v29 = vadd.f32 %v3706_v2, %v6765_v56  ;;  %4001 = vmatpush1.bf16.msra.mxu1 %v2661_v61  ;;  %4032 = vmatprep.mubr.bf16.mxu1 %v5983_v9  ;;  %v2613_v9 = vunpack.c.h.s8.bf16 %v1673_v38  ;;  %v2653_v33 = vunpack.c.h.s8.bf16 %v1693_v46  ;;  %v2649_v27 = vunpack.c.l.s8.bf16 %v1693_v46  ;;  %v1721_v46 = vld [vmem:[%s7080_s5 + $0xf30] sm:$0xff] }
 0x443   :  { %v3708_v54 = vpop.f32.mrf.mxu1  ;;  %3981 = vmatprep.subr.bf16.mxu0 %v2618_v53  ;;  %4002 = vmatprep.subr.bf16.mxu1 %v2658_v18  ;;  %v2694_v61 = vunpack.c.h.s8.bf16 %v1714_v47  ;;  %v1713_v53 = vld [vmem:[%s7080_s5 + $0xef0] sm:$0xff]  ;;  %v2714_v2 = vunpack.c.l.s8.bf16 %v1726_v34  ;;  %v2705_v59 = vunpack.c.l.s8.bf16 %v1721_v46 }
 0x444   :  { %v6843_v56 = vadd.f32 %v3708_v54, %v6772_v8  ;;  %v2609_v8 = vunpack.c.l.s8.bf16 %v1673_v38  ;;  %v2693_v30 = vunpack.c.h.s8.bf16 %v1713_v53  ;;  %v2689_v54 = vunpack.c.l.s8.bf16 %v1713_v53  ;;  %v4669_v53 = vld [vmem:[%s7083_s8 + $0x70] sm:$0xff]  }
 0x445   :  { %v3710_v14 = vpop.f32.mrf.mxu1  ;;  %3982 = vmatpush2.bf16.msra.mxu0 %v2617_v50  ;;  %v2690_v50 = vunpack.c.l.s8.bf16 %v1714_v47  ;;  %v2730_v47 = vunpack.c.l.s8.bf16 %v1734_v51  ;;  %v4685_v51 = vld [vmem:[%s7083_s8 + $0xa8] sm:$0xff]  }
 0x446   :  { %4003 = vmatpush1.bf16.msra.mxu1 %v2657_v62  ;;  %3983 = vmatprep.subr.bf16.mxu0 %v2614_v5  ;;  %v6896_v62 = vld [vmem:[%s7084_s1] sm:$0xff]  ;;  %v1710_v5 = vld [vmem:[%s7080_s5 + $0xed8] sm:$0xff]  ;;  %v1709_v14 = vld [vmem:[%s7080_s5 + $0xed0] sm:$0xff] }
 0x447   :  { %v3711_v37 = vpop.f32.mrf.mxu1  ;;  %4004 = vmatprep.subr.bf16.mxu1 %v2654_v40  ;;  %4196 = vperm.xlu0 %4661, %v6896_v62  }
 0x448   :  { %v2682_v37 = vunpack.c.l.s8.bf16 %v1710_v5 }
 0x449   :  { %3984 = vmatpush2.bf16.msra.mxu0 %v2613_v9  ;;  %v2709_v9 = vunpack.c.h.s8.bf16 %v1721_v46 }
 0x44a   :  { %4005 = vmatpush1.bf16.msra.mxu1 %v2653_v33  ;;  %3985 = vmatprep.subr.bf16.mxu0 %v2610_v31  ;;  %v2685_v33 = vunpack.c.h.s8.bf16 %v1709_v14 }
 0x44b   :  { %4006 = vmatprep.subr.bf16.mxu1 %v2650_v22  ;;  %v1718_v22 = vld [vmem:[%s7080_s5 + $0xf18] sm:$0xff] }
 0x44d   :  { %3986 = vmatpush2.bf16.msra.mxu0 %v2609_v8  ;;  %v2681_v8 = vunpack.c.l.s8.bf16 %v1709_v14  ;;  %v4678_v14 = vld [vmem:[%s7083_s8 + $0x10] sm:$0xff]  }
 0x44e   :  { %4007 = vmatpush1.bf16.msra.mxu1 %v2649_v27  ;;  %3987 = vmatprep.subr.bf16.mxu0 %v2606_v48  ;;  %v2702_v27 = vunpack.c.h.s8.bf16 %v1718_v22  ;;  %v1717_v48 = vld [vmem:[%s7080_s5 + $0xf10] sm:$0xff] }
 0x44f   :  { %4008 = vmatprep.subr.bf16.mxu1 %v2646_v32  ;;  %v1705_v32 = vld [vmem:[%s7080_s5 + $0xeb0] sm:$0xff]  ;;  %v2701_v3 = vunpack.c.h.s8.bf16 %v1717_v48 }
 0x451   :  { %3988 = vmatpush2.bf16.msra.mxu0 %v2605_v24  ;;  %v2677_v24 = vunpack.c.h.s8.bf16 %v1705_v32 }
 0x452   :  { %4009 = vmatpush1.bf16.msra.mxu1 %v2645_v60  ;;  %3989 = vmatprep.subr.bf16.mxu0 %v2602_v23  ;;  %v2698_v60 = vunpack.c.l.s8.bf16 %v1718_v22  ;;  %v6923_v23 = vld [vmem:[%s7085_s6] sm:$0xf] }
 0x453   :  { %4010 = vmatprep.subr.bf16.mxu1 %v2642_v36  ;;  %v2674_v36 = vunpack.c.l.s8.bf16 %v1706_v39  ;;  %v4091_v10 = vrot.slane %v6923_v23, %v5043_v15  ;;  %v4087_v46 = vrot.slane %v6923_v23, %v5034_v12  ;;  %v4681_v39 = vld [vmem:[%s7083_s8 + $0x40] sm:$0xff]  }
 0x455   :  { %3990 = vmatpush2.bf16.msra.mxu0 %v2601_v0  ;;  %v1702_v0 = vld [vmem:[%s7080_s5 + $0xe98] sm:$0xff] }
 0x456   :  { %4011 = vmatpush1.bf16.msra.mxu1 %v2641_v45  ;;  %4041 = vmatprep.subr.bf16.mxu0 %v2726_v42  ;;  %v2697_v45 = vunpack.c.l.s8.bf16 %v1717_v48  ;;  %v2673_v42 = vunpack.c.l.s8.bf16 %v1705_v32 }
 0x457   :  { %4012 = vmatprep.subr.bf16.mxu1 %v2638_v21  ;;  %v1733_v21 = vld [vmem:[%s7080_s5 + $0xf90] sm:$0xff] }
 0x458   :  { %v3747_v1 = vpop.f32.mrf.mxu0  ;;  %3992 = vmatmul.mubr.bf16.vlgmr.msra.gmra.mxu0 %v5978_v44  ;;  %v1725_v44 = vld [vmem:[%s7080_s5 + $0xf50] sm:$0xff]  ;;  %v2733_v34 = vunpack.c.h.s8.bf16 %v1733_v21 }
 0x459   :  { %v6877_v26 = vadd.f32 %v3747_v1, %v6833_v29  ;;  %4042 = vmatpush1.bf16.msra.mxu0 %v2725_v25  ;;  %4585 = vmatprep.mubr.msk.bf16.mxu0 %vm143_vm0, %v5989_v17  ;;  %v2717_v18 = vunpack.c.h.s8.bf16 %v1725_v44  ;;  %v1722_v29 = vld [vmem:[%s7080_s5 + $0xf38] sm:$0xff]  ;;  %v2713_v38 = vunpack.c.l.s8.bf16 %v1725_v44  ;;  %v2670_v25 = vunpack.c.h.s8.bf16 %v1702_v0 }
 0x45a   :  { %4013 = vmatpush1.bf16.msra.mxu1 %v2637_v11  ;;  %v3749_v49 = vpop.f32.mrf.mxu0  ;;  %4043 = vmatprep.subr.bf16.mxu0 %v2722_v43  ;;  %v2710_v40 = vunpack.c.h.s8.bf16 %v1722_v29  ;;  %v2706_v31 = vunpack.c.l.s8.bf16 %v1722_v29  ;;  %v1701_v11 = vld [vmem:[%s7080_s5 + $0xe90] sm:$0xff]  ;;  %v4105_v43 = vmul.f32 %v4091_v10, %v6441_v19  ;;  %v4667_v19 = vld [vmem:[%s7083_s8 + $0x78] sm:$0xff]   ;;  %v4686_v10 = vld [vmem:[%s7083_s8 + $0xa0] sm:$0xff]  }
 0x45b   :  { %v6885_v20 = vadd.f32 %v3749_v49, %v6843_v56  ;;  %4014 = vmatprep.subr.bf16.mxu1 %v2634_v7  ;;  %v2686_v56 = vunpack.c.h.s8.bf16 %v1710_v5  ;;  %v4117_v7 = vrot.slane %v6939_v55, %v5043_v15  ;;  %v2669_v1 = vunpack.c.h.s8.bf16 %v1701_v11 }
 0x45c   :  { %v3751_v17 = vpop.f32.mrf.mxu0 }
 0x45d   :  { %4044 = vmatpush1.bf16.msra.mxu0 %v2721_v4  ;;  %v2666_v4 = vunpack.c.l.s8.bf16 %v1702_v0  ;;  %v4131_v49 = vadd.f32 %v4117_v7, %v4105_v43  ;;  %v7114_v17 = vmov 0   ;;  %v4687_v0 = vld [vmem:[%s7083_s8 + $0x98] sm:$0xff]   ;;  %v4689_v43 = vld [vmem:[%s7083_s8 + $0x88] sm:$0xff]  }
 0x45e   :  { %4015 = vmatpush1.bf16.msra.mxu1 %v2633_v63  ;;  %v3752_v35 = vpop.f32.mrf.mxu0  ;;  %4045 = vmatprep.subr.bf16.mxu0 %v2718_v52  ;;  %v2729_v63 = vunpack.c.l.s8.bf16 %v1733_v21  ;;  %v2665_v52 = vunpack.c.l.s8.bf16 %v1701_v11 }
 0x45f   :  { %4016 = vmatprep.subr.bf16.mxu1 %v2694_v61  ;;  %v4135_v44 = vmax.f32 %v4131_v49, 0.0  ;;  %v4668_v61 = vld [vmem:[%s7083_s8 + $0x38] sm:$0xff]  }
 0x461   :  { %4046 = vmatpush1.bf16.msra.mxu0 %v2717_v18  ;;  %v4139_v18 = vpack.c.bf16 %v4135_v44, %v4135_v44  ;;  %v4700_v44 = vmov 2  }
 0x462   :  { %4017 = vmatpush2.bf16.msra.mxu1 %v2693_v30  ;;  %4047 = vmatprep.subr.bf16.mxu0 %v2714_v2  ;;  %v4670_v30 = vld [vmem:[%s7083_s8 + $0x30] sm:$0xff]  }
 0x463   :  { %4018 = vmatprep.subr.bf16.mxu1 %v2690_v50  ;;  %v4671_v50 = vld [vmem:[%s7083_s8 + $0x68] sm:$0xff]   ;;  %4663 = vset.pattern.permute.xlu1 %v4700_v44 }
 0x464   :  { %4449 = vperm.xlu1 %4663, %v6896_v62  }
 0x465   :  { %4048 = vmatpush1.bf16.msra.mxu0 %v2713_v38 }
 0x466   :  { %4019 = vmatpush2.bf16.msra.mxu1 %v2689_v54  ;;  %4049 = vmatprep.subr.bf16.mxu0 %v2710_v40  ;;  %v4674_v54 = vld [vmem:[%s7083_s8 + $0x20] sm:$0xff]   ;;  %v4676_v40 = vld [vmem:[%s7083_s8 + $0x18] sm:$0xff]  }
 0x467   :  { %4020 = vmatprep.subr.bf16.mxu1 %v2686_v56  ;;  %v4677_v56 = vld [vmem:[%s7083_s8 + $0x50] sm:$0xff]  }
 0x469   :  { %4050 = vmatpush1.bf16.msra.mxu0 %v2709_v9  ;;  %v4104_v9 = vmul.f32 %v4087_v46, %v6434_v6 }
 0x46a   :  { %4021 = vmatpush2.bf16.msra.mxu1 %v2685_v33  ;;  %4051 = vmatprep.subr.bf16.mxu0 %v2706_v31  ;;  %v4113_v33 = vrot.slane %v6939_v55, %v5034_v12  ;;  %v4679_v31 = vld [vmem:[%s7083_s8 + $0x48] sm:$0xff]  }
 0x46b   :  { %4022 = vmatprep.subr.bf16.mxu1 %v2682_v37  ;;  %v4680_v37 = vld [vmem:[%s7083_s8 + $0x8] sm:$0xff]  }
 0x46c   :  { %v4130_v22 = vadd.f32 %v4113_v33, %v4104_v9  ;;  %v4121_v33 = vrot.slane %v6939_v55, %v5036_v13 }
 0x46d   :  { %4052 = vmatpush1.bf16.msra.mxu0 %v2705_v59 }
 0x46e   :  { %4023 = vmatpush2.bf16.msra.mxu1 %v2681_v8  ;;  %4053 = vmatprep.subr.bf16.mxu0 %v2702_v27  ;;  %v4682_v8 = vld [vmem:[%s7083_s8] sm:$0xff]   ;;  %v4134_v27 = vmax.f32 %v4130_v22, 0.0 }
 0x46f   :  { %4024 = vmatprep.subr.bf16.mxu1 %v2678_v58 }
 0x471   :  { %4054 = vmatpush1.bf16.msra.mxu0 %v2701_v3 }
 0x472   :  { %4025 = vmatpush2.bf16.msra.mxu1 %v2677_v24  ;;  %4055 = vmatprep.subr.bf16.mxu0 %v2698_v60  ;;  %v4138_v24 = vpack.c.bf16 %v4134_v27, %v4134_v27  ;;  %v4683_v60 = vld [vmem:[%s7083_s8 + $0xb8] sm:$0xff]  }
 0x473   :  { %4026 = vmatprep.subr.bf16.mxu1 %v2674_v36  ;;  %v4684_v36 = vld [vmem:[%s7083_s8 + $0xb0] sm:$0xff]  }
 0x475   :  { %4056 = vmatpush1.bf16.msra.mxu0 %v2697_v45 }
 0x476   :  { %4027 = vmatpush2.bf16.msra.mxu1 %v2673_v42  ;;  %4069 = vmatprep.subr.bf16.mxu0 %v2734_v57  ;;  %v4688_v42 = vld [vmem:[%s7083_s8 + $0x90] sm:$0xff]  }
 0x477   :  { %4028 = vmatprep.subr.bf16.mxu1 %v2670_v25 }
 0x479   :  { %4070 = vmatpush2.bf16.msra.mxu0 %v2733_v34  ;;  %v4690_v34 = vld [vmem:[%s7083_s8 + $0x80] sm:$0xff]  }
 0x47a   :  { %4029 = vmatpush2.bf16.msra.mxu1 %v2669_v1  ;;  %4071 = vmatprep.subr.bf16.mxu0 %v2730_v47  ;;  %v4691_v1 = vld [vmem:[%s7083_s8 + $0xc0] sm:$0xff]  }
 0x47b   :  { %4030 = vmatprep.subr.bf16.mxu1 %v2666_v4 }
 0x47d   :  { %4072 = vmatpush2.bf16.msra.mxu0 %v2729_v63 }
 0x47e   :  { %4031 = vmatpush2.bf16.msra.mxu1 %v2665_v52  ;;  %4618 = vmatprep.subr.bf16.mxu0 %v4667_v19 }
 0x47f   :  { %4398 = vmatprep.subr.bf16.mxu1 %v7114_v17 }
 0x480   :  { %4074 = vmatmul.mubr.bf16.vlgmr.msra.gmra.mxu0 %v6056_v28 }
 0x481   :  { %v3788_v35 = vpop.f32.mrf.mxu1  ;;  %4033 = vmatmul.mubr.bf16.vlgmr.msra.gmra.mxu1 %v6097_v41  ;;  %4619 = vmatpush3.bf16.msra.mxu0 %v4668_v61  ;;  %v4672_v41 = vld [vmem:[%s7083_s8 + $0x28] sm:$0xff]   ;;  %v4701_v61 = vmov 1  }
 0x482   :  { %v3789_v2 = vadd.f32 %v3788_v35, %v6877_v26  ;;  %4390 = vmatprep.mubr.bf16.mxu0 %v4139_v18  ;;  %4620 = vmatprep.subr.bf16.mxu0 %v4669_v53  ;;  %v4673_v26 = vld [vmem:[%s7083_s8 + $0x60] sm:$0xff]   ;;  %v4702_v53 = vmov 3  }
 0x483   :  { %v3790_v29 = vpop.f32.mrf.mxu1  ;;  %4399 = vmatpush1.bf16.msra.mxu1 %v4683_v60  ;;  %4662 = vset.pattern.permute.xlu0 %v4701_v61 }
 0x484   :  { %v3791_v28 = vadd.f32 %v3790_v29, %v6885_v20  ;;  %v4675_v20 = vld [vmem:[%s7083_s8 + $0x58] sm:$0xff]   ;;  %4400 = vmatprep.subr.bf16.mxu1 %v7114_v17  ;;  %4439 = vperm.xlu0 %4662, %v6896_v62  }
 0x485   :  { %v3792_v5 = vpop.f32.mrf.mxu1  ;;  %4621 = vmatpush3.bf16.msra.mxu0 %v4670_v30  ;;  %4664 = vset.pattern.permute.xlu1 %v4702_v53 }
 0x486   :  { %4622 = vmatprep.subr.bf16.mxu0 %v4671_v50  ;;  %4459 = vperm.xlu1 %4664, %v6896_v62  }
 0x487   :  { %v3793_v38 = vpop.f32.mrf.mxu1  ;;  %4401 = vmatpush1.bf16.msra.mxu1 %v4684_v36 }
 0x488   :  { %4402 = vmatprep.subr.bf16.mxu1 %v7114_v17 }
 0x489   :  { %4623 = vmatpush3.bf16.msra.mxu0 %v4672_v41 }
 0x48a   :  { %4624 = vmatprep.subr.bf16.mxu0 %v4673_v26 }
 0x48b   :  { %4403 = vmatpush1.bf16.msra.mxu1 %v4685_v51 }
 0x48c   :  { %4404 = vmatprep.subr.bf16.mxu1 %v7114_v17 }
 0x48d   :  { %4625 = vmatpush3.bf16.msra.mxu0 %v4674_v54 }
 0x48e   :  { %4626 = vmatprep.subr.bf16.mxu0 %v4675_v20 }
 0x48f   :  { %4405 = vmatpush1.bf16.msra.mxu1 %v4686_v10 }
 0x490   :  { %4406 = vmatprep.subr.bf16.mxu1 %v7114_v17 }
 0x491   :  { %4627 = vmatpush3.bf16.msra.mxu0 %v4676_v40 }
 0x492   :  { %4628 = vmatprep.subr.bf16.mxu0 %v4677_v56  ;;  %v4095_v56 = vrot.slane %v6923_v23, %v5036_v13 }
 0x493   :  { %4407 = vmatpush1.bf16.msra.mxu1 %v4687_v0 }
 0x494   :  { %4408 = vmatprep.subr.bf16.mxu1 %v7114_v17 }
 0x495   :  { %4629 = vmatpush3.bf16.msra.mxu0 %v4678_v14 }
 0x496   :  { %4630 = vmatprep.subr.bf16.mxu0 %v4679_v31 }
 0x497   :  { %4409 = vmatpush1.bf16.msra.mxu1 %v4688_v42 }
 0x498   :  { %v3829_v6 = vpop.f32.mrf.mxu0  ;;  %4410 = vmatprep.subr.bf16.mxu1 %v7114_v17 }
 0x499   :  { %v3830_v59 = vadd.f32 %v3829_v6, %v3789_v2  ;;  %4631 = vmatpush3.bf16.msra.mxu0 %v4680_v37  ;;  %v4099_v37 = vrot.slane %v6923_v23, %v5045_v16 }
 0x49a   :  { %v3831_v48 = vpop.f32.mrf.mxu0  ;;  %4632 = vmatprep.subr.bf16.mxu0 %v4681_v39 }
 0x49b   :  { %v3832_v58 = vadd.f32 %v3831_v48, %v3791_v28  ;;  %4411 = vmatpush1.bf16.msra.mxu1 %v4689_v43  ;;  %v4193_v43 = vld [vmem:[%s7088_s9] sm:$0x1f] }
 0x49c   :  { %v3833_v32 = vpop.f32.mrf.mxu0  ;;  %4412 = vmatprep.subr.bf16.mxu1 %v7114_v17 }
 0x49d   :  { %4633 = vmatpush3.bf16.msra.mxu0 %v4682_v8  ;;  %v4125_v8 = vrot.slane %v6939_v55, %v5045_v16  ;;  %v4692_v55 = vld [vmem:[%s7087_s11 + $0x10] ss:$0 sps:$4 sm:$0xff]  }
 0x49e   :  { %v3834_v3 = vpop.f32.mrf.mxu0 }
 0x49f   :  { %4413 = vmatpush1.bf16.msra.mxu1 %v4690_v34  ;;  %v4202_v34 = vrot.slane %v4193_v43, %v5034_v12 }
 0x4a0   :  { %4391 = vmatmul.mubr.bf16.vlgmr.msra.gmra.mxu0 %v4138_v24  ;;  %4428 = vmatprep.subr.bf16.mxu1 %v7114_v17  ;;  %v4703_v17 = vmov 4  }
 0x4a1   :  { %4666 = vset.pattern.permute.xlu0 %v4703_v17  ;;  %4665 = vset.pattern.permute.xlu1 %v4703_v17  ;;  %v4465_v17 = vrot.slane %v4193_v43, %v5045_v16 }
 0x4a2   :  { %4469 = vperm.xlu1 %4665, %v6896_v62  }
 0x4a3   :  { %4429 = vmatpush2.bf16.msra.mxu1 %v4691_v1 }
 0x4c1   :  { %v3870_v45 = vpop.f32.mrf.mxu1 }
 0x4c2   :  { %v3871_v57 = vadd.f32 %v3870_v45, %v3830_v59  ;;  %v4197_v1 = vpop.permute.xlu0 %4196 }
 0x4c3   :  { %v3872_v21 = vpop.f32.mrf.mxu1 }
 0x4c4   :  { %v3873_v25 = vadd.f32 %v3872_v21, %v3832_v58  ;;  %v4521_v21 = vsel %vm4519_vm2, %v4692_v55, 0 }
 0x4c5   :  { %v3874_v11 = vpop.f32.mrf.mxu1 }
 0x4c6   :  { %v4694_v11 = vld [vmem:[%s7087_s11] sm:$0xff]  }
 0x4c7   :  { %v3875_v7 = vpop.f32.mrf.mxu1 }
 0x4d8   :  { %v3911_v47 = vpop.f32.mrf.mxu0 }
 0x4d9   :  { %v3912_v4 = vadd.f32 %v3911_v47, %v3871_v57  ;;  %v4704_v57 = vmov 0.0   ;;  %v4203_v47 = vmul.f32 %v4202_v34, %v4197_v1 }
 0x4da   :  { %v3913_v49 = vpop.f32.mrf.mxu0  ;;  %4644 = vmatprep.subr.bf16.mxu0 %v4704_v57  ;;  %4650 = vmatprep.mubr.msk.bf16.mxu0 %vm4705_vm3, %v4704_v57 }
 0x4db   :  { %v3914_v63 = vadd.f32 %v3913_v49, %v3873_v25  ;;  %4645 = vmatpush3.bf16.msra.mxu0 %v4521_v21  ;;  %v4693_v25 = vld [vmem:[%s7087_s11 + $0x8] sm:$0xff]  }
 0x4dc   :  { %v3915_v52 = vpop.f32.mrf.mxu0  ;;  %4646 = vmatprep.subr.bf16.mxu0 %v4704_v57 }
 0x4dd   :  { %v4455_v52 = vrot.slane %v4193_v43, %v5036_v13  ;;  %v4612_v13 = vld [vmem:[%s7089_s10] ss:$0 sm:$0xff] }
 0x4de   :  { %v3916_v19 = vpop.f32.mrf.mxu0 }
 0x4df   :  { %4647 = vmatpush3.bf16.msra.mxu0 %v4693_v25  ;;  %v4450_v7 = vpop.permute.xlu1 %4449 }
 0x4e0   :  { %4648 = vmatprep.subr.bf16.mxu0 %v4704_v57 }
 0x4e3   :  { %4649 = vmatpush3.bf16.msra.mxu0 %v4694_v11 }
 0x4ff   :  { %v4440_v49 = vpop.permute.xlu0 %4439 }
 0x501   :  { %v3952_v18 = vpop.f32.mrf.mxu1 }
 0x502   :  { %v3953_v41 = vadd.f32 %v3952_v18, %v3912_v4  ;;  %v4445_v4 = vrot.slane %v4193_v43, %v5043_v15  ;;  %v7115_v18 = vld [vmem:[#allocation2_spill] sm:$0xff] }
 0x503   :  { %v3954_v35 = vpop.f32.mrf.mxu1 }
 0x504   :  { %v3955_v26 = vadd.f32 %v3954_v35, %v3914_v63  ;;  %v4460_v63 = vpop.permute.xlu1 %4459  ;;  %v4446_v19 = vmul.f32 %v4445_v4, %v4440_v49  ;;  %v4475_v35 = vrot.slane %v4193_v43, %v7115_v18 }
 0x505   :  { %v3956_v30 = vpop.f32.mrf.mxu1 }
 0x507   :  { %v3957_v2 = vpop.f32.mrf.mxu1 }
 0x518   :  { %v3993_v50 = vpop.f32.mrf.mxu0 }
 0x519   :  { %v3994_v38 = vadd.f32 %v3993_v50, %v3953_v41  ;;  %v4456_v50 = vmul.f32 %v4455_v52, %v4450_v7 }
 0x51a   :  { %v3995_v29 = vpop.f32.mrf.mxu0 }
 0x51b   :  { %v3996_v40 = vadd.f32 %v3995_v29, %v3955_v26 }
 0x51c   :  { %v3997_v28 = vpop.f32.mrf.mxu0 }
 0x51d   :  { %v4470_v2 = vpop.permute.xlu1 %4469 }
 0x51e   :  { %v3998_v5 = vpop.f32.mrf.mxu0  ;;  %v4476_v15 = vmul.f32 %v4475_v35, %v4470_v2 }
 0x51f   :  { %v4466_v5 = vmul.f32 %v4465_v17, %v4460_v63 }
 0x540   :  { %v4075_v54 = vpop.f32.mrf.mxu0 }
 0x541   :  { %v4034_v20 = vpop.f32.mrf.mxu1 }
 0x542   :  { %v4035_v46 = vadd.f32 %v4034_v20, %v3994_v38  ;;  %v4077_v14 = vpop.f32.mrf.mxu0 }
 0x543   :  { %v4036_v62 = vpop.f32.mrf.mxu1 }
 0x544   :  { %v4076_v9 = vadd.f32 %v4075_v54, %v4035_v46  ;;  %v4037_v31 = vadd.f32 %v4036_v62, %v3996_v40  ;;  %v4079_v22 = vpop.f32.mrf.mxu0  ;;  %v4613_v40 = vld [vmem:[%s7090_s12] ss:$0 sm:$0xff] }
 0x545   :  { %v4038_v39 = vpop.f32.mrf.mxu1 }
 0x546   :  { %v4106_v6 = vmul.f32 %v4095_v56, %v4076_v9  ;;  %v4078_v59 = vadd.f32 %v4077_v14, %v4037_v31  ;;  %v4080_v27 = vpop.f32.mrf.mxu0 }
 0x547   :  { %v4039_v48 = vpop.f32.mrf.mxu1 }
 0x548   :  { %v4132_v58 = vadd.f32 %v4121_v33, %v4106_v6  ;;  %v4107_v32 = vmul.f32 %v4099_v37, %v4078_v59 }
 0x54a   :  { %v4133_v3 = vadd.f32 %v4125_v8, %v4107_v32  ;;  %v4136_v24 = vmax.f32 %v4132_v58, 0.0 }
 0x54c   :  { %v4137_v60 = vmax.f32 %v4133_v3, 0.0  ;;  %v4140_v51 = vpack.c.bf16 %v4136_v24, %v4136_v24 }
 0x54e   :  { %v4141_v36 = vpack.c.bf16 %v4137_v60, %v4137_v60 }
 0x550   :  { %4611 = vmatprep.mubr.msk.bf16.mxu1 %vm4354_vm1, %v4141_v36 }
 0x551   :  { %4431 = vmatmul.mubr.bf16.vlgmr.msra.gmra.mxu1 %v4140_v51 }
 0x560   :  { %v4634_v23 = vpop.f32.mrf.mxu0 }
 0x562   :  { %v4635_v10 = vpop.f32.mrf.mxu0 }
 0x563   :  { %v4636_v0 = vadd.f32 %v4635_v10, %v4634_v23 }
 0x564   :  { %v4637_v45 = vpop.f32.mrf.mxu0 }
 0x565   :  { %v4393_v44 = vadd.f32 %v4636_v0, %v4203_v47 }
 0x566   :  { %v4638_v42 = vpop.f32.mrf.mxu0 }
 0x611   :  { %v4432_v61 = vpop.f32.mrf.mxu1 }
 0x612   :  { %v4433_v53 = vadd.f32 %v4432_v61, %v4393_v44 }
 0x613   :  { %v4434_v30 = vpop.f32.mrf.mxu1 }
 0x614   :  { %v4447_v12 = vadd.f32 %v4446_v19, %v4433_v53 }
 0x615   :  { %v4435_v29 = vpop.f32.mrf.mxu1 }
 0x616   :  { %v4457_v28 = vadd.f32 %v4456_v50, %v4447_v12 }
 0x617   :  { %v4436_v41 = vpop.f32.mrf.mxu1 }
 0x618   :  { %v4467_v26 = vadd.f32 %v4466_v5, %v4457_v28 }
 0x61a   :  { %v4477_v38 = vadd.f32 %v4476_v15, %v4467_v26 }
 0x61c   :  { %v4485_v54 = vadd.f32 %v4612_v13, %v4477_v38 }
 0x61e   :  { %v4486_v20 = vmax.f32 %v4485_v54, 0.0 }
 0x620   :  { %v4487_v16 = vpack.c.bf16 %v4486_v20, %v4486_v20 }
 0x622   :  { %4651 = vmatmul.mubr.msk.bf16.vlgmr.msra.gmra.mxu0 %vm4515_vm4, %v4487_v16 }
 0x6e2   :  { %v4557_v46 = vpop.f32.mrf.mxu0 }
 0x6e3   :  { %v4558_v56 = vadd.f32 %v4613_v40, %v4557_v46 }
 0x6e4   :  { %v4652_v14 = vpop.f32.mrf.mxu0 }
 0x6e5   :  { %4563 = vst [vmem:[%s7091_s13] sm:$0xff] %v4558_v56 }
 0x6e6   :  { %v4560_v62 = vpop.f32.mrf.mxu0 }
 0x6e8   :  { %v4653_v9 = vpop.f32.mrf.mxu0 }

</bundles_post_ra>
